<compile_context>
chip_gen: v7x
topology: tpu7x:2x2x1
jax: 0.10.0
libtpu: 0.0.40
codegen_flags: <defaults>
</compile_context>

<pallas_src>
import functools

import jax
import jax.numpy as jnp
from jax.experimental import pallas as pl
from jax.experimental.pallas import tpu as pltpu


_LANE = 128
_MIB = 1024 * 1024


def _round_up(x, m):
    return ((x + m - 1) // m) * m


def _divisors(n):
    return [d for d in range(1, n + 1) if n % d == 0]


def _sublane_multiple(itemsize):
    # Packed sublane tile height: f32 -> 8, bf16 -> 16, int8/fp8 -> 32.
    return {4: 8, 2: 16, 1: 32}.get(itemsize, 8)


def _hw_params():
    """Return (block_vmem_budget, vmem_limit_cap, min_grid_steps), per chip gen."""
    cap = None
    cores = 0
    try:
        info = pltpu.get_tpu_info()
        cap = int(getattr(info, "vmem_capacity_bytes", 0)) or None
        for attr in ("num_tensorcores", "tensorcores_per_chip", "num_cores",
                     "core_count"):
            val = getattr(info, attr, None)
            if val:
                cores = int(val)
                break
    except Exception:
        pass  # hardware query unavailable / API drift: stay conservative below
    if cap is None:
        # Unknown generation: size for the smallest VMEM (v7x: 64 MiB / TC).
        return 12 * _MIB, 56 * _MIB, 1
    if cap <= 64 * _MIB:
        # v7x: 64 MiB physical per TensorCore; leave compiler/pipeline headroom
        # and make sure both TensorCores get at least one grid step.
        return 12 * _MIB, 56 * _MIB, 2 if cores != 1 else 1
    # v5e / v6e: 128 MiB physical VMEM.  (On v5e the *default scoped* limit is
    # only 16 MiB, so the explicit vmem_limit_bytes below matters.)
    return 28 * _MIB, 100 * _MIB, 2 if cores >= 2 else 1


def _choose_fold(h, w, s):
    """Number of input rows of one plane folded onto the lane axis (divides h).

    Prefer the smallest fold making the *input* row a multiple of 128 lanes
    (then the s*s-wider output row is too); otherwise settle for a
    lane-dense-enough output row.  Planes too small for either are folded
    whole (the tensor is a few KiB, layout is irrelevant there).
    """
    divs = _divisors(h)
    for g in divs:
        if (g * w) % _LANE == 0:
            return g
    for g in divs:
        if (g * w * s * s) % _LANE == 0:
            return g
    for g in divs:
        if g * w * s * s >= _LANE:
            return g
    return h


def _choose_rows_block(rows, w_in, w_out, itemsize, budget, min_steps):
    """Largest row-block (divisor of rows, sublane aligned) under the budget."""
    sub = _sublane_multiple(itemsize)
    row_bytes = (_round_up(w_in, _LANE) + _round_up(w_out, _LANE)) * itemsize
    cands = [d for d in _divisors(rows) if d % sub == 0 or d == rows]
    smallest = min(cands)
    chosen = smallest
    for d in sorted(cands, reverse=True):
        if _round_up(d, sub) * row_bytes > budget and d != smallest:
            continue
        if rows // d < min_steps and d != smallest:
            continue
        chosen = d
        break
    blk_bytes = _round_up(chosen, sub) * row_bytes
    return chosen, blk_bytes


def _upsample_kernel(x_ref, o_ref, *, scale, fold, width):
    # x_ref: (rows_blk, fold * width)
    # o_ref: (rows_blk, fold * scale * width * scale)
    #   output lane index = r*(s*s*W) + a*(s*W) + wi*s + b  (r = folded sub-row,
    #   a = row replica, b = column replica), i.e. the row-major layout of the
    #   (H*s, W*s) output plane -> the wrapper reshape is free.
    s = scale
    cw = width * s  # lane width of one column-replicated input sub-row
    x = x_ref[...]
    # Column (W) replication along the lane axis.
    y = jnp.repeat(x, s, axis=-1)        # (rows_blk, fold * width * s)
    # Row (H) replication, also on the lane axis: each replicated sub-row is
    # stored `s` times at its interleaved chunk offset via static-slice stores
    # (zero-cost views); no s*s-wide concatenated value is materialized.
    # TODO(synk): if the jnp.repeat lane interleave lowers to a VPU select
    # chain and binds at large blocks, move it to a one-hot (W, s*W)
    # replication matmul on the otherwise-idle MXU.
    for r in range(fold):
        sub = y[:, r * cw:(r + 1) * cw]
        for a in range(s):
            off = (r * s + a) * cw
            o_ref[:, off:off + cw] = sub


def upsample_nearest(x, scale_factor=2):
    """Equivalent of F.interpolate(x, scale_factor=s, mode='nearest') on NCHW."""
    if scale_factor <= 1:
        return x
    s_f = float(scale_factor)
    if not s_f.is_integer():
        # TODO(synk): non-integer nearest scale factors (different index math)
        # are not implemented.
        raise NotImplementedError("only integer scale factors are supported")
    s = int(s_f)

    n, c, h, w = x.shape
    itemsize = jnp.dtype(x.dtype).itemsize

    budget, vmem_cap, min_steps = _hw_params()

    fold = _choose_fold(h, w, s)
    rows = (n * c * h) // fold
    w_in = fold * w
    w_out = fold * s * s * w

    rows_blk, blk_bytes = _choose_rows_block(
        rows, w_in, w_out, itemsize, budget, min_steps)
    grid = (rows // rows_blk,)

    # Double-buffered in+out blocks plus headroom for Mosaic internal scratch,
    # capped below the generation's physical VMEM.
    # TODO(synk): if a single (huge-W) row ever exceeds the budget, tile W too.
    vmem_limit = int(min(vmem_cap, max(32 * _MIB, 2 * blk_bytes + 8 * _MIB)))

    # Free (row-major preserving) reshape: fold batch, channel and `fold`
    # consecutive rows of a plane onto two axes (rows, lanes).
    x2 = x.reshape(rows, w_in)

    out2 = pl.pallas_call(
        functools.partial(_upsample_kernel, scale=s, fold=fold, width=w),
        out_shape=jax.ShapeDtypeStruct((rows, w_out), x.dtype),
        grid=grid,
        in_specs=[pl.BlockSpec((rows_blk, w_in), lambda i: (i, 0))],
        # TODO(synk): try pipeline_mode=pl.Buffered(3) on out_specs if a trace
        # shows exposed output DMA at grid-step boundaries.
        out_specs=pl.BlockSpec((rows_blk, w_out), lambda i: (i, 0)),
        compiler_params=pltpu.CompilerParams(
            dimension_semantics=("parallel",),
            vmem_limit_bytes=vmem_limit,
        ),
        cost_estimate=pl.CostEstimate(
            flops=0,
            transcendentals=0,
            bytes_accessed=(1 + s * s) * x.size * itemsize,
        ),
    )(x2)

    # Free reshape back to the NCHW upsampled layout:
    # (rows, fold*s*W*s) row-major == (N, C, H*s, W*s) row-major.
    return out2.reshape(n, c, h * s, w * s)


def _reference_upsample(x, scale_factor=2):
    if scale_factor <= 1:
        return x
    s = int(scale_factor)
    y = jnp.repeat(x, s, axis=2)
    y = jnp.repeat(y, s, axis=3)
    return y


if __name__ == "__main__":
    key = jax.random.PRNGKey(0)

    # Small shapes consistent with the module: batch=2, channels=4, spatial=16.
    x = jax.random.normal(key, (2, 4, 16, 16), dtype=jnp.float32)
    out = jax.block_until_ready(upsample_nearest(x, scale_factor=2))
    ref = _reference_upsample(x, scale_factor=2)
    assert out.shape == (2, 4, 32, 32), out.shape
    assert jnp.array_equal(out, ref), "mismatch with reference (scale=2)"

    # A second, non-default scale factor and odd channel count.
    x2 = jax.random.normal(jax.random.PRNGKey(1), (1, 3, 8, 8), dtype=jnp.float32)
    out2 = jax.block_until_ready(upsample_nearest(x2, scale_factor=3))
    ref2 = _reference_upsample(x2, scale_factor=3)
    assert out2.shape == (1, 3, 24, 24), out2.shape
    assert jnp.array_equal(out2, ref2), "mismatch with reference (scale=3)"

    # scale_factor <= 1 path: identity (matches the PyTorch module).
    ident = jax.block_until_ready(upsample_nearest(x, scale_factor=1))
    assert jnp.array_equal(ident, x)

    print("KERNEL_OK")
</pallas_src>

<mosaic_0001>
module attributes {stable_mosaic.version = 11 : i64} {
  func.func @_upsample_kernel(%arg0: i32, %arg1: memref<16x128xf32, #tpu.memory_space<vmem>>, %arg2: memref<16x512xf32, #tpu.memory_space<vmem>>) attributes {dimension_semantics = [#tpu.dimension_semantics<parallel>], iteration_bounds = array<i64: 1>, scalar_prefetch = 0 : i64, scratch_operands = 0 : i64, tpu.core_type = #tpu.core_type<tc>, window_params = [{transform_indices = @transform_0, window_bounds = array<i64: 16, 128>}, {transform_indices = @transform_1, window_bounds = array<i64: 16, 512>}]} {
    %c0 = arith.constant 0 : index
    %c0_0 = arith.constant 0 : index
    %0 = vector.load %arg1[%c0, %c0_0] : memref<16x128xf32, #tpu.memory_space<vmem>>, vector<16x128xf32>
    %1 = vector.shape_cast %0 : vector<16x128xf32> to vector<16x128x1xf32>
    %2 = vector.broadcast %1 : vector<16x128x1xf32> to vector<16x128x2xf32>
    %3 = vector.shape_cast %2 : vector<16x128x2xf32> to vector<16x256xf32>
    %4 = vector.extract_strided_slice %3 {offsets = [0, 0], sizes = [16, 32], strides = [1, 1]} : vector<16x256xf32> to vector<16x32xf32>
    %c0_1 = arith.constant 0 : index
    %c0_2 = arith.constant 0 : index
    %5 = vector.load %arg2[%c0_1, %c0_2] : memref<16x512xf32, #tpu.memory_space<vmem>>, vector<16x32xf32>
    tpu.vector_store %arg2[%c0_1, %c0_2], %4 {strides = array<i32>} : memref<16x512xf32, #tpu.memory_space<vmem>>, vector<16x32xf32>,
    %c0_3 = arith.constant 0 : index
    %c32 = arith.constant 32 : index
    %6 = vector.load %arg2[%c0_3, %c32] : memref<16x512xf32, #tpu.memory_space<vmem>>, vector<16x32xf32>
    tpu.vector_store %arg2[%c0_3, %c32], %4 {strides = array<i32>} : memref<16x512xf32, #tpu.memory_space<vmem>>, vector<16x32xf32>,
    %7 = vector.extract_strided_slice %3 {offsets = [0, 32], sizes = [16, 32], strides = [1, 1]} : vector<16x256xf32> to vector<16x32xf32>
    %c0_4 = arith.constant 0 : index
    %c64 = arith.constant 64 : index
    %8 = vector.load %arg2[%c0_4, %c64] : memref<16x512xf32, #tpu.memory_space<vmem>>, vector<16x32xf32>
    tpu.vector_store %arg2[%c0_4, %c64], %7 {strides = array<i32>} : memref<16x512xf32, #tpu.memory_space<vmem>>, vector<16x32xf32>,
    %c0_5 = arith.constant 0 : index
    %c96 = arith.constant 96 : index
    %9 = vector.load %arg2[%c0_5, %c96] : memref<16x512xf32, #tpu.memory_space<vmem>>, vector<16x32xf32>
    tpu.vector_store %arg2[%c0_5, %c96], %7 {strides = array<i32>} : memref<16x512xf32, #tpu.memory_space<vmem>>, vector<16x32xf32>,
    %10 = vector.extract_strided_slice %3 {offsets = [0, 64], sizes = [16, 32], strides = [1, 1]} : vector<16x256xf32> to vector<16x32xf32>
    %c0_6 = arith.constant 0 : index
    %c128 = arith.constant 128 : index
    %11 = vector.load %arg2[%c0_6, %c128] : memref<16x512xf32, #tpu.memory_space<vmem>>, vector<16x32xf32>
    tpu.vector_store %arg2[%c0_6, %c128], %10 {strides = array<i32>} : memref<16x512xf32, #tpu.memory_space<vmem>>, vector<16x32xf32>,
    %c0_7 = arith.constant 0 : index
    %c160 = arith.constant 160 : index
    %12 = vector.load %arg2[%c0_7, %c160] : memref<16x512xf32, #tpu.memory_space<vmem>>, vector<16x32xf32>
    tpu.vector_store %arg2[%c0_7, %c160], %10 {strides = array<i32>} : memref<16x512xf32, #tpu.memory_space<vmem>>, vector<16x32xf32>,
    %13 = vector.extract_strided_slice %3 {offsets = [0, 96], sizes = [16, 32], strides = [1, 1]} : vector<16x256xf32> to vector<16x32xf32>
    %c0_8 = arith.constant 0 : index
    %c192 = arith.constant 192 : index
    %14 = vector.load %arg2[%c0_8, %c192] : memref<16x512xf32, #tpu.memory_space<vmem>>, vector<16x32xf32>
    tpu.vector_store %arg2[%c0_8, %c192], %13 {strides = array<i32>} : memref<16x512xf32, #tpu.memory_space<vmem>>, vector<16x32xf32>,
    %c0_9 = arith.constant 0 : index
    %c224 = arith.constant 224 : index
    %15 = vector.load %arg2[%c0_9, %c224] : memref<16x512xf32, #tpu.memory_space<vmem>>, vector<16x32xf32>
    tpu.vector_store %arg2[%c0_9, %c224], %13 {strides = array<i32>} : memref<16x512xf32, #tpu.memory_space<vmem>>, vector<16x32xf32>,
    %16 = vector.extract_strided_slice %3 {offsets = [0, 128], sizes = [16, 32], strides = [1, 1]} : vector<16x256xf32> to vector<16x32xf32>
    %c0_10 = arith.constant 0 : index
    %c256 = arith.constant 256 : index
    %17 = vector.load %arg2[%c0_10, %c256] : memref<16x512xf32, #tpu.memory_space<vmem>>, vector<16x32xf32>
    tpu.vector_store %arg2[%c0_10, %c256], %16 {strides = array<i32>} : memref<16x512xf32, #tpu.memory_space<vmem>>, vector<16x32xf32>,
    %c0_11 = arith.constant 0 : index
    %c288 = arith.constant 288 : index
    %18 = vector.load %arg2[%c0_11, %c288] : memref<16x512xf32, #tpu.memory_space<vmem>>, vector<16x32xf32>
    tpu.vector_store %arg2[%c0_11, %c288], %16 {strides = array<i32>} : memref<16x512xf32, #tpu.memory_space<vmem>>, vector<16x32xf32>,
    %19 = vector.extract_strided_slice %3 {offsets = [0, 160], sizes = [16, 32], strides = [1, 1]} : vector<16x256xf32> to vector<16x32xf32>
    %c0_12 = arith.constant 0 : index
    %c320 = arith.constant 320 : index
    %20 = vector.load %arg2[%c0_12, %c320] : memref<16x512xf32, #tpu.memory_space<vmem>>, vector<16x32xf32>
    tpu.vector_store %arg2[%c0_12, %c320], %19 {strides = array<i32>} : memref<16x512xf32, #tpu.memory_space<vmem>>, vector<16x32xf32>,
    %c0_13 = arith.constant 0 : index
    %c352 = arith.constant 352 : index
    %21 = vector.load %arg2[%c0_13, %c352] : memref<16x512xf32, #tpu.memory_space<vmem>>, vector<16x32xf32>
    tpu.vector_store %arg2[%c0_13, %c352], %19 {strides = array<i32>} : memref<16x512xf32, #tpu.memory_space<vmem>>, vector<16x32xf32>,
    %22 = vector.extract_strided_slice %3 {offsets = [0, 192], sizes = [16, 32], strides = [1, 1]} : vector<16x256xf32> to vector<16x32xf32>
    %c0_14 = arith.constant 0 : index
    %c384 = arith.constant 384 : index
    %23 = vector.load %arg2[%c0_14, %c384] : memref<16x512xf32, #tpu.memory_space<vmem>>, vector<16x32xf32>
    tpu.vector_store %arg2[%c0_14, %c384], %22 {strides = array<i32>} : memref<16x512xf32, #tpu.memory_space<vmem>>, vector<16x32xf32>,
    %c0_15 = arith.constant 0 : index
    %c416 = arith.constant 416 : index
    %24 = vector.load %arg2[%c0_15, %c416] : memref<16x512xf32, #tpu.memory_space<vmem>>, vector<16x32xf32>
    tpu.vector_store %arg2[%c0_15, %c416], %22 {strides = array<i32>} : memref<16x512xf32, #tpu.memory_space<vmem>>, vector<16x32xf32>,
    %25 = vector.extract_strided_slice %3 {offsets = [0, 224], sizes = [16, 32], strides = [1, 1]} : vector<16x256xf32> to vector<16x32xf32>
    %c0_16 = arith.constant 0 : index
    %c448 = arith.constant 448 : index
    %26 = vector.load %arg2[%c0_16, %c448] : memref<16x512xf32, #tpu.memory_space<vmem>>, vector<16x32xf32>
    tpu.vector_store %arg2[%c0_16, %c448], %25 {strides = array<i32>} : memref<16x512xf32, #tpu.memory_space<vmem>>, vector<16x32xf32>,
    %c0_17 = arith.constant 0 : index
    %c480 = arith.constant 480 : index
    %27 = vector.load %arg2[%c0_17, %c480] : memref<16x512xf32, #tpu.memory_space<vmem>>, vector<16x32xf32>
    tpu.vector_store %arg2[%c0_17, %c480], %25 {strides = array<i32>} : memref<16x512xf32, #tpu.memory_space<vmem>>, vector<16x32xf32>,
    return
  }
  func.func @transform_0(%arg0: i32) -> (i32, i32) {
    %c0_i32 = arith.constant 0 : i32
    %c0_i32_0 = arith.constant 0 : i32
    return %arg0, %c0_i32 : i32, i32
  }
  func.func @transform_1(%arg0: i32) -> (i32, i32) {
    %c0_i32 = arith.constant 0 : i32
    %c0_i32_0 = arith.constant 0 : i32
    return %arg0, %c0_i32 : i32, i32
  }
}

</mosaic_0001>

<bundles_post_ra>
// kernel: tpu_custom_call.1
= control target key start
LH: loop header
LB: loop body
LE: loop exit
PB: predicated region body
PF: predicated region fallthrough
CT: control target
= control target key end

     0   :  { %6 = vsyncpa [#allocation3], 0  ;;  %s10249_s0 = inlined_call_operand.hbm [shape: f32[16,128], index: 0, kind: input, shape index: {}]   ;;  %s10250_s1 = inlined_call_operand.hbm [shape: f32[16,512], index: 1, kind: output, shape index: {}]  }
   0x1   :  { %7 = vsyncpa [#allocation4], 0  ;;  %s6981_s6 = smov [#allocation2]   ;;  %s6933_s10 = scalar_lea.hbm %s10249_s0, 256 }
   0x2   :  { %s13_s7 = sshll.u32 %s6981_s6, 4  ;;  %p6934_p0 = scmp.ne.s32.totalorder %s10249_s0, %s6933_s10  ;;  %s14_s7 = int_to_ptr.vmem [resolvable:$true] %s13_s7 }
   0x3   :  { %p6937_p1 = scmp.lt.u32.totalorder %s6933_s10, %s10249_s0 }
   0x5   :  { %p6939_p2 = pnand %p6937_p1, %p6934_p0 }
   0x7   :  { %6942 = shalt.err (!%p6939_p2)
}
   0x8   :  { %s6943_s15 = scalar_lea.vmem %s14_s7, 256  ;;  %p6948_p4 = scmp.lt.s32.totalorder %s14_s7, %s14_s7 }
   0x9   :  { %p6944_p3 = scmp.ne.s32.totalorder %s14_s7, %s6943_s15  ;;  %p6949_p5 = scmp.lt.s32.totalorder %s6943_s15, %s6943_s15 }
   0xb   :  { %p6950_p6 = por %p6949_p5, %p6948_p4 }
   0xd   :  { %p6951_p7 = pnand %p6950_p6, %p6944_p3 }
   0xf   :  { %6954 = shalt.err (!%p6951_p7)
}
  0x10   :  { %s6982_s16 = smov 128   ;;  %s6983_s17 = smov 8  }
  0x11   :  { %19 = dma.hbm_to_vmem [thread:$0]  %s10249_s0, 256, %s14_s7, [#allocation3], %s6982_s16, %s6982_s16, %s6983_s17  }
  0x12   :  { %6977 = dma.done.wait [#allocation3], 256  }
  0x13   :  { %6978 = vsyncadd [#allocation3], 4294967040  ;;  %v25_v0 = vlaneseq  ;;  %v7076_v3 = vld [vmem:[#allocation2] sm:$0xff]  ;;  %s6986_s0 = smov 2   ;;  %s6987_s20 = smov 4   ;;  %vm6457_vm0 = vcmask 15360  }
  0x14   :  { %s6988_s21 = smov 6   ;;  %s10457_s22 = smov 10   ;;  %vm6460_vm1 = vcmask 31744   ;;  %vm6463_vm2 = vcmask 48128   ;;  %vm6466_vm3 = vcmask 64512   ;;  %vm6469_vm4 = vcmask 80896  }
  0x15   :  { %v7073_v1 = vshrl.u32 %v25_v0, 7  ;;  %s10461_s23 = smov 12   ;;  %s10463_s24 = smov 14   ;;  %vm6472_vm5 = vcmask 97280   ;;  %vm6475_vm6 = vcmask 113664   ;;  %vm10634_vm7 = vcmask 130048  }
  0x16   :  { %s10465_s25 = smov 16   ;;  %s10467_s26 = smov 18   ;;  %vm10635_vm8 = vcmask 146432   ;;  %vm10571_vm9 = vcmask 162816   ;;  %vm10565_vm10 = vcmask 179200   ;;  %vm10563_vm11 = vcmask 195584  }
  0x17   :  { %v10257_v2 = vsub.s32 0, %v7073_v1  ;;  %v10256_v5 = vsub.s32 1, %v7073_v1  ;;  %v10255_v7 = vsub.s32 2, %v7073_v1  ;;  %v10254_v9 = vsub.s32 3, %v7073_v1  ;;  %s10469_s27 = smov 20   ;;  %s10471_s28 = smov 22  }
  0x18   :  { %v10253_v15 = vsub.s32 4, %v7073_v1  ;;  %v10252_v33 = vsub.s32 5, %v7073_v1  ;;  %v10251_v51 = vsub.s32 6, %v7073_v1  ;;  %s10476_s29 = smov 24   ;;  %s10478_s30 = smov 26   ;;  %vm10564_vm12 = vcmask 211968  }
  0x19   :  { %v28_v4 = vrot.slane %v7076_v3, %v10257_v2  ;;  %v95_v6 = vrot.slane %v7076_v3, %v10256_v5  ;;  %v162_v8 = vrot.slane %v7076_v3, %v10255_v7  ;;  %v229_v10 = vrot.slane %v7076_v3, %v10254_v9  ;;  %s10482_s2 = smov 28   ;;  %s10484_s3 = smov 30  }
  0x1a   :  { %v296_v18 = vrot.slane %v7076_v3, %v10253_v15  ;;  %v363_v36 = vrot.slane %v7076_v3, %v10252_v33  ;;  %v430_v54 = vrot.slane %v7076_v3, %v10251_v51  ;;  %s10486_s4 = smov 32   ;;  %s10488_s5 = smov 34   ;;  %vm10569_vm13 = vcmask 228352  }
  0x1b   :  { %38 = vbcast.lane.b32.xlu1 %v28_v4, 272  ;;  %30 = vbcast.lane.b32.xlu0 %v28_v4, 256  ;;  %s10490_s6 = smov 36   ;;  %s10495_s7 = smov 38   ;;  %vm10568_vm14 = vcmask 244736   ;;  %vm6502_vm15 = vcmask 261120  }
  0x1c   :  { %s10497_s8 = smov 40   ;;  %s10500_s9 = smov 42  }
  0x1d   :  { %s10502_s10 = smov 44   ;;  %s10504_s11 = smov 46  }
  0x1e   :  { %s10506_s12 = smov 48   ;;  %s10508_s13 = smov 50  }
  0x1f   :  { %42 = vbcast.lane.b32.xlu1 %v28_v4, 280  ;;  %34 = vbcast.lane.b32.xlu0 %v28_v4, 264  ;;  %s10510_s14 = smov 52   ;;  %s10518_s15 = smov 54  }
  0x20   :  { %s10515_s16 = smov 56   ;;  %s10520_s18 = smov 58  }
  0x21   :  { %s10524_s19 = smov 60  }
  0x23   :  { %50 = vbcast.lane.b32.xlu1 %v28_v4, 296  ;;  %46 = vbcast.lane.b32.xlu0 %v28_v4, 288 }
  0x27   :  { %58 = vbcast.lane.b32.xlu1 %v28_v4, 312  ;;  %54 = vbcast.lane.b32.xlu0 %v28_v4, 304 }
  0x2b   :  { %66 = vbcast.lane.b32.xlu1 %v28_v4, 328  ;;  %62 = vbcast.lane.b32.xlu0 %v28_v4, 320 }
  0x2f   :  { %74 = vbcast.lane.b32.xlu1 %v28_v4, 344  ;;  %70 = vbcast.lane.b32.xlu0 %v28_v4, 336 }
  0x33   :  { %82 = vbcast.lane.b32.xlu1 %v28_v4, 360  ;;  %78 = vbcast.lane.b32.xlu0 %v28_v4, 352 }
  0x37   :  { %90 = vbcast.lane.b32.xlu1 %v28_v4, 376  ;;  %86 = vbcast.lane.b32.xlu0 %v28_v4, 368 }
  0x3b   :  { %101 = vbcast.lane.b32.xlu1 %v95_v6, 264  ;;  %97 = vbcast.lane.b32.xlu0 %v95_v6, 256 }
  0x3f   :  { %109 = vbcast.lane.b32.xlu1 %v95_v6, 280  ;;  %105 = vbcast.lane.b32.xlu0 %v95_v6, 272 }
  0x43   :  { %117 = vbcast.lane.b32.xlu1 %v95_v6, 296  ;;  %113 = vbcast.lane.b32.xlu0 %v95_v6, 288 }
  0x47   :  { %125 = vbcast.lane.b32.xlu1 %v95_v6, 312  ;;  %121 = vbcast.lane.b32.xlu0 %v95_v6, 304 }
  0x4b   :  { %133 = vbcast.lane.b32.xlu1 %v95_v6, 328  ;;  %129 = vbcast.lane.b32.xlu0 %v95_v6, 320 }
  0x4f   :  { %141 = vbcast.lane.b32.xlu1 %v95_v6, 344  ;;  %137 = vbcast.lane.b32.xlu0 %v95_v6, 336 }
  0x53   :  { %149 = vbcast.lane.b32.xlu1 %v95_v6, 360  ;;  %145 = vbcast.lane.b32.xlu0 %v95_v6, 352 }
  0x57   :  { %157 = vbcast.lane.b32.xlu1 %v95_v6, 376  ;;  %153 = vbcast.lane.b32.xlu0 %v95_v6, 368 }
  0x5b   :  { %168 = vbcast.lane.b32.xlu1 %v162_v8, 264  ;;  %164 = vbcast.lane.b32.xlu0 %v162_v8, 256 }
  0x5f   :  { %176 = vbcast.lane.b32.xlu1 %v162_v8, 280  ;;  %172 = vbcast.lane.b32.xlu0 %v162_v8, 272 }
  0x63   :  { %184 = vbcast.lane.b32.xlu1 %v162_v8, 296  ;;  %180 = vbcast.lane.b32.xlu0 %v162_v8, 288 }
  0x67   :  { %192 = vbcast.lane.b32.xlu1 %v162_v8, 312  ;;  %188 = vbcast.lane.b32.xlu0 %v162_v8, 304 }
  0x6b   :  { %200 = vbcast.lane.b32.xlu1 %v162_v8, 328  ;;  %196 = vbcast.lane.b32.xlu0 %v162_v8, 320 }
  0x6f   :  { %208 = vbcast.lane.b32.xlu1 %v162_v8, 344  ;;  %204 = vbcast.lane.b32.xlu0 %v162_v8, 336 }
  0x73   :  { %216 = vbcast.lane.b32.xlu1 %v162_v8, 360  ;;  %212 = vbcast.lane.b32.xlu0 %v162_v8, 352 }
  0x77   :  { %224 = vbcast.lane.b32.xlu1 %v162_v8, 376  ;;  %220 = vbcast.lane.b32.xlu0 %v162_v8, 368 }
  0x7b   :  { %235 = vbcast.lane.b32.xlu1 %v229_v10, 264  ;;  %231 = vbcast.lane.b32.xlu0 %v229_v10, 256 }
  0x7f   :  { %243 = vbcast.lane.b32.xlu1 %v229_v10, 280  ;;  %239 = vbcast.lane.b32.xlu0 %v229_v10, 272 }
  0x83   :  { %251 = vbcast.lane.b32.xlu1 %v229_v10, 296  ;;  %247 = vbcast.lane.b32.xlu0 %v229_v10, 288 }
  0x87   :  { %259 = vbcast.lane.b32.xlu1 %v229_v10, 312  ;;  %255 = vbcast.lane.b32.xlu0 %v229_v10, 304 }
  0x8b   :  { %267 = vbcast.lane.b32.xlu1 %v229_v10, 328  ;;  %263 = vbcast.lane.b32.xlu0 %v229_v10, 320 }
  0x8d   :  { %v7093_v11 = vpop.permute.xlu1 %38  ;;  %v7095_v12 = vpop.permute.xlu0 %30 }
  0x8f   :  { %275 = vbcast.lane.b32.xlu1 %v229_v10, 344  ;;  %271 = vbcast.lane.b32.xlu0 %v229_v10, 336 }
  0x91   :  { %v7097_v13 = vpop.permute.xlu1 %42  ;;  %v7099_v14 = vpop.permute.xlu0 %34 }
  0x93   :  { %283 = vbcast.lane.b32.xlu1 %v229_v10, 360  ;;  %279 = vbcast.lane.b32.xlu0 %v229_v10, 352 }
  0x95   :  { %v7102_v16 = vpop.permute.xlu1 %50  ;;  %v7104_v17 = vpop.permute.xlu0 %46 }
  0x96   :  { %10636 = vst [vmem:[#allocation8_spill] sm:$0xff] %v7102_v16  ;;  %10637 = vst [vmem:[#allocation9_spill] sm:$0xff] %v7104_v17 }
  0x97   :  { %291 = vbcast.lane.b32.xlu1 %v229_v10, 376  ;;  %287 = vbcast.lane.b32.xlu0 %v229_v10, 368 }
  0x99   :  { %v7109_v19 = vpop.permute.xlu1 %58  ;;  %v7111_v20 = vpop.permute.xlu0 %54 }
  0x9a   :  { %10638 = vst [vmem:[#allocation10_spill] sm:$0xff] %v7109_v19  ;;  %10639 = vst [vmem:[#allocation11_spill] sm:$0xff] %v7111_v20 }
  0x9b   :  { %302 = vbcast.lane.b32.xlu1 %v296_v18, 264  ;;  %298 = vbcast.lane.b32.xlu0 %v296_v18, 256 }
  0x9d   :  { %v7113_v21 = vpop.permute.xlu1 %66  ;;  %v7115_v22 = vpop.permute.xlu0 %62 }
  0x9e   :  { %10640 = vst [vmem:[#allocation12_spill] sm:$0xff] %v7113_v21  ;;  %10641 = vst [vmem:[#allocation13_spill] sm:$0xff] %v7115_v22 }
  0x9f   :  { %310 = vbcast.lane.b32.xlu1 %v296_v18, 280  ;;  %306 = vbcast.lane.b32.xlu0 %v296_v18, 272 }
  0xa1   :  { %v7117_v23 = vpop.permute.xlu1 %74  ;;  %v7119_v24 = vpop.permute.xlu0 %70 }
  0xa2   :  { %10642 = vst [vmem:[#allocation14_spill] sm:$0xff] %v7117_v23  ;;  %10643 = vst [vmem:[#allocation15_spill] sm:$0xff] %v7119_v24 }
  0xa3   :  { %318 = vbcast.lane.b32.xlu1 %v296_v18, 296  ;;  %314 = vbcast.lane.b32.xlu0 %v296_v18, 288 }
  0xa5   :  { %v7121_v25 = vpop.permute.xlu1 %82  ;;  %v7123_v26 = vpop.permute.xlu0 %78 }
  0xa6   :  { %10644 = vst [vmem:[#allocation16_spill] sm:$0xff] %v7121_v25  ;;  %10645 = vst [vmem:[#allocation17_spill] sm:$0xff] %v7123_v26  ;;  %v7245_v25 = vld [vmem:[#allocation2 + $0x8] sm:$0xff] }
  0xa7   :  { %326 = vbcast.lane.b32.xlu1 %v296_v18, 312  ;;  %322 = vbcast.lane.b32.xlu0 %v296_v18, 304 }
  0xa9   :  { %v7125_v27 = vpop.permute.xlu1 %90  ;;  %v7127_v28 = vpop.permute.xlu0 %86 }
  0xaa   :  { %10646 = vst [vmem:[#allocation18_spill] sm:$0xff] %v7125_v27  ;;  %10647 = vst [vmem:[#allocation19_spill] sm:$0xff] %v7127_v28 }
  0xab   :  { %334 = vbcast.lane.b32.xlu1 %v296_v18, 328  ;;  %330 = vbcast.lane.b32.xlu0 %v296_v18, 320 }
  0xad   :  { %v7129_v29 = vpop.permute.xlu1 %101  ;;  %v7131_v30 = vpop.permute.xlu0 %97 }
  0xaf   :  { %342 = vbcast.lane.b32.xlu1 %v296_v18, 344  ;;  %338 = vbcast.lane.b32.xlu0 %v296_v18, 336 }
  0xb1   :  { %v7133_v31 = vpop.permute.xlu1 %109  ;;  %v7135_v32 = vpop.permute.xlu0 %105 }
  0xb3   :  { %350 = vbcast.lane.b32.xlu1 %v296_v18, 360  ;;  %346 = vbcast.lane.b32.xlu0 %v296_v18, 352 }
  0xb5   :  { %v7138_v34 = vpop.permute.xlu1 %117  ;;  %v7140_v35 = vpop.permute.xlu0 %113 }
  0xb6   :  { %10648 = vst [vmem:[#allocation20_spill] sm:$0xff] %v7138_v34 }
  0xb7   :  { %358 = vbcast.lane.b32.xlu1 %v296_v18, 376  ;;  %354 = vbcast.lane.b32.xlu0 %v296_v18, 368  ;;  %v10259_v18 = vsub.s32 7, %v7073_v1 }
  0xb9   :  { %v7145_v37 = vpop.permute.xlu1 %125  ;;  %v7147_v38 = vpop.permute.xlu0 %121  ;;  %v497_v33 = vrot.slane %v7076_v3, %v10259_v18 }
  0xba   :  { %10649 = vst [vmem:[#allocation21_spill] sm:$0xff] %v7145_v37  ;;  %10650 = vst [vmem:[#allocation22_spill] sm:$0xff] %v7147_v38 }
  0xbb   :  { %369 = vbcast.lane.b32.xlu1 %v363_v36, 264  ;;  %365 = vbcast.lane.b32.xlu0 %v363_v36, 256 }
  0xbd   :  { %v7149_v39 = vpop.permute.xlu1 %133  ;;  %v7151_v40 = vpop.permute.xlu0 %129 }
  0xbe   :  { %10651 = vst [vmem:[#allocation23_spill] sm:$0xff] %v7149_v39  ;;  %10652 = vst [vmem:[#allocation24_spill] sm:$0xff] %v7151_v40 }
  0xbf   :  { %377 = vbcast.lane.b32.xlu1 %v363_v36, 280  ;;  %373 = vbcast.lane.b32.xlu0 %v363_v36, 272 }
  0xc1   :  { %v7153_v41 = vpop.permute.xlu1 %141  ;;  %v7155_v42 = vpop.permute.xlu0 %137 }
  0xc2   :  { %10653 = vst [vmem:[#allocation25_spill] sm:$0xff] %v7153_v41  ;;  %10654 = vst [vmem:[#allocation26_spill] sm:$0xff] %v7155_v42 }
  0xc3   :  { %385 = vbcast.lane.b32.xlu1 %v363_v36, 296  ;;  %381 = vbcast.lane.b32.xlu0 %v363_v36, 288 }
  0xc5   :  { %v7157_v43 = vpop.permute.xlu1 %149  ;;  %v7159_v44 = vpop.permute.xlu0 %145 }
  0xc6   :  { %10655 = vst [vmem:[#allocation27_spill] sm:$0xff] %v7157_v43  ;;  %10656 = vst [vmem:[#allocation28_spill] sm:$0xff] %v7159_v44 }
  0xc7   :  { %393 = vbcast.lane.b32.xlu1 %v363_v36, 312  ;;  %389 = vbcast.lane.b32.xlu0 %v363_v36, 304 }
  0xc9   :  { %v7161_v45 = vpop.permute.xlu1 %157  ;;  %v7163_v46 = vpop.permute.xlu0 %153 }
  0xca   :  { %10657 = vst [vmem:[#allocation29_spill] sm:$0xff] %v7161_v45  ;;  %10658 = vst [vmem:[#allocation30_spill] sm:$0xff] %v7163_v46 }
  0xcb   :  { %401 = vbcast.lane.b32.xlu1 %v363_v36, 328  ;;  %397 = vbcast.lane.b32.xlu0 %v363_v36, 320 }
  0xcd   :  { %v7165_v47 = vpop.permute.xlu1 %168  ;;  %v7167_v48 = vpop.permute.xlu0 %164 }
  0xcf   :  { %409 = vbcast.lane.b32.xlu1 %v363_v36, 344  ;;  %405 = vbcast.lane.b32.xlu0 %v363_v36, 336 }
  0xd1   :  { %v7169_v49 = vpop.permute.xlu1 %176  ;;  %v7171_v50 = vpop.permute.xlu0 %172 }
  0xd3   :  { %417 = vbcast.lane.b32.xlu1 %v363_v36, 360  ;;  %413 = vbcast.lane.b32.xlu0 %v363_v36, 352 }
  0xd5   :  { %v7174_v52 = vpop.permute.xlu1 %184  ;;  %v7176_v53 = vpop.permute.xlu0 %180 }
  0xd6   :  { %10659 = vst [vmem:[#allocation31_spill] sm:$0xff] %v7174_v52  ;;  %10660 = vst [vmem:[#allocation32_spill] sm:$0xff] %v7176_v53 }
  0xd7   :  { %425 = vbcast.lane.b32.xlu1 %v363_v36, 376  ;;  %421 = vbcast.lane.b32.xlu0 %v363_v36, 368 }
  0xd9   :  { %v7181_v55 = vpop.permute.xlu1 %192  ;;  %v7183_v56 = vpop.permute.xlu0 %188 }
  0xda   :  { %10661 = vst [vmem:[#allocation33_spill] sm:$0xff] %v7181_v55  ;;  %10662 = vst [vmem:[#allocation34_spill] sm:$0xff] %v7183_v56  ;;  %v6984_v56 = vmov 1983009808  }
  0xdb   :  { %436 = vbcast.lane.b32.xlu1 %v430_v54, 264  ;;  %432 = vbcast.lane.b32.xlu0 %v430_v54, 256 }
  0xdd   :  { %v7185_v57 = vpop.permute.xlu1 %200  ;;  %v7187_v58 = vpop.permute.xlu0 %196 }
  0xde   :  { %10663 = vst [vmem:[#allocation35_spill] sm:$0xff] %v7185_v57  ;;  %10664 = vst [vmem:[#allocation36_spill] sm:$0xff] %v7187_v58 }
  0xdf   :  { %444 = vbcast.lane.b32.xlu1 %v430_v54, 280  ;;  %440 = vbcast.lane.b32.xlu0 %v430_v54, 272 }
  0xe1   :  { %v7189_v59 = vpop.permute.xlu1 %208  ;;  %v7191_v60 = vpop.permute.xlu0 %204 }
  0xe2   :  { %10665 = vst [vmem:[#allocation37_spill] sm:$0xff] %v7189_v59  ;;  %10666 = vst [vmem:[#allocation38_spill] sm:$0xff] %v7191_v60 }
  0xe3   :  { %452 = vbcast.lane.b32.xlu1 %v430_v54, 296  ;;  %448 = vbcast.lane.b32.xlu0 %v430_v54, 288 }
  0xe5   :  { %v7193_v61 = vpop.permute.xlu1 %216  ;;  %v7195_v62 = vpop.permute.xlu0 %212 }
  0xe6   :  { %10667 = vst [vmem:[#allocation39_spill] sm:$0xff] %v7193_v61  ;;  %10668 = vst [vmem:[#allocation40_spill] sm:$0xff] %v7195_v62 }
  0xe7   :  { %460 = vbcast.lane.b32.xlu1 %v430_v54, 312  ;;  %456 = vbcast.lane.b32.xlu0 %v430_v54, 304 }
  0xe9   :  { %v7197_v63 = vpop.permute.xlu1 %224  ;;  %v7199_v0 = vpop.permute.xlu0 %220 }
  0xea   :  { %10669 = vst [vmem:[#allocation41_spill] sm:$0xff] %v7197_v63  ;;  %10670 = vst [vmem:[#allocation42_spill] sm:$0xff] %v7199_v0 }
  0xeb   :  { %468 = vbcast.lane.b32.xlu1 %v430_v54, 328  ;;  %464 = vbcast.lane.b32.xlu0 %v430_v54, 320 }
  0xed   :  { %v7201_v4 = vpop.permute.xlu1 %235  ;;  %v7203_v6 = vpop.permute.xlu0 %231 }
  0xee   :  { %v1113_v38 = vcombine.low %v7131_v30, %v7203_v6 }
  0xef   :  { %476 = vbcast.lane.b32.xlu1 %v430_v54, 344  ;;  %472 = vbcast.lane.b32.xlu0 %v430_v54, 336 }
  0xf1   :  { %v7205_v8 = vpop.permute.xlu1 %243  ;;  %v7207_v10 = vpop.permute.xlu0 %239 }
  0xf3   :  { %484 = vbcast.lane.b32.xlu1 %v430_v54, 360  ;;  %480 = vbcast.lane.b32.xlu0 %v430_v54, 352 }
  0xf5   :  { %v7210_v36 = vpop.permute.xlu1 %251  ;;  %v7212_v51 = vpop.permute.xlu0 %247 }
  0xf6   :  { %10671 = vst [vmem:[#allocation43_spill] sm:$0xff] %v7210_v36  ;;  %v10721_v36 = vsub.s32 3, %v7073_v1 }
  0xf7   :  { %492 = vbcast.lane.b32.xlu1 %v430_v54, 376  ;;  %488 = vbcast.lane.b32.xlu0 %v430_v54, 368 }
  0xf9   :  { %v7217_v15 = vpop.permute.xlu1 %259  ;;  %v7219_v9 = vpop.permute.xlu0 %255 }
  0xfa   :  { %10672 = vst [vmem:[#allocation44_spill] sm:$0xff] %v7217_v15  ;;  %10673 = vst [vmem:[#allocation45_spill] sm:$0xff] %v7219_v9 }
  0xfb   :  { %503 = vbcast.lane.b32.xlu1 %v497_v33, 264  ;;  %499 = vbcast.lane.b32.xlu0 %v497_v33, 256 }
  0xfd   :  { %v7221_v7 = vpop.permute.xlu1 %267  ;;  %v7223_v5 = vpop.permute.xlu0 %263 }
  0xfe   :  { %10674 = vst [vmem:[#allocation46_spill] sm:$0xff] %v7221_v7  ;;  %10675 = vst [vmem:[#allocation47_spill] sm:$0xff] %v7223_v5 }
  0xff   :  { %511 = vbcast.lane.b32.xlu1 %v497_v33, 280  ;;  %507 = vbcast.lane.b32.xlu0 %v497_v33, 272 }
 0x101   :  { %v7225_v2 = vpop.permute.xlu1 %275  ;;  %v7227_v27 = vpop.permute.xlu0 %271 }
 0x102   :  { %10676 = vst [vmem:[#allocation48_spill] sm:$0xff] %v7225_v2  ;;  %10677 = vst [vmem:[#allocation49_spill] sm:$0xff] %v7227_v27 }
 0x103   :  { %519 = vbcast.lane.b32.xlu1 %v497_v33, 296  ;;  %515 = vbcast.lane.b32.xlu0 %v497_v33, 288 }
 0x105   :  { %v7229_v3 = vpop.permute.xlu1 %283  ;;  %v7231_v54 = vpop.permute.xlu0 %279 }
 0x106   :  { %10678 = vst [vmem:[#allocation50_spill] sm:$0xff] %v7229_v3  ;;  %10679 = vst [vmem:[#allocation51_spill] sm:$0xff] %v7231_v54 }
 0x107   :  { %527 = vbcast.lane.b32.xlu1 %v497_v33, 312  ;;  %523 = vbcast.lane.b32.xlu0 %v497_v33, 304 }
 0x109   :  { %v7233_v18 = vpop.permute.xlu1 %291  ;;  %v7235_v63 = vpop.permute.xlu0 %287 }
 0x10a   :  { %10680 = vst [vmem:[#allocation52_spill] sm:$0xff] %v7233_v18  ;;  %10681 = vst [vmem:[#allocation53_spill] sm:$0xff] %v7235_v63  ;;  %v10683_v63 = vsub.s32 0, %v7073_v1 }
 0x10b   :  { %535 = vbcast.lane.b32.xlu1 %v497_v33, 328  ;;  %531 = vbcast.lane.b32.xlu0 %v497_v33, 320 }
 0x10c   :  { %v564_v43 = vrot.slane %v7245_v25, %v10683_v63 }
 0x10d   :  { %v7237_v45 = vpop.permute.xlu1 %302  ;;  %v7239_v46 = vpop.permute.xlu0 %298 }
 0x10f   :  { %543 = vbcast.lane.b32.xlu1 %v497_v33, 344  ;;  %539 = vbcast.lane.b32.xlu0 %v497_v33, 336 }
 0x111   :  { %v7241_v28 = vpop.permute.xlu1 %310  ;;  %v7243_v0 = vpop.permute.xlu0 %306 }
 0x113   :  { %551 = vbcast.lane.b32.xlu1 %v497_v33, 360  ;;  %547 = vbcast.lane.b32.xlu0 %v497_v33, 352 }
 0x115   :  { %v7247_v61 = vpop.permute.xlu1 %318  ;;  %v7249_v18 = vpop.permute.xlu0 %314 }
 0x116   :  { %10682 = vst [vmem:[#allocation54_spill] sm:$0xff] %v7247_v61 }
 0x117   :  { %559 = vbcast.lane.b32.xlu1 %v497_v33, 376  ;;  %555 = vbcast.lane.b32.xlu0 %v497_v33, 368 }
 0x119   :  { %v7254_v3 = vpop.permute.xlu1 %326  ;;  %v7256_v44 = vpop.permute.xlu0 %322 }
 0x11a   :  { %10684 = vst [vmem:[#allocation55_spill] sm:$0xff] %v7254_v3  ;;  %10685 = vst [vmem:[#allocation56_spill] sm:$0xff] %v7256_v44  ;;  %v1100_v44 = vunpack.c.l.s4 %v6984_v56 }
 0x11b   :  { %570 = vbcast.lane.b32.xlu1 %v564_v43, 264  ;;  %566 = vbcast.lane.b32.xlu0 %v564_v43, 256 }
 0x11d   :  { %v7258_v54 = vpop.permute.xlu1 %334  ;;  %v7260_v26 = vpop.permute.xlu0 %330 }
 0x11e   :  { %10686 = vst [vmem:[#allocation57_spill] sm:$0xff] %v7258_v54  ;;  %10687 = vst [vmem:[#allocation58_spill] sm:$0xff] %v7260_v26 }
 0x11f   :  { %578 = vbcast.lane.b32.xlu1 %v564_v43, 280  ;;  %574 = vbcast.lane.b32.xlu0 %v564_v43, 272 }
 0x121   :  { %v7262_v62 = vpop.permute.xlu1 %342  ;;  %v7264_v41 = vpop.permute.xlu0 %338 }
 0x122   :  { %10688 = vst [vmem:[#allocation59_spill] sm:$0xff] %v7262_v62  ;;  %10689 = vst [vmem:[#allocation60_spill] sm:$0xff] %v7264_v41 }
 0x123   :  { %586 = vbcast.lane.b32.xlu1 %v564_v43, 296  ;;  %582 = vbcast.lane.b32.xlu0 %v564_v43, 288 }
 0x125   :  { %v7266_v63 = vpop.permute.xlu1 %350  ;;  %v7268_v33 = vpop.permute.xlu0 %346 }
 0x126   :  { %10690 = vst [vmem:[#allocation61_spill] sm:$0xff] %v7266_v63  ;;  %10691 = vst [vmem:[#allocation62_spill] sm:$0xff] %v7268_v33 }
 0x127   :  { %594 = vbcast.lane.b32.xlu1 %v564_v43, 312  ;;  %590 = vbcast.lane.b32.xlu0 %v564_v43, 304 }
 0x129   :  { %v7270_v2 = vpop.permute.xlu1 %358  ;;  %v7272_v24 = vpop.permute.xlu0 %354 }
 0x12a   :  { %10692 = vst [vmem:[#allocation63_spill] sm:$0xff] %v7270_v2  ;;  %10693 = vst [vmem:[#allocation64_spill] sm:$0xff] %v7272_v24  ;;  %v10695_v2 = vsub.s32 1, %v7073_v1 }
 0x12b   :  { %602 = vbcast.lane.b32.xlu1 %v564_v43, 328  ;;  %598 = vbcast.lane.b32.xlu0 %v564_v43, 320 }
 0x12c   :  { %v631_v24 = vrot.slane %v7245_v25, %v10695_v2 }
 0x12d   :  { %v7274_v60 = vpop.permute.xlu1 %369  ;;  %v7276_v42 = vpop.permute.xlu0 %365 }
 0x12f   :  { %610 = vbcast.lane.b32.xlu1 %v564_v43, 344  ;;  %606 = vbcast.lane.b32.xlu0 %v564_v43, 336 }
 0x131   :  { %v7278_v62 = vpop.permute.xlu1 %377  ;;  %v7280_v41 = vpop.permute.xlu0 %373 }
 0x133   :  { %618 = vbcast.lane.b32.xlu1 %v564_v43, 360  ;;  %614 = vbcast.lane.b32.xlu0 %v564_v43, 352 }
 0x135   :  { %v7282_v63 = vpop.permute.xlu1 %385  ;;  %v7284_v33 = vpop.permute.xlu0 %381 }
 0x136   :  { %10694 = vst [vmem:[#allocation65_spill] sm:$0xff] %v7282_v63  ;;  %v765_v63 = vrot.slane %v7245_v25, %v10721_v36 }
 0x137   :  { %626 = vbcast.lane.b32.xlu1 %v564_v43, 376  ;;  %622 = vbcast.lane.b32.xlu0 %v564_v43, 368 }
 0x139   :  { %v7289_v27 = vpop.permute.xlu1 %393  ;;  %v7291_v23 = vpop.permute.xlu0 %389 }
 0x13a   :  { %10696 = vst [vmem:[#allocation66_spill] sm:$0xff] %v7289_v27  ;;  %10697 = vst [vmem:[#allocation67_spill] sm:$0xff] %v7291_v23 }
 0x13b   :  { %637 = vbcast.lane.b32.xlu1 %v631_v24, 264  ;;  %633 = vbcast.lane.b32.xlu0 %v631_v24, 256 }
 0x13d   :  { %v7293_v59 = vpop.permute.xlu1 %401  ;;  %v7295_v21 = vpop.permute.xlu0 %397 }
 0x13e   :  { %10698 = vst [vmem:[#allocation68_spill] sm:$0xff] %v7293_v59  ;;  %10699 = vst [vmem:[#allocation69_spill] sm:$0xff] %v7295_v21 }
 0x13f   :  { %645 = vbcast.lane.b32.xlu1 %v631_v24, 280  ;;  %641 = vbcast.lane.b32.xlu0 %v631_v24, 272 }
 0x141   :  { %v7297_v57 = vpop.permute.xlu1 %409  ;;  %v7299_v54 = vpop.permute.xlu0 %405 }
 0x142   :  { %10700 = vst [vmem:[#allocation70_spill] sm:$0xff] %v7297_v57  ;;  %10701 = vst [vmem:[#allocation71_spill] sm:$0xff] %v7299_v54 }
 0x143   :  { %653 = vbcast.lane.b32.xlu1 %v631_v24, 296  ;;  %649 = vbcast.lane.b32.xlu0 %v631_v24, 288 }
 0x145   :  { %v7301_v2 = vpop.permute.xlu1 %417  ;;  %v7303_v43 = vpop.permute.xlu0 %413 }
 0x146   :  { %10702 = vst [vmem:[#allocation72_spill] sm:$0xff] %v7301_v2  ;;  %10703 = vst [vmem:[#allocation73_spill] sm:$0xff] %v7303_v43 }
 0x147   :  { %661 = vbcast.lane.b32.xlu1 %v631_v24, 312  ;;  %657 = vbcast.lane.b32.xlu0 %v631_v24, 304 }
 0x149   :  { %v7305_v39 = vpop.permute.xlu1 %425  ;;  %v7307_v7 = vpop.permute.xlu0 %421 }
 0x14a   :  { %10704 = vst [vmem:[#allocation74_spill] sm:$0xff] %v7305_v39  ;;  %10705 = vst [vmem:[#allocation75_spill] sm:$0xff] %v7307_v7  ;;  %v10707_v39 = vsub.s32 2, %v7073_v1 }
 0x14b   :  { %669 = vbcast.lane.b32.xlu1 %v631_v24, 328  ;;  %665 = vbcast.lane.b32.xlu0 %v631_v24, 320 }
 0x14c   :  { %v698_v7 = vrot.slane %v7245_v25, %v10707_v39 }
 0x14d   :  { %v7309_v59 = vpop.permute.xlu1 %436  ;;  %v7311_v19 = vpop.permute.xlu0 %432 }
 0x14f   :  { %677 = vbcast.lane.b32.xlu1 %v631_v24, 344  ;;  %673 = vbcast.lane.b32.xlu0 %v631_v24, 336 }
 0x151   :  { %v7313_v57 = vpop.permute.xlu1 %444  ;;  %v7315_v54 = vpop.permute.xlu0 %440 }
 0x153   :  { %685 = vbcast.lane.b32.xlu1 %v631_v24, 360  ;;  %681 = vbcast.lane.b32.xlu0 %v631_v24, 352 }
 0x155   :  { %v7317_v2 = vpop.permute.xlu1 %452  ;;  %v7319_v43 = vpop.permute.xlu0 %448 }
 0x156   :  { %10706 = vst [vmem:[#allocation76_spill] sm:$0xff] %v7317_v2 }
 0x157   :  { %693 = vbcast.lane.b32.xlu1 %v631_v24, 376  ;;  %689 = vbcast.lane.b32.xlu0 %v631_v24, 368 }
 0x159   :  { %v7324_v55 = vpop.permute.xlu1 %460  ;;  %v7326_v3 = vpop.permute.xlu0 %456 }
 0x15a   :  { %10708 = vst [vmem:[#allocation77_spill] sm:$0xff] %v7324_v55  ;;  %10709 = vst [vmem:[#allocation78_spill] sm:$0xff] %v7326_v3  ;;  %v1101_v55 = vunpack.c.0.s8 %v1100_v44 }
 0x15b   :  { %704 = vbcast.lane.b32.xlu1 %v698_v7, 264  ;;  %700 = vbcast.lane.b32.xlu0 %v698_v7, 256 }
 0x15c   :  { %v7347_v56 = vsub.s32 %v1101_v55, %v7073_v1 }
 0x15d   :  { %v7328_v37 = vpop.permute.xlu1 %468  ;;  %v7330_v15 = vpop.permute.xlu0 %464 }
 0x15e   :  { %10710 = vst [vmem:[#allocation79_spill] sm:$0xff] %v7328_v37  ;;  %10711 = vst [vmem:[#allocation80_spill] sm:$0xff] %v7330_v15  ;;  %v6985_v37 = vmov 1934713408  }
 0x15f   :  { %712 = vbcast.lane.b32.xlu1 %v698_v7, 280  ;;  %708 = vbcast.lane.b32.xlu0 %v698_v7, 272  ;;  %v1164_v3 = vunpack.c.l.s4 %v6985_v37  ;;  %v1129_v37 = vcombine.low %v7239_v46, %v7311_v19 }
 0x161   :  { %v7332_v27 = vpop.permute.xlu1 %476  ;;  %v7334_v20 = vpop.permute.xlu0 %472  ;;  %v1165_v44 = vunpack.c.0.s8 %v1164_v3  ;;  %v7371_v23 = vrot.slane %v1129_v37, %v7347_v56 }
 0x162   :  { %10712 = vst [vmem:[#allocation81_spill] sm:$0xff] %v7332_v27  ;;  %10713 = vst [vmem:[#allocation82_spill] sm:$0xff] %v7334_v20 }
 0x163   :  { %720 = vbcast.lane.b32.xlu1 %v698_v7, 296  ;;  %716 = vbcast.lane.b32.xlu0 %v698_v7, 288  ;;  %v7366_v3 = vsub.s32 %v1165_v44, %v7073_v1 }
 0x165   :  { %v7336_v24 = vpop.permute.xlu1 %484  ;;  %v7338_v39 = vpop.permute.xlu0 %480 }
 0x166   :  { %10714 = vst [vmem:[#allocation83_spill] sm:$0xff] %v7336_v24  ;;  %10715 = vst [vmem:[#allocation84_spill] sm:$0xff] %v7338_v39  ;;  %v1097_v24 = vcombine.low %v7095_v12, %v7167_v48  ;;  %v7352_v39 = vrot.slane %v1113_v38, %v7347_v56 }
 0x167   :  { %728 = vbcast.lane.b32.xlu1 %v698_v7, 312  ;;  %724 = vbcast.lane.b32.xlu0 %v698_v7, 304 }
 0x169   :  { %v7342_v9 = vpop.permute.xlu1 %492  ;;  %v7344_v27 = vpop.permute.xlu0 %488 }
 0x16a   :  { %10716 = vst [vmem:[#allocation85_spill] sm:$0xff] %v7342_v9  ;;  %10717 = vst [vmem:[#allocation86_spill] sm:$0xff] %v7344_v27  ;;  %v7361_v27 = vrot.slane %v1097_v24, %v7347_v56 }
 0x16b   :  { %736 = vbcast.lane.b32.xlu1 %v698_v7, 328  ;;  %732 = vbcast.lane.b32.xlu0 %v698_v7, 320 }
 0x16c   :  { %v1161_v38 = vcombine.low %v7361_v27, %v7352_v39 }
 0x16d   :  { %v7356_v20 = vpop.permute.xlu1 %503  ;;  %v7358_v9 = vpop.permute.xlu0 %499 }
 0x16e   :  { %v1145_v55 = vcombine.low %v7276_v42, %v7358_v9  ;;  %v7383_v44 = vrot.slane %v1161_v38, %v7366_v3 }
 0x16f   :  { %744 = vbcast.lane.b32.xlu1 %v698_v7, 344  ;;  %740 = vbcast.lane.b32.xlu0 %v698_v7, 336 }
 0x170   :  { %v7374_v16 = vrot.slane %v1145_v55, %v7347_v56  ;;  %10718 = vst [vmem:[#allocation87_spill] sm:$0xff] %v7383_v44  ;;  %v3273_v55 = vcombine.low %v7115_v22, %v7187_v58 }
 0x171   :  { %v7376_v52 = vpop.permute.xlu1 %511  ;;  %v7378_v24 = vpop.permute.xlu0 %507 }
 0x172   :  { %v1193_v61 = vcombine.low %v7371_v23, %v7374_v16 }
 0x173   :  { %752 = vbcast.lane.b32.xlu1 %v698_v7, 360  ;;  %748 = vbcast.lane.b32.xlu0 %v698_v7, 352 }
 0x174   :  { %v7386_v2 = vrot.slane %v1193_v61, %v7366_v3  ;;  %v3289_v61 = vcombine.low %v7151_v40, %v7223_v5  ;;  %v7417_v40 = vrot.slane %v3273_v55, %v7347_v56 }
 0x175   :  { %v7388_v37 = vpop.permute.xlu1 %519  ;;  %v7390_v34 = vpop.permute.xlu0 %515 }
 0x176   :  { %10719 = vst [vmem:[#allocation88_spill] sm:$0xff] %v7386_v2  ;;  %10720 = vst [vmem:[#allocation89_spill] sm:$0xff] %v7388_v37  ;;  %v7410_v36 = vrot.slane %v3289_v61, %v7347_v56 }
 0x177   :  { %760 = vbcast.lane.b32.xlu1 %v698_v7, 376  ;;  %756 = vbcast.lane.b32.xlu0 %v698_v7, 368  ;;  %v3305_v7 = vcombine.low %v7260_v26, %v7330_v15  ;;  %10728 = vst [vmem:[#allocation96_spill] sm:$0xff] %v7417_v40 }
 0x178   :  { %10726 = vst [vmem:[#allocation94_spill] sm:$0xff] %v7410_v36  ;;  %v3337_v22 = vcombine.low %v7417_v40, %v7410_v36 }
 0x179   :  { %v7397_v17 = vpop.permute.xlu1 %527  ;;  %v7399_v38 = vpop.permute.xlu0 %523  ;;  %v7426_v61 = vrot.slane %v3305_v7, %v7347_v56 }
 0x17a   :  { %10722 = vst [vmem:[#allocation90_spill] sm:$0xff] %v7397_v17  ;;  %10723 = vst [vmem:[#allocation91_spill] sm:$0xff] %v7399_v38 }
 0x17b   :  { %771 = vbcast.lane.b32.xlu1 %v765_v63, 264  ;;  %767 = vbcast.lane.b32.xlu0 %v765_v63, 256  ;;  %10730 = vst [vmem:[#allocation98_spill] sm:$0xff] %v7426_v61 }
 0x17d   :  { %v7403_v37 = vpop.permute.xlu1 %535  ;;  %v7407_v53 = vpop.permute.xlu0 %531 }
 0x17e   :  { %10724 = vst [vmem:[#allocation92_spill] sm:$0xff] %v7403_v37  ;;  %10725 = vst [vmem:[#allocation93_spill] sm:$0xff] %v7407_v53  ;;  %v3321_v37 = vcombine.low %v7295_v21, %v7407_v53 }
 0x17f   :  { %779 = vbcast.lane.b32.xlu1 %v765_v63, 280  ;;  %775 = vbcast.lane.b32.xlu0 %v765_v63, 272 }
 0x180   :  { %v7429_v58 = vrot.slane %v3321_v37, %v7347_v56  ;;  %v10743_v37 = vsub.s32 4, %v7073_v1 }
 0x181   :  { %v7414_v17 = vpop.permute.xlu1 %543  ;;  %v7421_v5 = vpop.permute.xlu0 %539 }
 0x182   :  { %10727 = vst [vmem:[#allocation95_spill] sm:$0xff] %v7414_v17  ;;  %10729 = vst [vmem:[#allocation97_spill] sm:$0xff] %v7421_v5  ;;  %v3369_v55 = vcombine.low %v7426_v61, %v7429_v58  ;;  %v7438_v5 = vrot.slane %v3337_v22, %v7366_v3 }
 0x183   :  { %787 = vbcast.lane.b32.xlu1 %v765_v63, 296  ;;  %10731 = vst [vmem:[#allocation99_spill] sm:$0xff] %v7429_v58  ;;  %783 = vbcast.lane.b32.xlu0 %v765_v63, 288 }
 0x184   :  { %10734 = vst [vmem:[#allocation102_spill] sm:$0xff] %v7438_v5  ;;  %v7441_v40 = vrot.slane %v3369_v55, %v7366_v3 }
 0x185   :  { %v7431_v17 = vpop.permute.xlu1 %551  ;;  %v7435_v26 = vpop.permute.xlu0 %547 }
 0x186   :  { %10732 = vst [vmem:[#allocation100_spill] sm:$0xff] %v7431_v17  ;;  %10733 = vst [vmem:[#allocation101_spill] sm:$0xff] %v7435_v26 }
 0x187   :  { %795 = vbcast.lane.b32.xlu1 %v765_v63, 312  ;;  %10735 = vst [vmem:[#allocation103_spill] sm:$0xff] %v7441_v40  ;;  %791 = vbcast.lane.b32.xlu0 %v765_v63, 304 }
 0x189   :  { %v7443_v7 = vpop.permute.xlu1 %559  ;;  %v7447_v36 = vpop.permute.xlu0 %555 }
 0x18a   :  { %10736 = vst [vmem:[#allocation104_spill] sm:$0xff] %v7443_v7  ;;  %10737 = vst [vmem:[#allocation105_spill] sm:$0xff] %v7447_v36  ;;  %v832_v36 = vrot.slane %v7245_v25, %v10743_v37 }
 0x18b   :  { %803 = vbcast.lane.b32.xlu1 %v765_v63, 328  ;;  %799 = vbcast.lane.b32.xlu0 %v765_v63, 320 }
 0x18d   :  { %v7449_v17 = vpop.permute.xlu1 %570  ;;  %v7451_v26 = vpop.permute.xlu0 %566 }
 0x18e   :  { %10738 = vst [vmem:[#allocation106_spill] sm:$0xff] %v7449_v17 }
 0x18f   :  { %811 = vbcast.lane.b32.xlu1 %v765_v63, 344  ;;  %807 = vbcast.lane.b32.xlu0 %v765_v63, 336 }
 0x191   :  { %v7453_v22 = vpop.permute.xlu1 %578  ;;  %v7455_v55 = vpop.permute.xlu0 %574 }
 0x192   :  { %10739 = vst [vmem:[#allocation107_spill] sm:$0xff] %v7453_v22  ;;  %10740 = vst [vmem:[#allocation108_spill] sm:$0xff] %v7455_v55 }
 0x193   :  { %819 = vbcast.lane.b32.xlu1 %v765_v63, 360  ;;  %815 = vbcast.lane.b32.xlu0 %v765_v63, 352 }
 0x195   :  { %v7457_v7 = vpop.permute.xlu1 %586  ;;  %v7459_v15 = vpop.permute.xlu0 %582 }
 0x196   :  { %10741 = vst [vmem:[#allocation109_spill] sm:$0xff] %v7457_v7  ;;  %10742 = vst [vmem:[#allocation110_spill] sm:$0xff] %v7459_v15 }
 0x197   :  { %827 = vbcast.lane.b32.xlu1 %v765_v63, 376  ;;  %823 = vbcast.lane.b32.xlu0 %v765_v63, 368 }
 0x199   :  { %v7464_v5 = vpop.permute.xlu1 %594  ;;  %v7466_v40 = vpop.permute.xlu0 %590 }
 0x19a   :  { %10744 = vst [vmem:[#allocation111_spill] sm:$0xff] %v7464_v5  ;;  %10745 = vst [vmem:[#allocation112_spill] sm:$0xff] %v7466_v40 }
 0x19b   :  { %838 = vbcast.lane.b32.xlu1 %v832_v36, 264  ;;  %834 = vbcast.lane.b32.xlu0 %v832_v36, 256 }
 0x19d   :  { %v7468_v61 = vpop.permute.xlu1 %602  ;;  %v7470_v58 = vpop.permute.xlu0 %598 }
 0x19e   :  { %10746 = vst [vmem:[#allocation113_spill] sm:$0xff] %v7468_v61  ;;  %10747 = vst [vmem:[#allocation114_spill] sm:$0xff] %v7470_v58 }
 0x19f   :  { %846 = vbcast.lane.b32.xlu1 %v832_v36, 280  ;;  %842 = vbcast.lane.b32.xlu0 %v832_v36, 272 }
 0x1a1   :  { %v7472_v21 = vpop.permute.xlu1 %610  ;;  %v7474_v53 = vpop.permute.xlu0 %606 }
 0x1a2   :  { %10748 = vst [vmem:[#allocation115_spill] sm:$0xff] %v7472_v21  ;;  %10749 = vst [vmem:[#allocation116_spill] sm:$0xff] %v7474_v53 }
 0x1a3   :  { %854 = vbcast.lane.b32.xlu1 %v832_v36, 296  ;;  %850 = vbcast.lane.b32.xlu0 %v832_v36, 288 }
 0x1a5   :  { %v7476_v37 = vpop.permute.xlu1 %618  ;;  %v7478_v63 = vpop.permute.xlu0 %614 }
 0x1a6   :  { %10750 = vst [vmem:[#allocation117_spill] sm:$0xff] %v7476_v37  ;;  %10751 = vst [vmem:[#allocation118_spill] sm:$0xff] %v7478_v63 }
 0x1a7   :  { %862 = vbcast.lane.b32.xlu1 %v832_v36, 312  ;;  %858 = vbcast.lane.b32.xlu0 %v832_v36, 304 }
 0x1a9   :  { %v7480_v5 = vpop.permute.xlu1 %626  ;;  %v7482_v40 = vpop.permute.xlu0 %622 }
 0x1aa   :  { %10752 = vst [vmem:[#allocation119_spill] sm:$0xff] %v7480_v5  ;;  %10753 = vst [vmem:[#allocation120_spill] sm:$0xff] %v7482_v40  ;;  %v10759_v5 = vsub.s32 5, %v7073_v1 }
 0x1ab   :  { %870 = vbcast.lane.b32.xlu1 %v832_v36, 328  ;;  %866 = vbcast.lane.b32.xlu0 %v832_v36, 320 }
 0x1ac   :  { %v899_v40 = vrot.slane %v7245_v25, %v10759_v5 }
 0x1ad   :  { %v7484_v61 = vpop.permute.xlu1 %637  ;;  %v7486_v7 = vpop.permute.xlu0 %633 }
 0x1ae   :  { %10754 = vst [vmem:[#allocation121_spill] sm:$0xff] %v7484_v61 }
 0x1af   :  { %878 = vbcast.lane.b32.xlu1 %v832_v36, 344  ;;  %874 = vbcast.lane.b32.xlu0 %v832_v36, 336 }
 0x1b1   :  { %v7488_v21 = vpop.permute.xlu1 %645  ;;  %v7490_v53 = vpop.permute.xlu0 %641 }
 0x1b2   :  { %10755 = vst [vmem:[#allocation122_spill] sm:$0xff] %v7488_v21  ;;  %10756 = vst [vmem:[#allocation123_spill] sm:$0xff] %v7490_v53 }
 0x1b3   :  { %886 = vbcast.lane.b32.xlu1 %v832_v36, 360  ;;  %882 = vbcast.lane.b32.xlu0 %v832_v36, 352 }
 0x1b5   :  { %v7492_v37 = vpop.permute.xlu1 %653  ;;  %v7494_v63 = vpop.permute.xlu0 %649 }
 0x1b6   :  { %10757 = vst [vmem:[#allocation124_spill] sm:$0xff] %v7492_v37  ;;  %10758 = vst [vmem:[#allocation125_spill] sm:$0xff] %v7494_v63 }
 0x1b7   :  { %894 = vbcast.lane.b32.xlu1 %v832_v36, 376  ;;  %890 = vbcast.lane.b32.xlu0 %v832_v36, 368 }
 0x1b9   :  { %v7499_v15 = vpop.permute.xlu1 %661  ;;  %v7501_v22 = vpop.permute.xlu0 %657 }
 0x1ba   :  { %10760 = vst [vmem:[#allocation126_spill] sm:$0xff] %v7499_v15  ;;  %10761 = vst [vmem:[#allocation127_spill] sm:$0xff] %v7501_v22 }
 0x1bb   :  { %905 = vbcast.lane.b32.xlu1 %v899_v40, 264  ;;  %901 = vbcast.lane.b32.xlu0 %v899_v40, 256 }
 0x1bd   :  { %v7503_v21 = vpop.permute.xlu1 %669  ;;  %v7505_v38 = vpop.permute.xlu0 %665 }
 0x1be   :  { %10762 = vst [vmem:[#allocation128_spill] sm:$0xff] %v7503_v21  ;;  %10763 = vst [vmem:[#allocation129_spill] sm:$0xff] %v7505_v38 }
 0x1bf   :  { %913 = vbcast.lane.b32.xlu1 %v899_v40, 280  ;;  %909 = vbcast.lane.b32.xlu0 %v899_v40, 272 }
 0x1c1   :  { %v7507_v37 = vpop.permute.xlu1 %677  ;;  %v7509_v63 = vpop.permute.xlu0 %673 }
 0x1c2   :  { %10764 = vst [vmem:[#allocation130_spill] sm:$0xff] %v7507_v37  ;;  %10765 = vst [vmem:[#allocation131_spill] sm:$0xff] %v7509_v63 }
 0x1c3   :  { %921 = vbcast.lane.b32.xlu1 %v899_v40, 296  ;;  %917 = vbcast.lane.b32.xlu0 %v899_v40, 288 }
 0x1c5   :  { %v7511_v5 = vpop.permute.xlu1 %685  ;;  %v7513_v36 = vpop.permute.xlu0 %681 }
 0x1c6   :  { %10766 = vst [vmem:[#allocation132_spill] sm:$0xff] %v7511_v5  ;;  %10767 = vst [vmem:[#allocation133_spill] sm:$0xff] %v7513_v36 }
 0x1c7   :  { %929 = vbcast.lane.b32.xlu1 %v899_v40, 312  ;;  %925 = vbcast.lane.b32.xlu0 %v899_v40, 304 }
 0x1c9   :  { %v7515_v15 = vpop.permute.xlu1 %693  ;;  %v7517_v22 = vpop.permute.xlu0 %689 }
 0x1ca   :  { %10768 = vst [vmem:[#allocation134_spill] sm:$0xff] %v7515_v15  ;;  %10769 = vst [vmem:[#allocation135_spill] sm:$0xff] %v7517_v22  ;;  %v10775_v15 = vsub.s32 6, %v7073_v1 }
 0x1cb   :  { %937 = vbcast.lane.b32.xlu1 %v899_v40, 328  ;;  %933 = vbcast.lane.b32.xlu0 %v899_v40, 320 }
 0x1cc   :  { %v966_v22 = vrot.slane %v7245_v25, %v10775_v15 }
 0x1cd   :  { %v7519_v21 = vpop.permute.xlu1 %704  ;;  %v7521_v55 = vpop.permute.xlu0 %700 }
 0x1ce   :  { %10770 = vst [vmem:[#allocation136_spill] sm:$0xff] %v7519_v21 }
 0x1cf   :  { %945 = vbcast.lane.b32.xlu1 %v899_v40, 344  ;;  %941 = vbcast.lane.b32.xlu0 %v899_v40, 336 }
 0x1d1   :  { %v7523_v37 = vpop.permute.xlu1 %712  ;;  %v7525_v63 = vpop.permute.xlu0 %708 }
 0x1d2   :  { %10771 = vst [vmem:[#allocation137_spill] sm:$0xff] %v7523_v37  ;;  %10772 = vst [vmem:[#allocation138_spill] sm:$0xff] %v7525_v63 }
 0x1d3   :  { %953 = vbcast.lane.b32.xlu1 %v899_v40, 360  ;;  %949 = vbcast.lane.b32.xlu0 %v899_v40, 352 }
 0x1d5   :  { %v7527_v5 = vpop.permute.xlu1 %720  ;;  %v7529_v36 = vpop.permute.xlu0 %716 }
 0x1d6   :  { %10773 = vst [vmem:[#allocation139_spill] sm:$0xff] %v7527_v5  ;;  %10774 = vst [vmem:[#allocation140_spill] sm:$0xff] %v7529_v36 }
 0x1d7   :  { %961 = vbcast.lane.b32.xlu1 %v899_v40, 376  ;;  %957 = vbcast.lane.b32.xlu0 %v899_v40, 368 }
 0x1d9   :  { %v7534_v53 = vpop.permute.xlu1 %728  ;;  %v7536_v17 = vpop.permute.xlu0 %724 }
 0x1da   :  { %10776 = vst [vmem:[#allocation141_spill] sm:$0xff] %v7534_v53  ;;  %10777 = vst [vmem:[#allocation142_spill] sm:$0xff] %v7536_v17 }
 0x1db   :  { %972 = vbcast.lane.b32.xlu1 %v966_v22, 264  ;;  %968 = vbcast.lane.b32.xlu0 %v966_v22, 256 }
 0x1dd   :  { %v7538_v37 = vpop.permute.xlu1 %736  ;;  %v7540_v63 = vpop.permute.xlu0 %732 }
 0x1de   :  { %10778 = vst [vmem:[#allocation143_spill] sm:$0xff] %v7538_v37  ;;  %10779 = vst [vmem:[#allocation144_spill] sm:$0xff] %v7540_v63 }
 0x1df   :  { %980 = vbcast.lane.b32.xlu1 %v966_v22, 280  ;;  %976 = vbcast.lane.b32.xlu0 %v966_v22, 272 }
 0x1e1   :  { %v7542_v5 = vpop.permute.xlu1 %744  ;;  %v7544_v36 = vpop.permute.xlu0 %740 }
 0x1e2   :  { %10780 = vst [vmem:[#allocation145_spill] sm:$0xff] %v7542_v5  ;;  %10781 = vst [vmem:[#allocation146_spill] sm:$0xff] %v7544_v36 }
 0x1e3   :  { %988 = vbcast.lane.b32.xlu1 %v966_v22, 296  ;;  %984 = vbcast.lane.b32.xlu0 %v966_v22, 288 }
 0x1e5   :  { %v7546_v15 = vpop.permute.xlu1 %752  ;;  %v7548_v40 = vpop.permute.xlu0 %748 }
 0x1e6   :  { %10782 = vst [vmem:[#allocation147_spill] sm:$0xff] %v7546_v15  ;;  %10783 = vst [vmem:[#allocation148_spill] sm:$0xff] %v7548_v40 }
 0x1e7   :  { %996 = vbcast.lane.b32.xlu1 %v966_v22, 312  ;;  %992 = vbcast.lane.b32.xlu0 %v966_v22, 304 }
 0x1e9   :  { %v7550_v53 = vpop.permute.xlu1 %760  ;;  %v7552_v17 = vpop.permute.xlu0 %756 }
 0x1ea   :  { %10784 = vst [vmem:[#allocation149_spill] sm:$0xff] %v7550_v53  ;;  %10785 = vst [vmem:[#allocation150_spill] sm:$0xff] %v7552_v17  ;;  %v10791_v53 = vsub.s32 7, %v7073_v1 }
 0x1eb   :  { %1004 = vbcast.lane.b32.xlu1 %v966_v22, 328  ;;  %1000 = vbcast.lane.b32.xlu0 %v966_v22, 320 }
 0x1ec   :  { %v1033_v17 = vrot.slane %v7245_v25, %v10791_v53 }
 0x1ed   :  { %v7554_v37 = vpop.permute.xlu1 %771  ;;  %v7556_v21 = vpop.permute.xlu0 %767 }
 0x1ee   :  { %10786 = vst [vmem:[#allocation151_spill] sm:$0xff] %v7554_v37 }
 0x1ef   :  { %1012 = vbcast.lane.b32.xlu1 %v966_v22, 344  ;;  %1008 = vbcast.lane.b32.xlu0 %v966_v22, 336 }
 0x1f1   :  { %v7558_v5 = vpop.permute.xlu1 %779  ;;  %v7560_v36 = vpop.permute.xlu0 %775 }
 0x1f2   :  { %10787 = vst [vmem:[#allocation152_spill] sm:$0xff] %v7558_v5  ;;  %10788 = vst [vmem:[#allocation153_spill] sm:$0xff] %v7560_v36 }
 0x1f3   :  { %1020 = vbcast.lane.b32.xlu1 %v966_v22, 360  ;;  %1016 = vbcast.lane.b32.xlu0 %v966_v22, 352 }
 0x1f5   :  { %v7562_v15 = vpop.permute.xlu1 %787  ;;  %v7564_v40 = vpop.permute.xlu0 %783 }
 0x1f6   :  { %10789 = vst [vmem:[#allocation154_spill] sm:$0xff] %v7562_v15  ;;  %10790 = vst [vmem:[#allocation155_spill] sm:$0xff] %v7564_v40 }
 0x1f7   :  { %1028 = vbcast.lane.b32.xlu1 %v966_v22, 376  ;;  %1024 = vbcast.lane.b32.xlu0 %v966_v22, 368 }
 0x1f9   :  { %v7569_v61 = vpop.permute.xlu1 %795  ;;  %v7571_v37 = vpop.permute.xlu0 %791 }
 0x1fa   :  { %10792 = vst [vmem:[#allocation156_spill] sm:$0xff] %v7569_v61  ;;  %10793 = vst [vmem:[#allocation157_spill] sm:$0xff] %v7571_v37  ;;  %v1114_v37 = vcombine.high %v7131_v30, %v7203_v6 }
 0x1fb   :  { %1039 = vbcast.lane.b32.xlu1 %v1033_v17, 264  ;;  %1035 = vbcast.lane.b32.xlu0 %v1033_v17, 256 }
 0x1fd   :  { %v7573_v5 = vpop.permute.xlu1 %803  ;;  %v7575_v36 = vpop.permute.xlu0 %799 }
 0x1fe   :  { %10794 = vst [vmem:[#allocation158_spill] sm:$0xff] %v7573_v5  ;;  %10795 = vst [vmem:[#allocation159_spill] sm:$0xff] %v7575_v36 }
 0x1ff   :  { %1047 = vbcast.lane.b32.xlu1 %v1033_v17, 280  ;;  %1043 = vbcast.lane.b32.xlu0 %v1033_v17, 272 }
 0x201   :  { %v7577_v15 = vpop.permute.xlu1 %811  ;;  %v7579_v40 = vpop.permute.xlu0 %807 }
 0x202   :  { %10796 = vst [vmem:[#allocation160_spill] sm:$0xff] %v7577_v15  ;;  %10797 = vst [vmem:[#allocation161_spill] sm:$0xff] %v7579_v40 }
 0x203   :  { %1055 = vbcast.lane.b32.xlu1 %v1033_v17, 296  ;;  %1051 = vbcast.lane.b32.xlu0 %v1033_v17, 288 }
 0x205   :  { %v7581_v1 = vpop.permute.xlu1 %819  ;;  %v7583_v25 = vpop.permute.xlu0 %815 }
 0x206   :  { %10798 = vst [vmem:[#allocation162_spill] sm:$0xff] %v7581_v1  ;;  %10799 = vst [vmem:[#allocation163_spill] sm:$0xff] %v7583_v25 }
 0x207   :  { %1063 = vbcast.lane.b32.xlu1 %v1033_v17, 312  ;;  %1059 = vbcast.lane.b32.xlu0 %v1033_v17, 304 }
 0x209   :  { %v7585_v53 = vpop.permute.xlu1 %827  ;;  %v7587_v22 = vpop.permute.xlu0 %823 }
 0x20a   :  { %10800 = vst [vmem:[#allocation164_spill] sm:$0xff] %v7585_v53  ;;  %10801 = vst [vmem:[#allocation165_spill] sm:$0xff] %v7587_v22  ;;  %v1146_v53 = vcombine.high %v7276_v42, %v7358_v9  ;;  %v1194_v22 = vcombine.high %v7371_v23, %v7374_v16  ;;  %v1098_v9 = vcombine.high %v7095_v12, %v7167_v48 }
 0x20b   :  { %1071 = vbcast.lane.b32.xlu1 %v1033_v17, 328  ;;  %1067 = vbcast.lane.b32.xlu0 %v1033_v17, 320  ;;  %v1226_v42 = vcombine.high %v7383_v44, %v7386_v2 }
 0x20c   :  { %v1160_v16 = vrot.slane %v1146_v53, %v7347_v56  ;;  %v1208_v30 = vrot.slane %v1194_v22, %v7366_v3  ;;  %v1112_v12 = vrot.slane %v1098_v9, %v7347_v56 }
 0x20d   :  { %v7589_v5 = vpop.permute.xlu1 %838  ;;  %v7591_v61 = vpop.permute.xlu0 %834 }
 0x20f   :  { %1079 = vbcast.lane.b32.xlu1 %v1033_v17, 344  ;;  %1075 = vbcast.lane.b32.xlu0 %v1033_v17, 336 }
 0x211   :  { %v7593_v15 = vpop.permute.xlu1 %846  ;;  %v7595_v40 = vpop.permute.xlu0 %842 }
 0x212   :  { %10802 = vst [vmem:[#allocation166_spill] sm:$0xff] %v7593_v15  ;;  %10803 = vst [vmem:[#allocation167_spill] sm:$0xff] %v7595_v40  ;;  %v1162_v15 = vcombine.high %v7361_v27, %v7352_v39  ;;  %v1130_v40 = vcombine.high %v7239_v46, %v7311_v19  ;;  %v1128_v27 = vrot.slane %v1114_v37, %v7347_v56 }
 0x213   :  { %1087 = vbcast.lane.b32.xlu1 %v1033_v17, 360  ;;  %1083 = vbcast.lane.b32.xlu0 %v1033_v17, 352 }
 0x214   :  { %v1144_v6 = vrot.slane %v1130_v40, %v7347_v56  ;;  %v1177_v53 = vcombine.low %v1112_v12, %v1128_v27 }
 0x215   :  { %v7597_v1 = vpop.permute.xlu1 %854  ;;  %v7603_v25 = vpop.permute.xlu0 %850 }
 0x216   :  { %10804 = vst [vmem:[#allocation168_spill] sm:$0xff] %v7597_v1  ;;  %10805 = vst [vmem:[#allocation169_spill] sm:$0xff] %v7603_v25  ;;  %v1209_v46 = vcombine.low %v1144_v6, %v1160_v16  ;;  %v1386_v25 = vcombine.high %v7129_v29, %v7201_v4 }
 0x217   :  { %1095 = vbcast.lane.b32.xlu1 %v1033_v17, 376  ;;  %1091 = vbcast.lane.b32.xlu0 %v1033_v17, 368  ;;  %v1176_v17 = vrot.slane %v1162_v15, %v7366_v3  ;;  %v1185_v15 = vrot.slane %v1177_v53, %v7366_v3  ;;  %v1369_v53 = vcombine.low %v7099_v14, %v7165_v47 }
 0x219   :  { %v7611_v1 = vpop.permute.xlu1 %862  ;;  %v7616_v23 = vpop.permute.xlu0 %858  ;;  %v1227_v39 = vcombine.low %v1176_v17, %v1208_v30  ;;  %v1228_v22 = vcombine.high %v1176_v17, %v1208_v30  ;;  %v1178_v30 = vcombine.high %v1112_v12, %v1128_v27  ;;  %v1401_v17 = vcombine.low %v7237_v45, %v7309_v59 }
 0x21a   :  { %10806 = vst [vmem:[#allocation170_spill] sm:$0xff] %v7611_v1  ;;  %10807 = vst [vmem:[#allocation171_spill] sm:$0xff] %v7616_v23  ;;  %v1210_v1 = vcombine.high %v1144_v6, %v1160_v16 }
 0x21b   :  { %5451 = vrot.lane.b32.xlu0 %v1226_v42, %s6986_s0  ;;  %v1217_v42 = vrot.slane %v1209_v46, %v7366_v3  ;;  %v1409_v27 = vrot.slane %v1401_v17, %v7347_v56  ;;  %v1192_v12 = vrot.slane %v1178_v30, %v7366_v3 }
 0x21d   :  { %v7625_v19 = vpop.permute.xlu1 %870  ;;  %v7628_v48 = vpop.permute.xlu0 %866  ;;  %v1230_v6 = vcombine.high %v1185_v15, %v1217_v42 }
 0x21e   :  { %10808 = vst [vmem:[#allocation172_spill] sm:$0xff] %v7625_v19  ;;  %10809 = vst [vmem:[#allocation173_spill] sm:$0xff] %v7628_v48  ;;  %v1417_v19 = vcombine.low %v7274_v60, %v7356_v20 }
 0x21f   :  { %5459 = vrot.lane.b32.xlu0 %v1227_v39, %s6987_s20  ;;  %v1229_v39 = vcombine.low %v1185_v15, %v1217_v42 }
 0x221   :  { %v7631_v37 = vpop.permute.xlu1 %878  ;;  %v7633_v40 = vpop.permute.xlu0 %874 }
 0x222   :  { %10810 = vst [vmem:[#allocation174_spill] sm:$0xff] %v7631_v37  ;;  %10811 = vst [vmem:[#allocation175_spill] sm:$0xff] %v7633_v40  ;;  %v1385_v37 = vcombine.low %v7129_v29, %v7201_v4  ;;  %v1400_v29 = vrot.slane %v1386_v25, %v7347_v56 }
 0x223   :  { %5467 = vrot.lane.b32.xlu0 %v1228_v22, %s6988_s21  ;;  %v1425_v22 = vrot.slane %v1417_v19, %v7347_v56 }
 0x225   :  { %v7638_v9 = vpop.permute.xlu1 %886  ;;  %v7642_v2 = vpop.permute.xlu0 %882  ;;  %v1465_v40 = vcombine.low %v1409_v27, %v1425_v22  ;;  %v1466_v44 = vcombine.high %v1409_v27, %v1425_v22 }
 0x226   :  { %10812 = vst [vmem:[#allocation176_spill] sm:$0xff] %v7638_v9  ;;  %10813 = vst [vmem:[#allocation177_spill] sm:$0xff] %v7642_v2  ;;  %v1224_v9 = vrot.slane %v1210_v1, %v7366_v3  ;;  %v1393_v2 = vrot.slane %v1385_v37, %v7347_v56 }
 0x227   :  { %5475 = vrot.lane.b32.xlu0 %v1229_v39, %s6983_s17  ;;  %v1473_v17 = vrot.slane %v1465_v40, %v7366_v3  ;;  %v1402_v40 = vcombine.high %v7237_v45, %v7309_v59  ;;  %v1480_v27 = vrot.slane %v1466_v44, %v7366_v3 }
 0x228   :  { %v1232_v15 = vcombine.high %v1192_v12, %v1224_v9 }
 0x229   :  { %v7649_v46 = vpop.permute.xlu1 %894  ;;  %v7654_v16 = vpop.permute.xlu0 %890  ;;  %v1416_v4 = vrot.slane %v1402_v40, %v7347_v56 }
 0x22a   :  { %10814 = vst [vmem:[#allocation178_spill] sm:$0xff] %v7649_v46  ;;  %10815 = vst [vmem:[#allocation179_spill] sm:$0xff] %v7654_v16  ;;  %v1377_v46 = vrot.slane %v1369_v53, %v7347_v56  ;;  %v1231_v16 = vcombine.low %v1192_v12, %v1224_v9 }
 0x22b   :  { %5483 = vrot.lane.b32.xlu0 %v1230_v6, %s10457_s22  ;;  %v1418_v6 = vcombine.high %v7274_v60, %v7356_v20 }
 0x22c   :  { %v1433_v42 = vcombine.low %v1377_v46, %v1393_v2  ;;  %v1434_v9 = vcombine.high %v1377_v46, %v1393_v2 }
 0x22d   :  { %v7661_v39 = vpop.permute.xlu1 %905  ;;  %v7664_v19 = vpop.permute.xlu0 %901  ;;  %v1432_v20 = vrot.slane %v1418_v6, %v7347_v56 }
 0x22e   :  { %v1441_v30 = vrot.slane %v1433_v42, %v7366_v3  ;;  %v1370_v42 = vcombine.high %v7099_v14, %v7165_v47  ;;  %v1448_v45 = vrot.slane %v1434_v9, %v7366_v3  ;;  %v1689_v9 = vcombine.low %v7280_v41, %v7378_v24 }
 0x22f   :  { %5491 = vrot.lane.b32.xlu0 %v1231_v16, %s10461_s23  ;;  %v1481_v47 = vcombine.low %v1416_v4, %v1432_v20 }
 0x230   :  { %v1497_v16 = vcombine.low %v1441_v30, %v1473_v17  ;;  %v1498_v22 = vcombine.high %v1441_v30, %v1473_v17  ;;  %v1384_v14 = vrot.slane %v1370_v42, %v7347_v56  ;;  %v1499_v46 = vcombine.low %v1448_v45, %v1480_v27 }
 0x231   :  { %v7667_v1 = vpop.permute.xlu1 %913  ;;  %v7669_v37 = vpop.permute.xlu0 %909  ;;  %v1500_v25 = vcombine.high %v1448_v45, %v1480_v27  ;;  %v1489_v17 = vrot.slane %v1481_v47, %v7366_v3  ;;  %v1657_v27 = vcombine.low %v7135_v32, %v7207_v10  ;;  %v1673_v45 = vcombine.low %v7243_v0, %v7315_v54 }
 0x233   :  { %5499 = vrot.lane.b32.xlu0 %v1232_v15, %s10463_s24  ;;  %v1449_v15 = vcombine.low %v1384_v14, %v1400_v29 }
 0x235   :  { %v7674_v53 = vpop.permute.xlu1 %921  ;;  %v7678_v23 = vpop.permute.xlu0 %917  ;;  %v1457_v6 = vrot.slane %v1449_v15, %v7366_v3 }
 0x237   :  { %5507 = vrot.lane.b32.xlu0 %v1497_v16, %s10465_s25  ;;  %v1482_v16 = vcombine.high %v1416_v4, %v1432_v20  ;;  %v1501_v42 = vcombine.low %v1457_v6, %v1489_v17  ;;  %v1641_v20 = vcombine.low %v7093_v11, %v7171_v50  ;;  %v1697_v4 = vrot.slane %v1689_v9, %v7347_v56 }
 0x238   :  { %v1502_v15 = vcombine.high %v1457_v6, %v1489_v17 }
 0x239   :  { %v7685_v12 = vpop.permute.xlu1 %929  ;;  %v7690_v60 = vpop.permute.xlu0 %925 }
 0x23a   :  { %10816 = vst [vmem:[#allocation180_spill] sm:$0xff] %v7685_v12  ;;  %10817 = vst [vmem:[#allocation181_spill] sm:$0xff] %v7690_v60 }
 0x23b   :  { %5515 = vrot.lane.b32.xlu0 %v1498_v22, %s10467_s26  ;;  %v1450_v22 = vcombine.high %v1384_v14, %v1400_v29  ;;  %v1496_v29 = vrot.slane %v1482_v16, %v7366_v3  ;;  %v1665_v14 = vrot.slane %v1657_v27, %v7347_v56 }
 0x23d   :  { %v7697_v59 = vpop.permute.xlu1 %937  ;;  %v7700_v2 = vpop.permute.xlu0 %933 }
 0x23e   :  { %10818 = vst [vmem:[#allocation182_spill] sm:$0xff] %v7697_v59  ;;  %10819 = vst [vmem:[#allocation183_spill] sm:$0xff] %v7700_v2 }
 0x23f   :  { %5523 = vrot.lane.b32.xlu0 %v1499_v46, %s10469_s27 }
 0x241   :  { %v7703_v44 = vpop.permute.xlu0 %941  ;;  %v7706_v30 = vpop.permute.xlu1 %945 }
 0x242   :  { %10820 = vst [vmem:[#allocation184_spill] sm:$0xff] %v7703_v44  ;;  %10821 = vst [vmem:[#allocation185_spill] sm:$0xff] %v7706_v30 }
 0x243   :  { %5531 = vrot.lane.b32.xlu0 %v1500_v25, %s10471_s28  ;;  %v1681_v25 = vrot.slane %v1673_v45, %v7347_v56 }
 0x245   :  { %v7712_v40 = vpop.permute.xlu0 %949  ;;  %v7719_v47 = vpop.permute.xlu1 %953 }
 0x246   :  { %10822 = vst [vmem:[#allocation186_spill] sm:$0xff] %v7712_v40  ;;  %10823 = vst [vmem:[#allocation187_spill] sm:$0xff] %v7719_v47  ;;  %v1649_v47 = vrot.slane %v1641_v20, %v7347_v56  ;;  %v1737_v40 = vcombine.low %v1681_v25, %v1697_v4  ;;  %v1690_v20 = vcombine.high %v7280_v41, %v7378_v24 }
 0x247   :  { %5539 = vrot.lane.b32.xlu0 %v1501_v42, %s10476_s29  ;;  %v1464_v42 = vrot.slane %v1450_v22, %v7366_v3 }
 0x248   :  { %v1705_v17 = vcombine.low %v1649_v47, %v1665_v14  ;;  %v1745_v27 = vrot.slane %v1737_v40, %v7366_v3  ;;  %v1674_v40 = vcombine.high %v7243_v0, %v7315_v54 }
 0x249   :  { %v7724_v46 = vpop.permute.xlu0 %957  ;;  %v1503_v9 = vcombine.low %v1464_v42, %v1496_v29  ;;  %v7734_v44 = vpop.permute.xlu1 %961  ;;  %v1504_v16 = vcombine.high %v1464_v42, %v1496_v29  ;;  %v1706_v29 = vcombine.high %v1649_v47, %v1665_v14  ;;  %v1642_v42 = vcombine.high %v7093_v11, %v7171_v50 }
 0x24a   :  { %10824 = vst [vmem:[#allocation188_spill] sm:$0xff] %v7724_v46  ;;  %10825 = vst [vmem:[#allocation189_spill] sm:$0xff] %v7734_v44  ;;  %v1713_v22 = vrot.slane %v1705_v17, %v7366_v3  ;;  %v1704_v17 = vrot.slane %v1690_v20, %v7347_v56 }
 0x24b   :  { %5547 = vrot.lane.b32.xlu0 %v1502_v15, %s10478_s30  ;;  %v1738_v15 = vcombine.high %v1681_v25, %v1697_v4  ;;  %v1720_v0 = vrot.slane %v1706_v29, %v7366_v3  ;;  %v1656_v11 = vrot.slane %v1642_v42, %v7347_v56 }
 0x24c   :  { %v1769_v46 = vcombine.low %v1713_v22, %v1745_v27  ;;  %v1770_v24 = vcombine.high %v1713_v22, %v1745_v27 }
 0x24d   :  { %v7732_v30 = vpop.permute.xlu0 %968  ;;  %v7742_v45 = vpop.permute.xlu1 %972  ;;  %v1752_v4 = vrot.slane %v1738_v15, %v7366_v3  ;;  %v1961_v15 = vcombine.low %v7278_v62, %v7376_v52 }
 0x24f   :  { %5555 = vrot.lane.b32.xlu0 %v1503_v9, %s10482_s2  ;;  %v1658_v9 = vcombine.high %v7135_v32, %v7207_v10  ;;  %v1688_v10 = vrot.slane %v1674_v40, %v7347_v56  ;;  %v1771_v47 = vcombine.low %v1720_v0, %v1752_v4  ;;  %v1772_v27 = vcombine.high %v1720_v0, %v1752_v4 }
 0x250   :  { %v1945_v0 = vcombine.low %v7241_v28, %v7313_v57 }
 0x251   :  { %v7737_v6 = vpop.permute.xlu0 %976  ;;  %v7759_v25 = vpop.permute.xlu1 %980  ;;  %v1672_v32 = vrot.slane %v1658_v9, %v7347_v56  ;;  %v1753_v50 = vcombine.low %v1688_v10, %v1704_v17  ;;  %v1754_v9 = vcombine.high %v1688_v10, %v1704_v17  ;;  %v1913_v17 = vcombine.low %v7097_v13, %v7169_v49 }
 0x252   :  { %v1969_v10 = vrot.slane %v1961_v15, %v7347_v56  ;;  %v1265_v15 = vcombine.low %v7591_v61, %v7732_v30 }
 0x253   :  { %5563 = vrot.lane.b32.xlu0 %v1504_v16, %s10484_s3  ;;  %v1761_v22 = vrot.slane %v1753_v50, %v7366_v3  ;;  %v1722_v4 = vcombine.high %v1656_v11, %v1672_v32  ;;  %v1249_v50 = vcombine.low %v7486_v7, %v7556_v21 }
 0x255   :  { %v7746_v44 = vpop.permute.xlu0 %984  ;;  %v7769_v14 = vpop.permute.xlu1 %988 }
 0x256   :  { %10828 = vst [vmem:[#allocation192_spill] sm:$0xff] %v7769_v14 }
 0x257   :  { %5571 = vrot.lane.b32.xlu0 %v1769_v46, %s10486_s4  ;;  %v1721_v46 = vcombine.low %v1656_v11, %v1672_v32  ;;  %v1233_v32 = vcombine.low %v7451_v26, %v7521_v55 }
 0x259   :  { %v7756_v41 = vpop.permute.xlu0 %992  ;;  %v1729_v20 = vrot.slane %v1721_v46, %v7366_v3  ;;  %v7780_v42 = vpop.permute.xlu1 %996 }
 0x25a   :  { %10826 = vst [vmem:[#allocation190_spill] sm:$0xff] %v7756_v41  ;;  %10831 = vst [vmem:[#allocation195_spill] sm:$0xff] %v7780_v42 }
 0x25b   :  { %5579 = vrot.lane.b32.xlu0 %v1770_v24, %s10488_s5  ;;  %v1773_v40 = vcombine.low %v1729_v20, %v1761_v22  ;;  %v1929_v24 = vcombine.low %v7133_v31, %v7205_v8  ;;  %v1774_v46 = vcombine.high %v1729_v20, %v1761_v22  ;;  %v1921_v20 = vrot.slane %v1913_v17, %v7347_v56 }
 0x25d   :  { %v7766_v54 = vpop.permute.xlu0 %1000  ;;  %v1937_v11 = vrot.slane %v1929_v24, %v7347_v56  ;;  %v7804_v22 = vpop.permute.xlu1 %1004  ;;  %v1241_v24 = vrot.slane %v1233_v32, %v7347_v56 }
 0x25e   :  { %10827 = vst [vmem:[#allocation191_spill] sm:$0xff] %v7766_v54  ;;  %10833 = vst [vmem:[#allocation197_spill] sm:$0xff] %v7804_v22 }
 0x25f   :  { %5587 = vrot.lane.b32.xlu0 %v1771_v47, %s10490_s6  ;;  %v1977_v42 = vcombine.low %v1921_v20, %v1937_v11 }
 0x261   :  { %v7771_v16 = vpop.permute.xlu0 %1008  ;;  %v7815_v41 = vpop.permute.xlu1 %1012  ;;  %v1985_v32 = vrot.slane %v1977_v42, %v7366_v3 }
 0x262   :  { %10829 = vst [vmem:[#allocation193_spill] sm:$0xff] %v7771_v16  ;;  %v1257_v16 = vrot.slane %v1249_v50, %v7347_v56  ;;  %v1273_v50 = vrot.slane %v1265_v15, %v7347_v56  ;;  %10834 = vst [vmem:[#allocation198_spill] sm:$0xff] %v7815_v41  ;;  %v1930_v41 = vcombine.high %v7133_v31, %v7205_v8 }
 0x263   :  { %5595 = vrot.lane.b32.xlu0 %v1772_v27, %s10495_s7  ;;  %v1768_v27 = vrot.slane %v1754_v9, %v7366_v3 }
 0x264   :  { %v1298_v31 = vcombine.high %v1241_v24, %v1257_v16 }
 0x265   :  { %v7778_v29 = vpop.permute.xlu0 %1016  ;;  %v7842_v8 = vpop.permute.xlu1 %1020 }
 0x266   :  { %10830 = vst [vmem:[#allocation194_spill] sm:$0xff] %v7778_v29  ;;  %v1736_v29 = vrot.slane %v1722_v4, %v7366_v3  ;;  %v1297_v4 = vcombine.low %v1241_v24, %v1257_v16  ;;  %10837 = vst [vmem:[#allocation201_spill] sm:$0xff] %v7842_v8 }
 0x267   :  { %5603 = vrot.lane.b32.xlu0 %v1773_v40, %s10497_s8  ;;  %v1953_v40 = vrot.slane %v1945_v0, %v7347_v56 }
 0x268   :  { %v1775_v59 = vcombine.low %v1736_v29, %v1768_v27  ;;  %v1776_v22 = vcombine.high %v1736_v29, %v1768_v27  ;;  %v7822_v15 = vrot.slane %v1297_v4, %v7366_v3 }
 0x269   :  { %v7792_v47 = vpop.permute.xlu0 %1024  ;;  %v2009_v9 = vcombine.low %v1953_v40, %v1969_v10  ;;  %v2010_v29 = vcombine.high %v1953_v40, %v1969_v10  ;;  %v7852_v40 = vrot.slane %v1930_v41, %v7347_v56 }
 0x26a   :  { %10832 = vst [vmem:[#allocation196_spill] sm:$0xff] %v7792_v47  ;;  %10835 = vst [vmem:[#allocation199_spill] sm:$0xff] %v7822_v15 }
 0x26b   :  { %5611 = vrot.lane.b32.xlu0 %v1774_v46, %s10500_s9  ;;  %v2017_v17 = vrot.slane %v2009_v9, %v7366_v3 }
 0x26d   :  { %v1036_v47 = vpop.permute.xlu0 %1035  ;;  %v2041_v9 = vcombine.low %v1985_v32, %v2017_v17 }
 0x26e   :  { %v1281_v0 = vcombine.low %v7664_v19, %v1036_v47 }
 0x26f   :  { %5619 = vrot.lane.b32.xlu0 %v1775_v59, %s10502_s10  ;;  %v1962_v59 = vcombine.high %v7278_v62, %v7376_v52  ;;  %v1946_v52 = vcombine.high %v7241_v28, %v7313_v57  ;;  %v1282_v62 = vcombine.high %v7664_v19, %v1036_v47  ;;  %v1266_v28 = vcombine.high %v7591_v61, %v7732_v30 }
 0x270   :  { %v1289_v46 = vrot.slane %v1281_v0, %v7347_v56  ;;  %v2042_v19 = vcombine.high %v1985_v32, %v2017_v17  ;;  %v2024_v47 = vrot.slane %v2010_v29, %v7366_v3  ;;  %v1234_v61 = vcombine.high %v7451_v26, %v7521_v55  ;;  %v7886_v17 = vpop.permute.xlu1 %1028 }
 0x271   :  { %v7812_v12 = vpop.permute.xlu0 %1043  ;;  %v7840_v10 = vrot.slane %v1962_v59, %v7347_v56  ;;  %v7879_v24 = vrot.slane %v1266_v28, %v7347_v56  ;;  %10840 = vst [vmem:[#allocation204_spill] sm:$0xff] %v7886_v17 }
 0x272   :  { %v1329_v60 = vcombine.low %v1273_v50, %v1289_v46  ;;  %v1330_v14 = vcombine.high %v1273_v50, %v1289_v46  ;;  %v7891_v29 = vrot.slane %v1234_v61, %v7347_v56 }
 0x273   :  { %5627 = vrot.lane.b32.xlu0 %v1776_v22, %s10504_s11  ;;  %v1978_v22 = vcombine.high %v1921_v20, %v1937_v11  ;;  %v1250_v11 = vcombine.high %v7486_v7, %v7556_v21  ;;  %v1960_v21 = vrot.slane %v1946_v52, %v7347_v56  ;;  %v7863_v7 = vrot.slane %v1282_v62, %v7347_v56 }
 0x274   :  { %v7825_v0 = vrot.slane %v1329_v60, %v7366_v3  ;;  %v1914_v60 = vcombine.high %v7097_v13, %v7169_v49  ;;  %v3425_v13 = vcombine.low %v7505_v38, %v7575_v36  ;;  %v1344_v16 = vrot.slane %v1330_v14, %v7366_v3 }
 0x275   :  { %v7827_v27 = vpop.permute.xlu0 %1051  ;;  %v1992_v30 = vrot.slane %v1978_v22, %v7366_v3  ;;  %v3409_v20 = vcombine.low %v7470_v58, %v7540_v63  ;;  %v1312_v14 = vrot.slane %v1298_v31, %v7366_v3  ;;  %v2025_v26 = vcombine.low %v1960_v21, %v7840_v10 }
 0x276   :  { %10836 = vst [vmem:[#allocation200_spill] sm:$0xff] %v7825_v0  ;;  %v1362_v49 = vcombine.high %v7822_v15, %v7825_v0  ;;  %v7868_v41 = vrot.slane %v1914_v60, %v7347_v56  ;;  %v7876_v55 = vrot.slane %v1250_v11, %v7347_v56  ;;  %v7884_v46 = vrot.slane %v3425_v13, %v7347_v56  ;;  %v10851_v0 = vld [vmem:[#allocation121_spill] sm:$0xff] }
 0x277   :  { %5635 = vrot.lane.b32.xlu0 %v2041_v9, %s10506_s12  ;;  %v2043_v50 = vcombine.low %v1992_v30, %v2024_v47  ;;  %v1363_v32 = vcombine.low %v1312_v14, %v1344_v16  ;;  %v3441_v9 = vcombine.low %v7628_v48, %v7766_v54  ;;  %v1345_v22 = vcombine.low %v7879_v24, %v7863_v7 }
 0x278   :  { %5453 = vrot.lane.b32.xlu1 %v1362_v49, %s6986_s0  ;;  %10839 = vst [vmem:[#allocation203_spill] sm:$0xff] %v7884_v46  ;;  %v1993_v59 = vcombine.low %v7868_v41, %v7852_v40  ;;  %v7899_v52 = vrot.slane %v3409_v20, %v7347_v56  ;;  %v1313_v60 = vcombine.low %v7891_v29, %v7876_v55 }
 0x279   :  { %v7848_v57 = vpop.permute.xlu0 %1059  ;;  %v2044_v11 = vcombine.high %v1992_v30, %v2024_v47  ;;  %v2033_v28 = vrot.slane %v2025_v26, %v7366_v3  ;;  %v1364_v49 = vcombine.high %v1312_v14, %v1344_v16  ;;  %v7915_v61 = vrot.slane %v3441_v9, %v7347_v56  ;;  %v7923_v26 = vpop.permute.xlu1 %1039 }
 0x27a   :  { %10841 = vst [vmem:[#allocation205_spill] sm:$0xff] %v7899_v52  ;;  %v1353_v20 = vrot.slane %v1345_v22, %v7366_v3  ;;  %v2026_v47 = vcombine.high %v1960_v21, %v7840_v10  ;;  %v2233_v30 = vcombine.low %v7284_v33, %v7390_v34  ;;  %v1321_v14 = vrot.slane %v1313_v60, %v7366_v3 }
 0x27b   :  { %5643 = vrot.lane.b32.xlu0 %v2042_v19, %s10508_s13  ;;  %v3473_v19 = vcombine.low %v7899_v52, %v7884_v46  ;;  %10844 = vst [vmem:[#allocation208_spill] sm:$0xff] %v7915_v61  ;;  %v2201_v10 = vcombine.low %v7140_v35, %v7212_v51  ;;  %v2217_v21 = vcombine.low %v7249_v18, %v7319_v43 }
 0x27c   :  { %5461 = vrot.lane.b32.xlu1 %v1363_v32, %s6987_s20  ;;  %v1346_v60 = vcombine.high %v7879_v24, %v7863_v7  ;;  %v2241_v17 = vrot.slane %v2233_v30, %v7347_v56  ;;  %v2040_v8 = vrot.slane %v2026_v47, %v7366_v3  ;;  %v1314_v7 = vcombine.high %v7891_v29, %v7876_v55  ;;  %v10853_v30 = vld [vmem:[#allocation136_spill] sm:$0xff] }
 0x27d   :  { %v7881_v4 = vpop.permute.xlu0 %1067  ;;  %v7938_v22 = vrot.slane %v3473_v19, %v7366_v3  ;;  %v1537_v24 = vcombine.low %v7589_v5, %v7742_v45  ;;  %v1366_v29 = vcombine.high %v1321_v14, %v1353_v20  ;;  %v2234_v63 = vcombine.high %v7284_v33, %v7390_v34 }
 0x27e   :  { %10838 = vst [vmem:[#allocation202_spill] sm:$0xff] %v7881_v4  ;;  %v3457_v62 = vcombine.low %v7700_v2, %v7881_v4 }
 0x27f   :  { %5651 = vrot.lane.b32.xlu0 %v2043_v50, %s10510_s14  ;;  %v2001_v50 = vrot.slane %v1993_v59, %v7366_v3  ;;  %v1994_v59 = vcombine.high %v7868_v41, %v7852_v40  ;;  %10846 = vst [vmem:[#allocation210_spill] sm:$0xff] %v7938_v22  ;;  %v10848_v40 = vld [vmem:[#allocation32_spill] sm:$0xff]  ;;  %v10849_v41 = vld [vmem:[#allocation9_spill] sm:$0xff] }
 0x280   :  { %v7912_v13 = vrot.slane %v3457_v62, %v7347_v56  ;;  %5469 = vrot.lane.b32.xlu1 %v1364_v49, %s6988_s21  ;;  %v1553_v62 = vcombine.low %v7661_v39, %v7923_v26  ;;  %v1365_v49 = vcombine.low %v1321_v14, %v1353_v20  ;;  %v2185_v42 = vcombine.low %v10849_v41, %v10848_v40 }
 0x281   :  { %v7906_v31 = vpop.permute.xlu0 %1075  ;;  %v2045_v9 = vcombine.low %v2001_v50, %v2033_v28  ;;  %v2046_v19 = vcombine.high %v2001_v50, %v2033_v28  ;;  %v2209_v28 = vrot.slane %v2201_v10, %v7347_v56  ;;  %v2225_v50 = vrot.slane %v2217_v21, %v7347_v56 }
 0x282   :  { %10842 = vst [vmem:[#allocation206_spill] sm:$0xff] %v7906_v31  ;;  %10843 = vst [vmem:[#allocation207_spill] sm:$0xff] %v7912_v13  ;;  %v3505_v16 = vcombine.low %v7915_v61, %v7912_v13  ;;  %v2008_v47 = vrot.slane %v1994_v59, %v7366_v3  ;;  %v10854_v31 = vld [vmem:[#allocation106_spill] sm:$0xff]  ;;  %v1561_v55 = vrot.slane %v1553_v62, %v7347_v56  ;;  %v10881_v61 = vld [vmem:[#allocation137_spill] sm:$0xff] }
 0x283   :  { %5659 = vrot.lane.b32.xlu0 %v2044_v11, %s10518_s15  ;;  %v1505_v58 = vcombine.low %v10854_v31, %v10853_v30  ;;  %v1545_v21 = vrot.slane %v1537_v24, %v7347_v56  ;;  %v1328_v59 = vrot.slane %v1314_v7, %v7366_v3  ;;  %v2186_v33 = vcombine.high %v10849_v41, %v10848_v40 }
 0x284   :  { %v7945_v11 = vrot.slane %v3505_v16, %v7366_v3  ;;  %5477 = vrot.lane.b32.xlu1 %v1365_v49, %s6983_s17  ;;  %v1360_v16 = vrot.slane %v1346_v60, %v7366_v3  ;;  %v2193_v49 = vrot.slane %v2185_v42, %v7347_v56  ;;  %v2047_v62 = vcombine.low %v2008_v47, %v2040_v8 }
 0x285   :  { %v7929_v32 = vpop.permute.xlu0 %1083  ;;  %v1513_v14 = vrot.slane %v1505_v58, %v7347_v56  ;;  %v2048_v60 = vcombine.high %v2008_v47, %v2040_v8  ;;  %v2218_v47 = vcombine.high %v7249_v18, %v7319_v43  ;;  %v1538_v43 = vcombine.high %v7589_v5, %v7742_v45 }
 0x286   :  { %10845 = vst [vmem:[#allocation209_spill] sm:$0xff] %v7929_v32  ;;  %10847 = vst [vmem:[#allocation211_spill] sm:$0xff] %v7945_v11  ;;  %v10850_v32 = vld [vmem:[#allocation151_spill] sm:$0xff]  ;;  %v2249_v20 = vcombine.low %v2193_v49, %v2209_v28  ;;  %v1367_v11 = vcombine.low %v1328_v59, %v1360_v16  ;;  %v1368_v7 = vcombine.high %v1328_v59, %v1360_v16 }
 0x287   :  { %5667 = vrot.lane.b32.xlu0 %v2045_v9, %s10515_s16  ;;  %v1521_v15 = vcombine.low %v10851_v0, %v10850_v32  ;;  %v2202_v16 = vcombine.high %v7140_v35, %v7212_v51  ;;  %v1554_v59 = vcombine.high %v7661_v39, %v7923_v26  ;;  %v1522_v51 = vcombine.high %v10851_v0, %v10850_v32 }
 0x288   :  { %5485 = vrot.lane.b32.xlu1 %v1366_v29, %s10457_s22  ;;  %s10522_s22 = smov 62   ;;  %v2257_v58 = vrot.slane %v2249_v20, %v7366_v3  ;;  %v1602_v20 = vcombine.high %v1545_v21, %v1561_v55  ;;  %v2232_v40 = vrot.slane %v2218_v47, %v7347_v56  ;;  %v1506_v41 = vcombine.high %v10854_v31, %v10853_v30 }
 0x289   :  { %v7961_v9 = vpop.permute.xlu0 %1091  ;;  %v1529_v10 = vrot.slane %v1521_v15, %v7347_v56  ;;  %v1568_v0 = vrot.slane %v1554_v59, %v7347_v56  ;;  %v2200_v45 = vrot.slane %v2186_v33, %v7347_v56  ;;  %v10857_v33 = vld [vmem:[#allocation43_spill] sm:$0xff] }
 0x28a   :  { %10852 = vst [vmem:[#allocation32_spill] sm:$0xff] %v7961_v9  ;;  %v2281_v9 = vcombine.low %v2225_v50, %v2241_v17  ;;  %v1616_v5 = vrot.slane %v1602_v20, %v7366_v3 }
 0x28b   :  { %5675 = vrot.lane.b32.xlu0 %v2046_v19, %s10520_s18  ;;  %v1601_v19 = vcombine.low %v1545_v21, %v1561_v55  ;;  %v1569_v42 = vcombine.low %v1513_v14, %v1529_v10  ;;  %v1570_v18 = vcombine.high %v1513_v14, %v1529_v10  ;;  %v1536_v55 = vrot.slane %v1522_v51, %v7347_v56 }
 0x28c   :  { %5493 = vrot.lane.b32.xlu1 %v1367_v11, %s10461_s23  ;;  %v2289_v24 = vrot.slane %v2281_v9, %v7366_v3  ;;  %v2250_v9 = vcombine.high %v2193_v49, %v2209_v28  ;;  %s10526_s23 = smov 64   ;;  %v2216_v28 = vrot.slane %v2202_v16, %v7347_v56  ;;  %v1552_v49 = vrot.slane %v1538_v43, %v7347_v56  ;;  %v10856_v16 = vld [vmem:[#allocation65_spill] sm:$0xff]  ;;  %v10859_v43 = vld [vmem:[#allocation76_spill] sm:$0xff] }
 0x28d   :  { %v7976_v22 = vpop.permute.xlu0 %5451  ;;  %v1609_v29 = vrot.slane %v1601_v19, %v7366_v3  ;;  %v1577_v11 = vrot.slane %v1569_v42, %v7366_v3  ;;  %v1584_v31 = vrot.slane %v1570_v18, %v7366_v3  ;;  %v1520_v14 = vrot.slane %v1506_v41, %v7347_v56 }
 0x28e   :  { %v2313_v8 = vcombine.low %v2257_v58, %v2289_v24  ;;  %v2314_v26 = vcombine.high %v2257_v58, %v2289_v24  ;;  %v2265_v21 = vcombine.low %v2200_v45, %v2216_v28  ;;  %v1617_v19 = vcombine.low %v1552_v49, %v1568_v0 }
 0x28f   :  { %5683 = vrot.lane.b32.xlu0 %v2047_v62, %s10524_s19  ;;  %v2282_v62 = vcombine.high %v2225_v50, %v2241_v17  ;;  %v1633_v34 = vcombine.low %v1577_v11, %v1609_v29  ;;  %v8003_v17 = vrot.slane %v2234_v63, %v7347_v56  ;;  %v2264_v63 = vrot.slane %v2250_v9, %v7366_v3 }
 0x290   :  { %5501 = vrot.lane.b32.xlu1 %v1368_v7, %s10463_s24  ;;  %v1634_v32 = vcombine.high %v1577_v11, %v1609_v29  ;;  %s10528_s24 = smov 66   ;;  %v1635_v42 = vcombine.low %v1584_v31, %v1616_v5  ;;  %v1636_v58 = vcombine.high %v1584_v31, %v1616_v5  ;;  %v2273_v11 = vrot.slane %v2265_v21, %v7366_v3 }
 0x291   :  { %v7981_v15 = vpop.permute.xlu0 %5459  ;;  %v2296_v35 = vrot.slane %v2282_v62, %v7366_v3  ;;  %v2297_v50 = vcombine.low %v2232_v40, %v8003_v17  ;;  %v1625_v62 = vrot.slane %v1617_v19, %v7366_v3  ;;  %v2298_v47 = vcombine.high %v2232_v40, %v8003_v17  ;;  %v10861_v17 = vld [vmem:[#allocation31_spill] sm:$0xff]  ;;  %v10862_v40 = vld [vmem:[#allocation8_spill] sm:$0xff]  ;;  %v10863_v19 = vld [vmem:[#allocation153_spill] sm:$0xff] }
 0x292   :  { %v2266_v18 = vcombine.high %v2200_v45, %v2216_v28  ;;  %v1618_v41 = vcombine.high %v1552_v49, %v1568_v0  ;;  %v1586_v21 = vcombine.high %v1520_v14, %v1536_v55  ;;  %v10864_v28 = vld [vmem:[#allocation123_spill] sm:$0xff] }
 0x293   :  { %5691 = vrot.lane.b32.xlu0 %v2048_v60, %s10522_s22  ;;  %v2315_v10 = vcombine.low %v2264_v63, %v2296_v35  ;;  %v1585_v60 = vcombine.low %v1520_v14, %v1536_v55  ;;  %v2316_v7 = vcombine.high %v2264_v63, %v2296_v35  ;;  %v2305_v29 = vrot.slane %v2297_v50, %v7366_v3  ;;  %v10858_v35 = vld [vmem:[#allocation20_spill] sm:$0xff] }
 0x294   :  { %5509 = vrot.lane.b32.xlu1 %v1633_v34, %s10465_s25  ;;  %s10530_s25 = smov 68   ;;  %v2473_v51 = vcombine.low %v10858_v35, %v10857_v33  ;;  %v2457_v50 = vcombine.low %v10862_v40, %v10861_v17  ;;  %v1793_v45 = vcombine.low %v10864_v28, %v10863_v19  ;;  %v10867_v55 = vld [vmem:[#allocation108_spill] sm:$0xff] }
 0x295   :  { %v7991_v48 = vpop.permute.xlu0 %5467  ;;  %v1593_v59 = vrot.slane %v1585_v60, %v7366_v3  ;;  %v2317_v34 = vcombine.low %v2273_v11, %v2305_v29  ;;  %v2312_v60 = vrot.slane %v2298_v47, %v7366_v3 }
 0x296   :  { %v2465_v54 = vrot.slane %v2457_v50, %v7347_v56 }
 0x297   :  { %5699 = vrot.lane.b32.xlu0 %v2313_v8, %s10526_s23  ;;  %v10855_v8 = vld [vmem:[#allocation89_spill] sm:$0xff]  ;;  %v1637_v5 = vcombine.low %v1593_v59, %v1625_v62 }
 0x298   :  { %5517 = vrot.lane.b32.xlu1 %v1634_v32, %s10467_s26  ;;  %s10532_s26 = smov 70   ;;  %v2505_v9 = vcombine.low %v10856_v16, %v10855_v8  ;;  %v1825_v32 = vcombine.low %v7669_v37, %v7812_v12  ;;  %v2506_v38 = vcombine.high %v10856_v16, %v10855_v8  ;;  %v2458_v16 = vcombine.high %v10862_v40, %v10861_v17 }
 0x299   :  { %v8011_v39 = vpop.permute.xlu0 %5475 }
 0x29a   :  { %v2513_v31 = vrot.slane %v2505_v9, %v7347_v56  ;;  %v2280_v9 = vrot.slane %v2266_v18, %v7366_v3  ;;  %v1600_v18 = vrot.slane %v1586_v21, %v7366_v3 }
 0x29b   :  { %5707 = vrot.lane.b32.xlu0 %v2314_v26, %s10528_s24  ;;  %v10860_v26 = vld [vmem:[#allocation54_spill] sm:$0xff] }
 0x29c   :  { %5525 = vrot.lane.b32.xlu1 %v1635_v42, %s10469_s27  ;;  %v2489_v63 = vcombine.low %v10860_v26, %v10859_v43  ;;  %s10534_s27 = smov 72   ;;  %v10865_v42 = vld [vmem:[#allocation167_spill] sm:$0xff] }
 0x29d   :  { %v8027_v30 = vpop.permute.xlu0 %5483  ;;  %v1809_v0 = vcombine.low %v10865_v42, %v7737_v6 }
 0x29f   :  { %5715 = vrot.lane.b32.xlu0 %v2315_v10, %s10530_s25  ;;  %v2318_v10 = vcombine.high %v2273_v11, %v2305_v29  ;;  %v10866_v29 = vld [vmem:[#allocation138_spill] sm:$0xff]  ;;  %v1833_v11 = vrot.slane %v1825_v32, %v7347_v56  ;;  %v2319_v32 = vcombine.low %v2280_v9, %v2312_v60 }
 0x2a0   :  { %5533 = vrot.lane.b32.xlu1 %v1636_v58, %s10471_s28  ;;  %v2497_v58 = vrot.slane %v2489_v63, %v7347_v56  ;;  %v1777_v14 = vcombine.low %v10867_v55, %v10866_v29  ;;  %s10536_s28 = smov 74   ;;  %v1817_v63 = vrot.slane %v1809_v0, %v7347_v56  ;;  %v1778_v17 = vcombine.high %v10867_v55, %v10866_v29 }
 0x2a1   :  { %v8032_v24 = vpop.permute.xlu0 %5491 }
 0x2a2   :  { %v2553_v47 = vcombine.low %v2497_v58, %v2513_v31 }
 0x2a3   :  { %5723 = vrot.lane.b32.xlu0 %v2316_v7, %s10532_s26  ;;  %v2481_v7 = vrot.slane %v2473_v51, %v7347_v56  ;;  %v1801_v51 = vrot.slane %v1793_v45, %v7347_v56  ;;  %v2320_v45 = vcombine.high %v2280_v9, %v2312_v60  ;;  %v2474_v9 = vcombine.high %v10858_v35, %v10857_v33 }
 0x2a4   :  { %5541 = vrot.lane.b32.xlu1 %v1637_v5, %s10476_s29  ;;  %v1632_v5 = vrot.slane %v1618_v41, %v7366_v3  ;;  %s7022_s29 = smov 76   ;;  %v2561_v0 = vrot.slane %v2553_v47, %v7366_v3  ;;  %v2490_v47 = vcombine.high %v10860_v26, %v10859_v43  ;;  %v1810_v35 = vcombine.high %v10865_v42, %v7737_v6 }
 0x2a5   :  { %v8043_v20 = vpop.permute.xlu0 %5499  ;;  %v2488_v43 = vrot.slane %v2474_v9, %v7347_v56  ;;  %v10868_v9 = vld [vmem:[#allocation91_spill] sm:$0xff] }
 0x2a6   :  { %v1639_v46 = vcombine.low %v1600_v18, %v1632_v5  ;;  %v1640_v21 = vcombine.high %v1600_v18, %v1632_v5  ;;  %v2522_v5 = vcombine.high %v2465_v54, %v2481_v7  ;;  %v1826_v18 = vcombine.high %v7669_v37, %v7812_v12 }
 0x2a7   :  { %5731 = vrot.lane.b32.xlu0 %v2317_v34, %s10534_s27  ;;  %v1638_v34 = vcombine.high %v1593_v59, %v1625_v62  ;;  %v2521_v62 = vcombine.low %v2465_v54, %v2481_v7  ;;  %v1785_v59 = vrot.slane %v1777_v14, %v7347_v56  ;;  %v1794_v54 = vcombine.high %v10864_v28, %v10863_v19 }
 0x2a8   :  { %v2504_v26 = vrot.slane %v2490_v47, %v7347_v56  ;;  %v1840_v40 = vrot.slane %v1826_v18, %v7347_v56  ;;  %v2472_v28 = vrot.slane %v2458_v16, %v7347_v56  ;;  %v8137_v18 = vpop.permute.xlu1 %1047 }
 0x2a9   :  { %v8060_v49 = vpop.permute.xlu0 %5507  ;;  %5549 = vrot.lane.b32.xlu1 %v1638_v34, %s10478_s30  ;;  %v1841_v41 = vcombine.low %v1785_v59, %v1801_v51  ;;  %s7023_s30 = smov 78   ;;  %v2529_v14 = vrot.slane %v2521_v62, %v7366_v3  ;;  %v1874_v62 = vcombine.high %v1817_v63, %v1833_v11  ;;  %v1842_v33 = vcombine.high %v1785_v59, %v1801_v51 }
 0x2aa   :  { %v1808_v7 = vrot.slane %v1794_v54, %v7347_v56  ;;  %v1792_v59 = vrot.slane %v1778_v17, %v7347_v56  ;;  %v10871_v54 = vld [vmem:[#allocation45_spill] sm:$0xff] }
 0x2ab   :  { %5739 = vrot.lane.b32.xlu0 %v2318_v10, %s10536_s28  ;;  %v1873_v10 = vcombine.low %v1817_v63, %v1833_v11  ;;  %v2585_v60 = vcombine.low %v2529_v14, %v2561_v0  ;;  %v2586_v12 = vcombine.high %v2529_v14, %v2561_v0  ;;  %v1888_v6 = vrot.slane %v1874_v62, %v7366_v3 }
 0x2ac   :  { %v1824_v11 = vrot.slane %v1810_v35, %v7347_v56  ;;  %v1856_v51 = vrot.slane %v1842_v33, %v7366_v3  ;;  %v2537_v63 = vcombine.low %v2472_v28, %v2488_v43  ;;  %v10872_v33 = vld [vmem:[#allocation22_spill] sm:$0xff] }
 0x2ad   :  { %v8076_v52 = vpop.permute.xlu0 %5515  ;;  %5557 = vrot.lane.b32.xlu1 %v1639_v46, %s10482_s2  ;;  %v1881_v34 = vrot.slane %v1873_v10, %v7366_v3  ;;  %v1849_v46 = vrot.slane %v1841_v41, %v7366_v3  ;;  %s7024_s2 = smov 80   ;;  %v2745_v35 = vcombine.low %v10872_v33, %v10871_v54 }
 0x2ae   :  { %v1889_v10 = vcombine.low %v1824_v11, %v1840_v40  ;;  %v1907_v41 = vcombine.low %v1856_v51, %v1888_v6  ;;  %v1908_v14 = vcombine.high %v1856_v51, %v1888_v6  ;;  %v10875_v6 = vld [vmem:[#allocation34_spill] sm:$0xff] }
 0x2af   :  { %5747 = vrot.lane.b32.xlu0 %v2319_v32, %s7022_s29  ;;  %v2554_v32 = vcombine.high %v2497_v58, %v2513_v31  ;;  %v1905_v8 = vcombine.low %v1849_v46, %v1881_v34  ;;  %v2520_v31 = vrot.slane %v2506_v38, %v7347_v56  ;;  %v2536_v38 = vrot.slane %v2522_v5, %v7366_v3  ;;  %v10869_v5 = vld [vmem:[#allocation67_spill] sm:$0xff] }
 0x2b0   :  { %v1906_v19 = vcombine.high %v1849_v46, %v1881_v34  ;;  %v2545_v46 = vrot.slane %v2537_v63, %v7366_v3  ;;  %v2777_v47 = vcombine.low %v10869_v5, %v10868_v9  ;;  %v10878_v63 = vld [vmem:[#allocation122_spill] sm:$0xff] }
 0x2b1   :  { %v8081_v50 = vpop.permute.xlu0 %5523  ;;  %5565 = vrot.lane.b32.xlu1 %v1640_v21, %s10484_s3  ;;  %v2568_v58 = vrot.slane %v2554_v32, %v7366_v3  ;;  %s7025_s3 = smov 82   ;;  %v2569_v42 = vcombine.low %v2504_v26, %v2520_v31  ;;  %v1897_v32 = vrot.slane %v1889_v10, %v7366_v3 }
 0x2b3   :  { %5755 = vrot.lane.b32.xlu0 %v2320_v45, %s7023_s30  ;;  %v2587_v55 = vcombine.low %v2536_v38, %v2568_v58  ;;  %v1857_v45 = vcombine.low %v1792_v59, %v1808_v7  ;;  %v2588_v21 = vcombine.high %v2536_v38, %v2568_v58  ;;  %v2577_v34 = vrot.slane %v2569_v42, %v7366_v3  ;;  %v10874_v38 = vld [vmem:[#allocation56_spill] sm:$0xff]  ;;  %v10876_v42 = vld [vmem:[#allocation11_spill] sm:$0xff] }
 0x2b4   :  { %v2538_v58 = vcombine.high %v2472_v28, %v2488_v43  ;;  %v2729_v51 = vcombine.low %v10876_v42, %v10875_v6  ;;  %v10877_v28 = vld [vmem:[#allocation152_spill] sm:$0xff] }
 0x2b5   :  { %v8091_v36 = vpop.permute.xlu0 %5531  ;;  %5573 = vrot.lane.b32.xlu1 %v1905_v8, %s10486_s4  ;;  %s10540_s4 = smov 84   ;;  %v1865_v62 = vrot.slane %v1857_v45, %v7366_v3  ;;  %v2589_v16 = vcombine.low %v2545_v46, %v2577_v34  ;;  %v2065_v10 = vcombine.low %v10878_v63, %v10877_v28  ;;  %v10879_v45 = vld [vmem:[#allocation166_spill] sm:$0xff] }
 0x2b7   :  { %5763 = vrot.lane.b32.xlu0 %v2585_v60, %s7024_s2  ;;  %v2570_v60 = vcombine.high %v2504_v26, %v2520_v31  ;;  %v2097_v31 = vcombine.low %v7667_v1, %v8137_v18  ;;  %v1890_v26 = vcombine.high %v1824_v11, %v1840_v40  ;;  %v2590_v11 = vcombine.high %v2545_v46, %v2577_v34 }
 0x2b8   :  { %v2737_v34 = vrot.slane %v2729_v51, %v7347_v56 }
 0x2b9   :  { %v8109_v37 = vpop.permute.xlu0 %5539  ;;  %5581 = vrot.lane.b32.xlu1 %v1906_v19, %s10488_s5  ;;  %s10538_s5 = smov 86   ;;  %v1909_v19 = vcombine.low %v1865_v62, %v1897_v32  ;;  %v2584_v43 = vrot.slane %v2570_v60, %v7366_v3  ;;  %v10882_v60 = vld [vmem:[#allocation107_spill] sm:$0xff]  ;;  %v8167_v2 = vrot.slane %v2097_v31, %v7347_v56 }
 0x2ba   :  { %v2049_v13 = vcombine.low %v10882_v60, %v10881_v61 }
 0x2bb   :  { %5771 = vrot.lane.b32.xlu0 %v2586_v12, %s7025_s3  ;;  %v10873_v12 = vld [vmem:[#allocation78_spill] sm:$0xff] }
 0x2bc   :  { %v2761_v17 = vcombine.low %v10874_v38, %v10873_v12 }
 0x2bd   :  { %v8124_v29 = vpop.permute.xlu0 %5547  ;;  %5589 = vrot.lane.b32.xlu1 %v1907_v41, %s10490_s6  ;;  %s10542_s6 = smov 88   ;;  %v1858_v41 = vcombine.high %v1792_v59, %v1808_v7  ;;  %v1910_v7 = vcombine.high %v1865_v62, %v1897_v32  ;;  %v1904_v59 = vrot.slane %v1890_v26, %v7366_v3 }
 0x2bf   :  { %5779 = vrot.lane.b32.xlu0 %v2587_v55, %s10540_s4  ;;  %v2785_v55 = vrot.slane %v2777_v47, %v7347_v56  ;;  %v2552_v47 = vrot.slane %v2538_v58, %v7366_v3  ;;  %v1872_v31 = vrot.slane %v1858_v41, %v7366_v3 }
 0x2c1   :  { %v8129_v0 = vpop.permute.xlu0 %5555  ;;  %5597 = vrot.lane.b32.xlu1 %v1908_v14, %s10495_s7  ;;  %v2753_v14 = vrot.slane %v2745_v35, %v7347_v56  ;;  %s10544_s7 = smov 90   ;;  %v8172_v35 = vpop.permute.xlu1 %1055  ;;  %v2591_v32 = vcombine.low %v2552_v47, %v2584_v43  ;;  %v1911_v51 = vcombine.low %v1872_v31, %v1904_v59 }
 0x2c3   :  { %5787 = vrot.lane.b32.xlu0 %v2588_v21, %s10538_s5  ;;  %v2081_v21 = vcombine.low %v10879_v45, %v7759_v25  ;;  %v2793_v62 = vcombine.low %v2737_v34, %v2753_v14 }
 0x2c5   :  { %v8141_v8 = vpop.permute.xlu0 %5563  ;;  %5605 = vrot.lane.b32.xlu1 %v1909_v19, %s10497_s8  ;;  %v2089_v58 = vrot.slane %v2081_v21, %v7347_v56  ;;  %s10628_s8 = smov 92   ;;  %v2592_v21 = vcombine.high %v2552_v47, %v2584_v43 }
 0x2c6   :  { %10870 = vst [vmem:[#allocation9_spill] sm:$0xff] %v8141_v8 }
 0x2c7   :  { %5795 = vrot.lane.b32.xlu0 %v2589_v16, %s10542_s6  ;;  %v2769_v16 = vrot.slane %v2761_v17, %v7347_v56  ;;  %v2073_v17 = vrot.slane %v2065_v10, %v7347_v56  ;;  %v2145_v26 = vcombine.low %v2089_v58, %v8167_v2 }
 0x2c9   :  { %v8159_v40 = vpop.permute.xlu0 %5571  ;;  %v2825_v46 = vcombine.low %v2769_v16, %v2785_v55  ;;  %5613 = vrot.lane.b32.xlu1 %v1910_v7, %s10500_s9  ;;  %v8187_v7 = vpop.permute.xlu1 %1063  ;;  %s10546_s9 = smov 94   ;;  %v2826_v8 = vcombine.high %v2769_v16, %v2785_v55 }
 0x2ca   :  { %10880 = vst [vmem:[#allocation151_spill] sm:$0xff] %v8159_v40  ;;  %v2801_v40 = vrot.slane %v2793_v62, %v7366_v3  ;;  %v2098_v62 = vcombine.high %v7667_v1, %v8137_v18 }
 0x2cb   :  { %5803 = vrot.lane.b32.xlu0 %v2590_v11, %s10544_s7  ;;  %v2057_v11 = vrot.slane %v2049_v13, %v7347_v56  ;;  %v2833_v41 = vrot.slane %v2825_v46, %v7366_v3  ;;  %v2153_v13 = vrot.slane %v2145_v26, %v7366_v3  ;;  %v2762_v26 = vcombine.high %v10874_v38, %v10873_v12 }
 0x2cc   :  { %v2066_v12 = vcombine.high %v10878_v63, %v10877_v28  ;;  %v8227_v28 = vrot.slane %v2098_v62, %v7347_v56  ;;  %v10890_v62 = vld [vmem:[#allocation66_spill] sm:$0xff] }
 0x2cd   :  { %v8178_v19 = vpop.permute.xlu0 %5579  ;;  %v2113_v4 = vcombine.low %v2057_v11, %v2073_v17  ;;  %5621 = vrot.lane.b32.xlu1 %v1911_v51, %s10502_s10  ;;  %v2857_v46 = vcombine.low %v2801_v40, %v2833_v41  ;;  %s10548_s10 = smov 96   ;;  %v2114_v1 = vcombine.high %v2057_v11, %v2073_v17  ;;  %v2858_v38 = vcombine.high %v2801_v40, %v2833_v41 }
 0x2ce   :  { %10883 = vst [vmem:[#allocation121_spill] sm:$0xff] %v8178_v19  ;;  %v1912_v19 = vcombine.high %v1872_v31, %v1904_v59  ;;  %v2746_v59 = vcombine.high %v10872_v33, %v10871_v54  ;;  %v2794_v31 = vcombine.high %v2737_v34, %v2753_v14  ;;  %v8211_v54 = vpop.permute.xlu1 %1071  ;;  %v2840_v33 = vrot.slane %v2826_v8, %v7366_v3 }
 0x2cf   :  { %5811 = vrot.lane.b32.xlu0 %v2591_v32, %s10628_s8  ;;  %v2778_v32 = vcombine.high %v10869_v5, %v10868_v9  ;;  %v2121_v43 = vrot.slane %v2113_v4, %v7366_v3  ;;  %v2146_v9 = vcombine.high %v2089_v58, %v8167_v2  ;;  %v2730_v4 = vcombine.high %v10876_v42, %v10875_v6 }
 0x2d0   :  { %10884 = vst [vmem:[#allocation136_spill] sm:$0xff] %v8211_v54  ;;  %v2082_v2 = vcombine.high %v10879_v45, %v7759_v25  ;;  %v2760_v6 = vrot.slane %v2746_v59, %v7347_v56  ;;  %v2776_v42 = vrot.slane %v2762_v26, %v7347_v56  ;;  %v2808_v14 = vrot.slane %v2794_v31, %v7366_v3  ;;  %v10889_v26 = vld [vmem:[#allocation90_spill] sm:$0xff] }
 0x2d1   :  { %v8184_v10 = vpop.permute.xlu0 %5587  ;;  %5629 = vrot.lane.b32.xlu1 %v1912_v19, %s10504_s11  ;;  %v2177_v5 = vcombine.low %v2121_v43, %v2153_v13  ;;  %v8209_v55 = vrot.slane %v2778_v32, %v7347_v56  ;;  %v2050_v8 = vcombine.high %v10882_v60, %v10881_v61  ;;  %v2178_v63 = vcombine.high %v2121_v43, %v2153_v13  ;;  %s10550_s11 = smov 98  }
 0x2d2   :  { %v2160_v25 = vrot.slane %v2146_v9, %v7366_v3  ;;  %v2744_v45 = vrot.slane %v2730_v4, %v7347_v56  ;;  %v8234_v16 = vrot.slane %v2066_v12, %v7347_v56  ;;  %v2096_v34 = vrot.slane %v2082_v2, %v7347_v56  ;;  %v8241_v58 = vpop.permute.xlu1 %1079  ;;  %v10893_v2 = vld [vmem:[#allocation44_spill] sm:$0xff] }
 0x2d3   :  { %5819 = vrot.lane.b32.xlu0 %v2592_v21, %s10546_s9  ;;  %v2841_v40 = vcombine.low %v2776_v42, %v8209_v55  ;;  %v2128_v61 = vrot.slane %v2114_v1, %v7366_v3  ;;  %v2859_v17 = vcombine.low %v2808_v14, %v2840_v33  ;;  %10887 = vst [vmem:[#allocation65_spill] sm:$0xff] %v8241_v58 }
 0x2d4   :  { %v2809_v19 = vcombine.low %v2744_v45, %v2760_v6  ;;  %v2064_v11 = vrot.slane %v2050_v8, %v7347_v56  ;;  %v2161_v51 = vcombine.low %v2096_v34, %v8227_v28  ;;  %v2860_v32 = vcombine.high %v2808_v14, %v2840_v33 }
 0x2d5   :  { %v8196_v47 = vpop.permute.xlu0 %5595  ;;  %5637 = vrot.lane.b32.xlu1 %v2177_v5, %s10506_s12  ;;  %v2179_v21 = vcombine.low %v2128_v61, %v2160_v25  ;;  %s10552_s12 = smov 100   ;;  %v2849_v43 = vrot.slane %v2841_v40, %v7366_v3  ;;  %v3049_v9 = vcombine.low %v10890_v62, %v10889_v26  ;;  %v2842_v4 = vcombine.high %v2776_v42, %v8209_v55  ;;  %v10897_v42 = vld [vmem:[#allocation33_spill] sm:$0xff] }
 0x2d6   :  { %v2129_v41 = vcombine.low %v2064_v11, %v8234_v16  ;;  %v2169_v59 = vrot.slane %v2161_v51, %v7366_v3  ;;  %v2817_v31 = vrot.slane %v2809_v19, %v7366_v3  ;;  %v8256_v5 = vpop.permute.xlu1 %1087  ;;  %v2810_v8 = vcombine.high %v2744_v45, %v2760_v6  ;;  %v10898_v19 = vld [vmem:[#allocation10_spill] sm:$0xff]  ;;  %v10899_v45 = vld [vmem:[#allocation155_spill] sm:$0xff] }
 0x2d7   :  { %5827 = vrot.lane.b32.xlu0 %v2857_v46, %s10548_s10  ;;  %v2180_v46 = vcombine.high %v2128_v61, %v2160_v25  ;;  %10891 = vst [vmem:[#allocation20_spill] sm:$0xff] %v8256_v5  ;;  %v10896_v25 = vld [vmem:[#allocation55_spill] sm:$0xff]  ;;  %v2162_v61 = vcombine.high %v2096_v34, %v8227_v28  ;;  %v3001_v51 = vcombine.low %v10898_v19, %v10897_v42  ;;  %v10901_v28 = vld [vmem:[#allocation169_spill] sm:$0xff] }
 0x2d8   :  { %v2137_v33 = vrot.slane %v2129_v41, %v7366_v3  ;;  %v2861_v1 = vcombine.low %v2817_v31, %v2849_v43  ;;  %v2862_v41 = vcombine.high %v2817_v31, %v2849_v43  ;;  %v2130_v6 = vcombine.high %v2064_v11, %v8234_v16  ;;  %v10904_v11 = vld [vmem:[#allocation140_spill] sm:$0xff]  ;;  %v10905_v31 = vld [vmem:[#allocation110_spill] sm:$0xff] }
 0x2d9   :  { %v8219_v18 = vpop.permute.xlu0 %5603  ;;  %5645 = vrot.lane.b32.xlu1 %v2178_v63, %s10508_s13  ;;  %s10554_s13 = smov 102   ;;  %v10895_v63 = vld [vmem:[#allocation77_spill] sm:$0xff]  ;;  %v2353_v34 = vcombine.low %v10901_v28, %v7746_v44  ;;  %v2824_v16 = vrot.slane %v2810_v8, %v7366_v3  ;;  %v2321_v54 = vcombine.low %v10905_v31, %v10904_v11 }
 0x2da   :  { %10885 = vst [vmem:[#allocation106_spill] sm:$0xff] %v8219_v18  ;;  %v3033_v40 = vcombine.low %v10896_v25, %v10895_v63  ;;  %v2181_v55 = vcombine.low %v2137_v33, %v2169_v59  ;;  %v8287_v43 = vpop.permute.xlu1 %1095 }
 0x2db   :  { %5835 = vrot.lane.b32.xlu0 %v2858_v38, %s10550_s11  ;;  %v10894_v38 = vld [vmem:[#allocation21_spill] sm:$0xff]  ;;  %10903 = vst [vmem:[#allocation31_spill] sm:$0xff] %v8287_v43  ;;  %v2361_v8 = vrot.slane %v2353_v34, %v7347_v56  ;;  %v2144_v43 = vrot.slane %v2130_v6, %v7366_v3 }
 0x2dc   :  { %v3017_v14 = vcombine.low %v10894_v38, %v10893_v2 }
 0x2dd   :  { %v8239_v60 = vpop.permute.xlu0 %5611  ;;  %5653 = vrot.lane.b32.xlu1 %v2179_v21, %s10510_s14  ;;  %s10557_s14 = smov 104   ;;  %v3057_v21 = vrot.slane %v3049_v9, %v7347_v56  ;;  %v3041_v9 = vrot.slane %v3033_v40, %v7347_v56 }
 0x2de   :  { %10886 = vst [vmem:[#allocation89_spill] sm:$0xff] %v8239_v60  ;;  %v8284_v58 = vrot.slane %v3017_v14, %v7347_v56  ;;  %v3009_v14 = vrot.slane %v3001_v51, %v7347_v56 }
 0x2df   :  { %5843 = vrot.lane.b32.xlu0 %v2859_v17, %s10552_s12  ;;  %v2369_v17 = vcombine.low %v7678_v23, %v7827_v27  ;;  %v3098_v18 = vcombine.high %v3041_v9, %v3057_v21 }
 0x2e1   :  { %v8248_v13 = vpop.permute.xlu0 %5619  ;;  %5661 = vrot.lane.b32.xlu1 %v2180_v46, %s10518_s15  ;;  %s10561_s15 = smov 108  }
 0x2e2   :  { %10888 = vst [vmem:[#allocation43_spill] sm:$0xff] %v8248_v13 }
 0x2e3   :  { %5851 = vrot.lane.b32.xlu0 %v2860_v32, %s10554_s13  ;;  %v10900_v32 = vld [vmem:[#allocation125_spill] sm:$0xff] }
 0x2e4   :  { %v2337_v46 = vcombine.low %v10900_v32, %v10899_v45 }
 0x2e5   :  { %v8261_v12 = vpop.permute.xlu0 %5627  ;;  %5669 = vrot.lane.b32.xlu1 %v2181_v55, %s10515_s16  ;;  %v2182_v55 = vcombine.high %v2137_v33, %v2169_v59  ;;  %s10559_s16 = smov 106  }
 0x2e6   :  { %10892 = vst [vmem:[#allocation76_spill] sm:$0xff] %v8261_v12  ;;  %v8293_v12 = vrot.slane %v2369_v17, %v7347_v56  ;;  %v8299_v40 = vrot.slane %v2337_v46, %v7347_v56 }
 0x2e7   :  { %5859 = vrot.lane.b32.xlu0 %v2861_v1, %s10557_s14  ;;  %v2856_v1 = vrot.slane %v2842_v4, %v7366_v3  ;;  %v2176_v4 = vrot.slane %v2162_v61, %v7366_v3  ;;  %v2329_v61 = vrot.slane %v2321_v54, %v7347_v56 }
 0x2e8   :  { %v2417_v51 = vcombine.low %v2361_v8, %v8293_v12 }
 0x2e9   :  { %v8280_v5 = vpop.permute.xlu0 %5635  ;;  %5677 = vrot.lane.b32.xlu1 %v2182_v55, %s10520_s18  ;;  %v2863_v59 = vcombine.low %v2824_v16, %v2856_v1  ;;  %v2183_v13 = vcombine.low %v2144_v43, %v2176_v4  ;;  %v2385_v46 = vcombine.low %v2329_v61, %v8299_v40  ;;  %v2864_v34 = vcombine.high %v2824_v16, %v2856_v1  ;;  %s10566_s18 = smov 110  }
 0x2ea   :  { %10902 = vst [vmem:[#allocation54_spill] sm:$0xff] %v8280_v5  ;;  %v3097_v5 = vcombine.low %v3041_v9, %v3057_v21  ;;  %v8306_v33 = vpop.permute.xlu1 %5453  ;;  %v2425_v54 = vrot.slane %v2417_v51, %v7366_v3  ;;  %v3066_v16 = vcombine.high %v3009_v14, %v8284_v58  ;;  %v3002_v9 = vcombine.high %v10898_v19, %v10897_v42 }
 0x2eb   :  { %5867 = vrot.lane.b32.xlu0 %v2862_v41, %s10559_s16  ;;  %10907 = vst [vmem:[#allocation153_spill] sm:$0xff] %v8306_v33  ;;  %v3065_v41 = vcombine.low %v3009_v14, %v8284_v58  ;;  %v3112_v58 = vrot.slane %v3098_v18, %v7366_v3  ;;  %v2322_v18 = vcombine.high %v10905_v31, %v10904_v11 }
 0x2ec   :  { %v3105_v55 = vrot.slane %v3097_v5, %v7366_v3  ;;  %v3080_v19 = vrot.slane %v3066_v16, %v7366_v3 }
 0x2ed   :  { %v8304_v17 = vpop.permute.xlu0 %5643  ;;  %5685 = vrot.lane.b32.xlu1 %v2183_v13, %s10524_s19  ;;  %v3073_v60 = vrot.slane %v3065_v41, %v7366_v3  ;;  %v2393_v13 = vrot.slane %v2385_v46, %v7366_v3  ;;  %s10578_s19 = smov 114   ;;  %v2336_v51 = vrot.slane %v2322_v18, %v7347_v56  ;;  %v10918_v18 = vld [vmem:[#allocation124_spill] sm:$0xff] }
 0x2ee   :  { %10906 = vst [vmem:[#allocation8_spill] sm:$0xff] %v8304_v17  ;;  %v8317_v33 = vpop.permute.xlu1 %5461  ;;  %v2184_v17 = vcombine.high %v2144_v43, %v2176_v4  ;;  %v3018_v43 = vcombine.high %v10894_v38, %v10893_v2  ;;  %v3034_v4 = vcombine.high %v10896_v25, %v10895_v63  ;;  %v2338_v38 = vcombine.high %v10900_v32, %v10899_v45 }
 0x2ef   :  { %5875 = vrot.lane.b32.xlu0 %v2863_v59, %s10561_s15  ;;  %10908 = vst [vmem:[#allocation123_spill] sm:$0xff] %v8317_v33  ;;  %v3050_v59 = vcombine.high %v10890_v62, %v10889_v26  ;;  %v3129_v5 = vcombine.low %v3073_v60, %v3105_v55  ;;  %v2370_v26 = vcombine.high %v7678_v23, %v7827_v27 }
 0x2f0   :  { %v2418_v62 = vcombine.high %v2361_v8, %v8293_v12  ;;  %v2449_v21 = vcombine.low %v2393_v13, %v2425_v54  ;;  %v2386_v63 = vcombine.high %v2329_v61, %v8299_v40  ;;  %v2354_v23 = vcombine.high %v10901_v28, %v7746_v44 }
 0x2f1   :  { %v8314_v6 = vpop.permute.xlu0 %5651  ;;  %5693 = vrot.lane.b32.xlu1 %v2184_v17, %s10522_s22  ;;  %s10572_s22 = smov 112   ;;  %v3064_v2 = vrot.slane %v3050_v59, %v7347_v56  ;;  %v3130_v12 = vcombine.high %v3073_v60, %v3105_v55  ;;  %v3032_v25 = vrot.slane %v3018_v43, %v7347_v56  ;;  %v3048_v42 = vrot.slane %v3034_v4, %v7347_v56 }
 0x2f2   :  { %v8333_v41 = vpop.permute.xlu1 %5469  ;;  %v2384_v45 = vrot.slane %v2370_v26, %v7347_v56  ;;  %v2450_v14 = vcombine.high %v2393_v13, %v2425_v54  ;;  %v2432_v44 = vrot.slane %v2418_v62, %v7366_v3  ;;  %v3016_v60 = vrot.slane %v3002_v9, %v7347_v56 }
 0x2f3   :  { %5883 = vrot.lane.b32.xlu0 %v2864_v34, %s10566_s18  ;;  %10909 = vst [vmem:[#allocation167_spill] sm:$0xff] %v8333_v41  ;;  %v3113_v28 = vcombine.low %v3048_v42, %v3064_v2  ;;  %v2352_v40 = vrot.slane %v2338_v38, %v7347_v56  ;;  %v2368_v8 = vrot.slane %v2354_v23, %v7347_v56  ;;  %v10936_v41 = vld [vmem:[#allocation94_spill] sm:$0xff] }
 0x2f4   :  { %v2400_v11 = vrot.slane %v2386_v63, %v7366_v3  ;;  %v3131_v17 = vcombine.low %v3080_v19, %v3112_v58  ;;  %v3081_v61 = vcombine.low %v3016_v60, %v3032_v25  ;;  %v3132_v13 = vcombine.high %v3080_v19, %v3112_v58 }
 0x2f5   :  { %v8326_v1 = vpop.permute.xlu0 %5659  ;;  %5701 = vrot.lane.b32.xlu1 %v2449_v21, %s10526_s23  ;;  %v2433_v46 = vcombine.low %v2368_v8, %v2384_v45  ;;  %s10584_s23 = smov 116   ;;  %v2401_v54 = vcombine.low %v2336_v51, %v2352_v40  ;;  %v3114_v62 = vcombine.high %v3048_v42, %v3064_v2  ;;  %v3082_v38 = vcombine.high %v3016_v60, %v3032_v25  ;;  %v10917_v42 = vld [vmem:[#allocation154_spill] sm:$0xff] }
 0x2f6   :  { %v8357_v32 = vpop.permute.xlu1 %5477  ;;  %v2451_v55 = vcombine.low %v2400_v11, %v2432_v44  ;;  %v2452_v16 = vcombine.high %v2400_v11, %v2432_v44  ;;  %v3089_v26 = vrot.slane %v3081_v61, %v7366_v3  ;;  %v2641_v63 = vcombine.low %v7674_v53, %v8172_v35  ;;  %v10920_v11 = vld [vmem:[#allocation168_spill] sm:$0xff]  ;;  %v10923_v61 = vld [vmem:[#allocation109_spill] sm:$0xff] }
 0x2f7   :  { %5891 = vrot.lane.b32.xlu0 %v3129_v5, %s10572_s22  ;;  %10910 = vst [vmem:[#allocation138_spill] sm:$0xff] %v8357_v32  ;;  %v3121_v5 = vrot.slane %v3113_v28, %v7366_v3  ;;  %v2441_v4 = vrot.slane %v2433_v46, %v7366_v3  ;;  %v2409_v21 = vrot.slane %v2401_v54, %v7366_v3  ;;  %v10919_v28 = vld [vmem:[#allocation192_spill] sm:$0xff] }
 0x2f8   :  { %v2434_v23 = vcombine.high %v2368_v8, %v2384_v45  ;;  %v3128_v2 = vrot.slane %v3114_v62, %v7366_v3  ;;  %v2402_v44 = vcombine.high %v2336_v51, %v2352_v40  ;;  %v3096_v60 = vrot.slane %v3082_v38, %v7366_v3  ;;  %v10922_v8 = vld [vmem:[#allocation139_spill] sm:$0xff] }
 0x2f9   :  { %v8349_v27 = vpop.permute.xlu0 %5667  ;;  %5709 = vrot.lane.b32.xlu1 %v2450_v14, %s10528_s24  ;;  %s10590_s24 = smov 118   ;;  %v3133_v58 = vcombine.low %v3089_v26, %v3121_v5  ;;  %v2453_v19 = vcombine.low %v2409_v21, %v2441_v4  ;;  %v2609_v14 = vcombine.low %v10918_v18, %v10917_v42  ;;  %v3134_v45 = vcombine.high %v3089_v26, %v3121_v5 }
 0x2fa   :  { %v8369_v34 = vpop.permute.xlu1 %5485  ;;  %v2593_v46 = vcombine.low %v10923_v61, %v10922_v8  ;;  %v2448_v40 = vrot.slane %v2434_v23, %v7366_v3  ;;  %v2416_v5 = vrot.slane %v2402_v44, %v7366_v3  ;;  %v3135_v62 = vcombine.low %v3096_v60, %v3128_v2  ;;  %v10928_v23 = vld [vmem:[#allocation69_spill] sm:$0xff] }
 0x2fb   :  { %5899 = vrot.lane.b32.xlu0 %v3130_v12, %s10578_s19  ;;  %10912 = vst [vmem:[#allocation91_spill] sm:$0xff] %v8369_v34  ;;  %v2617_v51 = vrot.slane %v2609_v14, %v7347_v56  ;;  %v10929_v14 = vld [vmem:[#allocation99_spill] sm:$0xff]  ;;  %v10935_v34 = vld [vmem:[#allocation58_spill] sm:$0xff] }
 0x2fd   :  { %v8366_v31 = vpop.permute.xlu0 %5675  ;;  %5717 = vrot.lane.b32.xlu1 %v2451_v55, %s10530_s25  ;;  %s10596_s25 = smov 120   ;;  %v2649_v55 = vrot.slane %v2641_v63, %v7347_v56  ;;  %v10927_v63 = vld [vmem:[#allocation93_spill] sm:$0xff] }
 0x2fe   :  { %10911 = vst [vmem:[#allocation108_spill] sm:$0xff] %v8366_v31  ;;  %v8376_v43 = vpop.permute.xlu1 %5493 }
 0x2ff   :  { %5907 = vrot.lane.b32.xlu0 %v3131_v17, %s10584_s23  ;;  %10914 = vst [vmem:[#allocation45_spill] sm:$0xff] %v8376_v43  ;;  %v2625_v17 = vcombine.low %v10920_v11, %v10919_v28 }
 0x301   :  { %v8373_v59 = vpop.permute.xlu0 %5683  ;;  %5725 = vrot.lane.b32.xlu1 %v2452_v16, %s10532_s26  ;;  %s10602_s26 = smov 122   ;;  %v2633_v16 = vrot.slane %v2625_v17, %v7347_v56  ;;  %v10930_v17 = vld [vmem:[#allocation98_spill] sm:$0xff] }
 0x302   :  { %10913 = vst [vmem:[#allocation67_spill] sm:$0xff] %v8373_v59  ;;  %v8387_v12 = vpop.permute.xlu1 %5501 }
 0x303   :  { %5915 = vrot.lane.b32.xlu0 %v3132_v13, %s10590_s24  ;;  %10916 = vst [vmem:[#allocation78_spill] sm:$0xff] %v8387_v12  ;;  %v2454_v13 = vcombine.high %v2409_v21, %v2441_v4  ;;  %v2689_v38 = vcombine.low %v2633_v16, %v2649_v55  ;;  %v2455_v21 = vcombine.low %v2416_v5, %v2448_v40  ;;  %v10933_v12 = vld [vmem:[#allocation24_spill] sm:$0xff] }
 0x305   :  { %v8383_v9 = vpop.permute.xlu0 %5691  ;;  %5733 = vrot.lane.b32.xlu1 %v2453_v19, %s10534_s27  ;;  %s10608_s27 = smov 124   ;;  %v3322_v19 = vcombine.high %v10928_v23, %v10927_v63  ;;  %v2456_v63 = vcombine.high %v2416_v5, %v2448_v40  ;;  %v10939_v23 = vld [vmem:[#allocation36_spill] sm:$0xff] }
 0x306   :  { %10915 = vst [vmem:[#allocation22_spill] sm:$0xff] %v8383_v9  ;;  %v8402_v54 = vpop.permute.xlu1 %5509 }
 0x307   :  { %5923 = vrot.lane.b32.xlu0 %v3133_v58, %s10596_s25  ;;  %10924 = vst [vmem:[#allocation34_spill] sm:$0xff] %v8402_v54  ;;  %v2601_v58 = vrot.slane %v2593_v46, %v7347_v56  ;;  %v3136_v54 = vcombine.high %v3096_v60, %v3128_v2  ;;  %v10932_v46 = vld [vmem:[#allocation47_spill] sm:$0xff]  ;;  %v3336_v60 = vrot.slane %v3322_v19, %v7347_v56 }
 0x308   :  { %v3290_v43 = vcombine.high %v10933_v12, %v10932_v46  ;;  %v2690_v19 = vcombine.high %v2633_v16, %v2649_v55 }
 0x309   :  { %v8396_v25 = vpop.permute.xlu0 %5699  ;;  %5741 = vrot.lane.b32.xlu1 %v2454_v13, %s10536_s28  ;;  %v2657_v13 = vcombine.low %v2601_v58, %v2617_v51  ;;  %s10614_s28 = smov 126  }
 0x30a   :  { %10921 = vst [vmem:[#allocation56_spill] sm:$0xff] %v8396_v25  ;;  %v8413_v4 = vpop.permute.xlu1 %5517 }
 0x30b   :  { %5931 = vrot.lane.b32.xlu0 %v3134_v45, %s10602_s26  ;;  %10926 = vst [vmem:[#allocation152_spill] sm:$0xff] %v8413_v4  ;;  %v3370_v45 = vcombine.high %v10930_v17, %v10929_v14  ;;  %v10934_v4 = vld [vmem:[#allocation80_spill] sm:$0xff]  ;;  %v10940_v14 = vld [vmem:[#allocation13_spill] sm:$0xff] }
 0x30c   :  { %v3306_v32 = vcombine.high %v10935_v34, %v10934_v4  ;;  %v3274_v2 = vcombine.high %v10940_v14, %v10939_v23  ;;  %v2665_v34 = vrot.slane %v2657_v13, %v7366_v3  ;;  %v10943_v4 = vld [vmem:[#allocation102_spill] sm:$0xff] }
 0x30d   :  { %v8410_v26 = vpop.permute.xlu0 %5707  ;;  %5749 = vrot.lane.b32.xlu1 %v2455_v21, %s7022_s29  ;;  %v2697_v21 = vrot.slane %v2689_v38, %v7366_v3  ;;  %v3384_v40 = vrot.slane %v3370_v45, %v7366_v3  ;;  %v2642_v38 = vcombine.high %v7674_v53, %v8172_v35  ;;  %v2658_v45 = vcombine.high %v2601_v58, %v2617_v51 }
 0x30e   :  { %10925 = vst [vmem:[#allocation11_spill] sm:$0xff] %v8410_v26  ;;  %v8429_v26 = vpop.permute.xlu1 %5525  ;;  %v3320_v5 = vrot.slane %v3306_v32, %v7347_v56  ;;  %v2626_v32 = vcombine.high %v10920_v11, %v10919_v28 }
 0x30f   :  { %5939 = vrot.lane.b32.xlu0 %v3135_v62, %s10608_s27  ;;  %v10937_v62 = vld [vmem:[#allocation96_spill] sm:$0xff]  ;;  %10938 = vst [vmem:[#allocation166_spill] sm:$0xff] %v8429_v26  ;;  %v2656_v16 = vrot.slane %v2642_v38, %v7347_v56  ;;  %v2672_v51 = vrot.slane %v2658_v45, %v7366_v3 }
 0x310   :  { %v3338_v33 = vcombine.high %v10937_v62, %v10936_v41  ;;  %v10942_v41 = vld [vmem:[#allocation103_spill] sm:$0xff]  ;;  %v2721_v62 = vcombine.low %v2665_v34, %v2697_v21  ;;  %v3385_v23 = vcombine.low %v3320_v5, %v3336_v60  ;;  %v2640_v11 = vrot.slane %v2626_v32, %v7347_v56 }
 0x311   :  { %v8421_v44 = vpop.permute.xlu0 %5715  ;;  %5757 = vrot.lane.b32.xlu1 %v2456_v63, %s7023_s30  ;;  %v3402_v17 = vcombine.high %v10943_v4, %v10942_v41  ;;  %v3288_v63 = vrot.slane %v3274_v2, %v7347_v56  ;;  %v2722_v2 = vcombine.high %v2665_v34, %v2697_v21  ;;  %v10955_v41 = vld [vmem:[#allocation57_spill] sm:$0xff] }
 0x312   :  { %10931 = vst [vmem:[#allocation122_spill] sm:$0xff] %v8421_v44  ;;  %v8449_v46 = vpop.permute.xlu1 %5533  ;;  %v3352_v13 = vrot.slane %v3338_v33, %v7366_v3  ;;  %v2594_v33 = vcombine.high %v10923_v61, %v10922_v8  ;;  %v2705_v21 = vcombine.low %v2640_v11, %v2656_v16  ;;  %v10969_v44 = vld [vmem:[#allocation112_spill] sm:$0xff] }
 0x313   :  { %5947 = vrot.lane.b32.xlu0 %v3136_v54, %s10614_s28  ;;  %v8444_v54 = vrot.slane %v3290_v43, %v7347_v56  ;;  %10944 = vst [vmem:[#allocation107_spill] sm:$0xff] %v8449_v46  ;;  %v2610_v43 = vcombine.high %v10918_v18, %v10917_v42  ;;  %v2704_v42 = vrot.slane %v2690_v19, %v7366_v3  ;;  %v10949_v19 = vld [vmem:[#allocation92_spill] sm:$0xff] }
 0x314   :  { %v3403_v35 = vcombine.low %v3352_v13, %v3384_v40  ;;  %v3393_v18 = vrot.slane %v3385_v23, %v7366_v3  ;;  %v3404_v61 = vcombine.high %v3352_v13, %v3384_v40  ;;  %v2608_v58 = vrot.slane %v2594_v33, %v7347_v56  ;;  %v10952_v13 = vld [vmem:[#allocation46_spill] sm:$0xff] }
 0x315   :  { %v8438_v12 = vpop.permute.xlu0 %5723  ;;  %5765 = vrot.lane.b32.xlu1 %v2721_v62, %s7024_s2  ;;  %v3353_v55 = vcombine.low %v3288_v63, %v8444_v54  ;;  %v2624_v28 = vrot.slane %v2610_v43, %v7347_v56  ;;  %v10950_v62 = vld [vmem:[#allocation68_spill] sm:$0xff]  ;;  %v3386_v43 = vcombine.high %v3320_v5, %v3336_v60  ;;  %v2713_v60 = vrot.slane %v2705_v21, %v7366_v3  ;;  %v10957_v5 = vld [vmem:[#allocation35_spill] sm:$0xff]  ;;  %v10960_v21 = vld [vmem:[#allocation181_spill] sm:$0xff] }
 0x316   :  { %10941 = vst [vmem:[#allocation137_spill] sm:$0xff] %v8438_v12  ;;  %v8465_v14 = vpop.permute.xlu1 %5541  ;;  %v3593_v23 = vcombine.low %v10950_v62, %v10949_v19 }
 0x317   :  { %5955 = vrot.lane.b32.xlu0 %v3402_v17, %s6986_s0  ;;  %10946 = vst [vmem:[#allocation66_spill] sm:$0xff] %v8465_v14  ;;  %v2723_v17 = vcombine.low %v2672_v51, %v2704_v42  ;;  %v3361_v38 = vrot.slane %v3353_v55, %v7366_v3  ;;  %v2673_v32 = vcombine.low %v2608_v58, %v2624_v28 }
 0x318   :  { %v2724_v55 = vcombine.high %v2672_v51, %v2704_v42  ;;  %v3601_v46 = vrot.slane %v3593_v23, %v7347_v56  ;;  %v2706_v51 = vcombine.high %v2640_v11, %v2656_v16 }
 0x319   :  { %v8459_v53 = vpop.permute.xlu0 %5731  ;;  %5773 = vrot.lane.b32.xlu1 %v2722_v2, %s7025_s3  ;;  %v3405_v40 = vcombine.low %v3361_v38, %v3393_v18  ;;  %v10954_v2 = vld [vmem:[#allocation79_spill] sm:$0xff]  ;;  %v2681_v26 = vrot.slane %v2673_v32, %v7366_v3 }
 0x31a   :  { %10945 = vst [vmem:[#allocation90_spill] sm:$0xff] %v8459_v53  ;;  %v3577_v4 = vcombine.low %v10955_v41, %v10954_v2  ;;  %v10965_v53 = vld [vmem:[#allocation190_spill] sm:$0xff]  ;;  %v2720_v25 = vrot.slane %v2706_v51, %v7366_v3 }
 0x31b   :  { %5963 = vrot.lane.b32.xlu0 %v3403_v35, %s6987_s20  ;;  %v8477_v34 = vpop.permute.xlu1 %5549  ;;  %v10953_v35 = vld [vmem:[#allocation23_spill] sm:$0xff]  ;;  %v2725_v23 = vcombine.low %v2681_v26, %v2713_v60 }
 0x31c   :  { %10948 = vst [vmem:[#allocation21_spill] sm:$0xff] %v8477_v34  ;;  %v3561_v33 = vcombine.low %v10953_v35, %v10952_v13  ;;  %v3585_v42 = vrot.slane %v3577_v4, %v7347_v56  ;;  %v10966_v4 = vld [vmem:[#allocation171_spill] sm:$0xff] }
 0x31d   :  { %v8474_v8 = vpop.permute.xlu0 %5739  ;;  %5781 = vrot.lane.b32.xlu1 %v2723_v17, %s10540_s4  ;;  %v10958_v17 = vld [vmem:[#allocation12_spill] sm:$0xff]  ;;  %v2897_v16 = vcombine.low %v10966_v4, %v10965_v53  ;;  %s10971_s4 = smov 12  }
 0x31e   :  { %10947 = vst [vmem:[#allocation44_spill] sm:$0xff] %v8474_v8  ;;  %v3545_v14 = vcombine.low %v10958_v17, %v10957_v5  ;;  %v3406_v8 = vcombine.high %v3361_v38, %v3393_v18  ;;  %v3641_v38 = vcombine.low %v3585_v42, %v3601_v46 }
 0x31f   :  { %5971 = vrot.lane.b32.xlu0 %v3404_v61, %s6988_s21  ;;  %v3354_v61 = vcombine.high %v3288_v63, %v8444_v54  ;;  %v8491_v34 = vpop.permute.xlu1 %5557  ;;  %v3400_v54 = vrot.slane %v3386_v43, %v7366_v3  ;;  %v8504_v63 = vrot.slane %v3561_v33, %v7347_v56  ;;  %v2674_v43 = vcombine.high %v2608_v58, %v2624_v28  ;;  %v10964_v33 = vld [vmem:[#allocation127_spill] sm:$0xff] }
 0x320   :  { %10956 = vst [vmem:[#allocation55_spill] sm:$0xff] %v8491_v34  ;;  %v3553_v18 = vrot.slane %v3545_v14, %v7347_v56  ;;  %v2726_v58 = vcombine.high %v2681_v26, %v2713_v60  ;;  %v2905_v9 = vrot.slane %v2897_v16, %v7347_v56  ;;  %v3642_v16 = vcombine.high %v3585_v42, %v3601_v46 }
 0x321   :  { %v8484_v45 = vpop.permute.xlu0 %5747  ;;  %5789 = vrot.lane.b32.xlu1 %v2724_v55, %s10538_s5  ;;  %s10962_s5 = smov 10   ;;  %v3368_v32 = vrot.slane %v3354_v61, %v7366_v3  ;;  %v10963_v55 = vld [vmem:[#allocation157_spill] sm:$0xff]  ;;  %v2688_v59 = vrot.slane %v2674_v43, %v7366_v3 }
 0x322   :  { %10951 = vst [vmem:[#allocation77_spill] sm:$0xff] %v8484_v45  ;;  %v3609_v12 = vcombine.low %v3553_v18, %v8504_v63 }
 0x323   :  { %5979 = vrot.lane.b32.xlu0 %v3405_v40, %s6983_s17  ;;  %v2913_v40 = vcombine.low %v10960_v21, %v7848_v57  ;;  %v8509_v34 = vpop.permute.xlu1 %5565  ;;  %v3408_v31 = vcombine.high %v3368_v32, %v3400_v54  ;;  %v2727_v51 = vcombine.low %v2688_v59, %v2720_v25 }
 0x324   :  { %10961 = vst [vmem:[#allocation10_spill] sm:$0xff] %v8509_v34  ;;  %v3407_v34 = vcombine.low %v3368_v32, %v3400_v54 }
 0x325   :  { %v8500_v45 = vpop.permute.xlu0 %5755  ;;  %5797 = vrot.lane.b32.xlu1 %v2725_v23, %s10542_s6  ;;  %v8525_v14 = vrot.slane %v2913_v40, %v7347_v56  ;;  %v3649_v23 = vrot.slane %v3641_v38, %v7366_v3  ;;  %s10973_s6 = smov 14   ;;  %v3594_v38 = vcombine.high %v10950_v62, %v10949_v19  ;;  %v3546_v19 = vcombine.high %v10958_v17, %v10957_v5 }
 0x326   :  { %10959 = vst [vmem:[#allocation33_spill] sm:$0xff] %v8500_v45  ;;  %v2881_v45 = vcombine.low %v10964_v33, %v10963_v55  ;;  %v2914_v5 = vcombine.high %v10960_v21, %v7848_v57 }
 0x327   :  { %5987 = vrot.lane.b32.xlu0 %v3406_v8, %s10962_s5  ;;  %v10968_v8 = vld [vmem:[#allocation142_spill] sm:$0xff]  ;;  %v8527_v28 = vpop.permute.xlu1 %5573  ;;  %v8564_v62 = vrot.slane %v3594_v38, %v7347_v56  ;;  %v2962_v17 = vcombine.high %v2905_v9, %v8525_v14 }
 0x328   :  { %v2865_v61 = vcombine.low %v10969_v44, %v10968_v8  ;;  %10970 = vst [vmem:[#allocation125_spill] sm:$0xff] %v8527_v28  ;;  %v10983_v38 = vld [vmem:[#allocation26_spill] sm:$0xff] }
 0x329   :  { %v8519_v11 = vpop.permute.xlu0 %5763  ;;  %5805 = vrot.lane.b32.xlu1 %v2726_v58, %s10544_s7  ;;  %v3578_v58 = vcombine.high %v10955_v41, %v10954_v2  ;;  %s10976_s7 = smov 16   ;;  %v3656_v2 = vrot.slane %v3642_v16, %v7366_v3 }
 0x32a   :  { %10967 = vst [vmem:[#allocation155_spill] sm:$0xff] %v8519_v11  ;;  %v8533_v11 = vrot.slane %v2881_v45, %v7347_v56  ;;  %v2873_v26 = vrot.slane %v2865_v61, %v7347_v56  ;;  %v3617_v45 = vrot.slane %v3609_v12, %v7366_v3  ;;  %v3562_v61 = vcombine.high %v10953_v35, %v10952_v13 }
 0x32b   :  { %5995 = vrot.lane.b32.xlu0 %v3407_v34, %s10971_s4  ;;  %v2961_v34 = vcombine.low %v2905_v9, %v8525_v14  ;;  %v8542_v60 = vpop.permute.xlu1 %5581  ;;  %v2882_v9 = vcombine.high %v10964_v33, %v10963_v55  ;;  %v2898_v14 = vcombine.high %v10966_v4, %v10965_v53  ;;  %v10987_v55 = vld [vmem:[#allocation97_spill] sm:$0xff]  ;;  %v10988_v33 = vld [vmem:[#allocation71_spill] sm:$0xff]  ;;  %v2866_v53 = vcombine.high %v10969_v44, %v10968_v8 }
 0x32c   :  { %10972 = vst [vmem:[#allocation169_spill] sm:$0xff] %v8542_v60  ;;  %v2929_v43 = vcombine.low %v2873_v26, %v8533_v11  ;;  %v3673_v32 = vcombine.low %v3617_v45, %v3649_v23  ;;  %v2728_v60 = vcombine.high %v2688_v59, %v2720_v25  ;;  %v3674_v35 = vcombine.high %v3617_v45, %v3649_v23  ;;  %v10982_v45 = vld [vmem:[#allocation49_spill] sm:$0xff] }
 0x32d   :  { %v8538_v40 = vpop.permute.xlu0 %5771  ;;  %5813 = vrot.lane.b32.xlu1 %v2727_v51, %s10628_s8  ;;  %v2969_v46 = vrot.slane %v2961_v34, %v7366_v3  ;;  %v8572_v59 = vrot.slane %v3562_v61, %v7347_v56  ;;  %v8575_v25 = vrot.slane %v3578_v58, %v7347_v56  ;;  %v8585_v23 = vrot.slane %v3546_v19, %v7347_v56  ;;  %v10980_v34 = vld [vmem:[#allocation37_spill] sm:$0xff]  ;;  %v10985_v58 = vld [vmem:[#allocation38_spill] sm:$0xff]  ;;  %s11102_s8 = smov 60  }
 0x32e   :  { %v2937_v13 = vrot.slane %v2929_v43, %v7366_v3  ;;  %v3833_v16 = vcombine.low %v10983_v38, %v10982_v45  ;;  %v2930_v21 = vcombine.high %v2873_v26, %v8533_v11  ;;  %v3865_v11 = vcombine.low %v10988_v33, %v10987_v55 }
 0x32f   :  { %6003 = vrot.lane.b32.xlu0 %v3408_v31, %s10973_s6  ;;  %v3610_v31 = vcombine.high %v3553_v18, %v8504_v63  ;;  %v8557_v12 = vpop.permute.xlu1 %5589  ;;  %v3657_v57 = vcombine.low %v8575_v25, %v8564_v62  ;;  %v8612_v4 = vrot.slane %v2914_v5, %v7347_v56  ;;  %v8627_v8 = vrot.slane %v2882_v9, %v7347_v56 }
 0x330   :  { %10975 = vst [vmem:[#allocation110_spill] sm:$0xff] %v8557_v12  ;;  %v2993_v42 = vcombine.low %v2937_v13, %v2969_v46  ;;  %v8621_v28 = vrot.slane %v3833_v16, %v7347_v56  ;;  %v8644_v9 = vrot.slane %v3865_v11, %v7347_v56 }
 0x331   :  { %v8550_v54 = vpop.permute.xlu0 %5779  ;;  %5821 = vrot.lane.b32.xlu1 %v2728_v60, %s10546_s9  ;;  %s10979_s9 = smov 18   ;;  %v3624_v18 = vrot.slane %v3610_v31, %v7366_v3  ;;  %v10981_v60 = vld [vmem:[#allocation14_spill] sm:$0xff]  ;;  %v10986_v31 = vld [vmem:[#allocation15_spill] sm:$0xff]  ;;  %v3665_v44 = vrot.slane %v3657_v57, %v7366_v3  ;;  %v3834_v57 = vcombine.high %v10983_v38, %v10982_v45 }
 0x332   :  { %10974 = vst [vmem:[#allocation140_spill] sm:$0xff] %v8550_v54  ;;  %v4089_v51 = vcombine.low %v10981_v60, %v10980_v34  ;;  %v4090_v61 = vcombine.high %v10981_v60, %v10980_v34  ;;  %v3817_v19 = vcombine.low %v10986_v31, %v10985_v58  ;;  %v2976_v34 = vrot.slane %v2962_v17, %v7366_v3  ;;  %v10991_v60 = vld [vmem:[#allocation48_spill] sm:$0xff] }
 0x333   :  { %6011 = vrot.lane.b32.xlu0 %v3673_v32, %s10976_s7  ;;  %v8580_v63 = vpop.permute.xlu1 %5597  ;;  %v3675_v32 = vcombine.low %v3624_v18, %v3656_v2  ;;  %v3676_v17 = vcombine.high %v3624_v18, %v3656_v2  ;;  %v3818_v16 = vcombine.high %v10986_v31, %v10985_v58  ;;  %v3626_v58 = vcombine.high %v8585_v23, %v8572_v59 }
 0x334   :  { %10978 = vst [vmem:[#allocation124_spill] sm:$0xff] %v8580_v63  ;;  %v10992_v63 = vld [vmem:[#allocation25_spill] sm:$0xff]  ;;  %v3658_v31 = vcombine.high %v8575_v25, %v8564_v62  ;;  %v11012_v25 = vld [vmem:[#allocation170_spill] sm:$0xff] }
 0x335   :  { %v8568_v41 = vpop.permute.xlu0 %5787  ;;  %5829 = vrot.lane.b32.xlu1 %v2993_v42, %s10548_s10  ;;  %v2994_v42 = vcombine.high %v2937_v13, %v2969_v46  ;;  %s10990_s10 = smov 20   ;;  %v4105_v12 = vcombine.low %v10992_v63, %v10991_v60  ;;  %v8630_v46 = vrot.slane %v2898_v14, %v7347_v56  ;;  %v2944_v13 = vrot.slane %v2930_v21, %v7366_v3 }
 0x336   :  { %10977 = vst [vmem:[#allocation154_spill] sm:$0xff] %v8568_v41  ;;  %v10994_v41 = vld [vmem:[#allocation60_spill] sm:$0xff]  ;;  %v8647_v14 = vrot.slane %v2866_v53, %v7347_v56  ;;  %v3640_v62 = vrot.slane %v3626_v58, %v7366_v3 }
 0x337   :  { %6019 = vrot.lane.b32.xlu0 %v3674_v35, %s10979_s9  ;;  %v3625_v35 = vcombine.low %v8585_v23, %v8572_v59  ;;  %v8614_v26 = vpop.permute.xlu1 %5605  ;;  %v2977_v21 = vcombine.low %v8630_v46, %v8612_v4  ;;  %v2995_v2 = vcombine.low %v2944_v13, %v2976_v34  ;;  %v8658_v45 = vrot.slane %v4105_v12, %v7347_v56 }
 0x338   :  { %10989 = vst [vmem:[#allocation168_spill] sm:$0xff] %v8614_v26  ;;  %v8679_v23 = vrot.slane %v3818_v16, %v7347_v56  ;;  %v2996_v26 = vcombine.high %v2944_v13, %v2976_v34  ;;  %v3866_v16 = vcombine.high %v10988_v33, %v10987_v55  ;;  %v11008_v55 = vld [vmem:[#allocation87_spill] sm:$0xff]  ;;  %v11009_v33 = vld [vmem:[#allocation88_spill] sm:$0xff] }
 0x339   :  { %v8599_v43 = vpop.permute.xlu0 %5795  ;;  %5837 = vrot.lane.b32.xlu1 %v2994_v42, %s10550_s11  ;;  %s10996_s11 = smov 22   ;;  %v3633_v18 = vrot.slane %v3625_v35, %v7366_v3  ;;  %v2945_v35 = vcombine.low %v8647_v14, %v8627_v8 }
 0x33a   :  { %10984 = vst [vmem:[#allocation192_spill] sm:$0xff] %v8599_v43  ;;  %v10993_v43 = vld [vmem:[#allocation82_spill] sm:$0xff] }
 0x33b   :  { %6027 = vrot.lane.b32.xlu0 %v3675_v32, %s10990_s10  ;;  %v3849_v54 = vcombine.low %v10994_v41, %v10993_v43  ;;  %v8639_v32 = vrot.slane %v3817_v19, %v7347_v56  ;;  %v8651_v42 = vpop.permute.xlu1 %5613  ;;  %v8666_v19 = vrot.slane %v4089_v51, %v7347_v56  ;;  %v3677_v12 = vcombine.low %v3633_v18, %v3665_v44 }
 0x33c   :  { %10995 = vst [vmem:[#allocation139_spill] sm:$0xff] %v8651_v42  ;;  %v3678_v13 = vcombine.high %v3633_v18, %v3665_v44 }
 0x33d   :  { %v8634_v5 = vpop.permute.xlu0 %5803  ;;  %v8661_v38 = vrot.slane %v3849_v54, %v7347_v56  ;;  %v3881_v11 = vcombine.low %v8639_v32, %v8621_v28  ;;  %5845 = vrot.lane.b32.xlu1 %v2995_v2, %s10552_s12  ;;  %v8676_v54 = vrot.slane %v4090_v61, %v7347_v56  ;;  %v8688_v2 = vrot.slane %v3834_v57, %v7347_v56  ;;  %s11001_s12 = smov 24  }
 0x33e   :  { %v2985_v61 = vrot.slane %v2977_v21, %v7366_v3  ;;  %v2953_v57 = vrot.slane %v2945_v35, %v7366_v3  ;;  %v2978_v35 = vcombine.high %v8630_v46, %v8612_v4  ;;  %v2946_v4 = vcombine.high %v8647_v14, %v8627_v8  ;;  %v11011_v46 = vld [vmem:[#allocation195_spill] sm:$0xff] }
 0x33f   :  { %6035 = vrot.lane.b32.xlu0 %v3676_v17, %s10996_s11  ;;  %10997 = vst [vmem:[#allocation109_spill] sm:$0xff] %v8676_v54  ;;  %v3913_v53 = vcombine.low %v8661_v38, %v8644_v9  ;;  %v8690_v42 = vpop.permute.xlu1 %5621  ;;  %v3672_v17 = vrot.slane %v3658_v31, %v7366_v3  ;;  %v8705_v21 = vrot.slane %v3881_v11, %v7366_v3 }
 0x340   :  { %11000 = vst [vmem:[#allocation93_spill] sm:$0xff] %v8690_v42  ;;  %v2997_v18 = vcombine.low %v2953_v57, %v2985_v61 }
 0x341   :  { %v8673_v59 = vpop.permute.xlu0 %5811  ;;  %5853 = vrot.lane.b32.xlu1 %v2996_v26, %s10554_s13  ;;  %v8712_v58 = vrot.slane %v3913_v53, %v7366_v3  ;;  %v11003_v26 = vld [vmem:[#allocation180_spill] sm:$0xff]  ;;  %s11005_s13 = smov 26   ;;  %v11010_v53 = vcombine.low %v11008_v55, %v11009_v33  ;;  %v3679_v42 = vcombine.low %v3640_v62, %v3672_v17  ;;  %v11014_v55 = vld [vmem:[#allocation111_spill] sm:$0xff] }
 0x342   :  { %v3185_v31 = vcombine.low %v11003_v26, %v8187_v7 }
 0x343   :  { %6043 = vrot.lane.b32.xlu0 %v3677_v12, %s11001_s12  ;;  %v3850_v12 = vcombine.high %v10994_v41, %v10993_v43  ;;  %v8718_v44 = vpop.permute.xlu1 %5629  ;;  %v11006_v41 = vld [vmem:[#allocation156_spill] sm:$0xff]  ;;  %v11007_v43 = vld [vmem:[#allocation126_spill] sm:$0xff]  ;;  %v6458_v51 = vsel %vm6457_vm0, %v11010_v53, %v7976_v22 }
 0x344   :  { %11004 = vst [vmem:[#allocation99_spill] sm:$0xff] %v8718_v44  ;;  %v3153_v11 = vcombine.low %v11007_v43, %v11006_v41  ;;  %v3169_v44 = vcombine.low %v11012_v25, %v11011_v46  ;;  %v8742_v8 = vrot.slane %v3185_v31, %v7347_v56 }
 0x345   :  { %v8702_v34 = vpop.permute.xlu0 %5819  ;;  %5861 = vrot.lane.b32.xlu1 %v2997_v18, %s10557_s14  ;;  %s11015_s14 = smov 28   ;;  %v2992_v18 = vrot.slane %v2978_v35, %v7366_v3 }
 0x346   :  { %11002 = vst [vmem:[#allocation69_spill] sm:$0xff] %v8702_v34  ;;  %v11013_v34 = vld [vmem:[#allocation141_spill] sm:$0xff]  ;;  %v8751_v53 = vrot.slane %v3153_v11, %v7347_v56  ;;  %v8756_v31 = vrot.slane %v3169_v44, %v7347_v56  ;;  %v3914_v11 = vcombine.high %v8661_v38, %v8644_v9  ;;  %v3897_v9 = vcombine.low %v8679_v23, %v8688_v2 }
 0x347   :  { %6051 = vrot.lane.b32.xlu0 %v3678_v13, %s11005_s13  ;;  %v6461_v13 = vsel %vm6460_vm1, %v6458_v51, %v7981_v15  ;;  %v3137_v33 = vcombine.low %v11014_v55, %v11013_v34  ;;  %v8746_v15 = vpop.permute.xlu1 %5637  ;;  %v2998_v51 = vcombine.high %v2953_v57, %v2985_v61  ;;  %v8765_v57 = vrot.slane %v3866_v16, %v7347_v56 }
 0x348   :  { %v6464_v22 = vsel %vm6463_vm2, %v6461_v13, %v7991_v48  ;;  %v3680_v13 = vcombine.high %v3640_v62, %v3672_v17  ;;  %v8780_v16 = vrot.slane %v3850_v12, %v7347_v56  ;;  %v3945_v12 = vcombine.low %v8705_v21, %v8712_v58 }
 0x349   :  { %v8735_v54 = vpop.permute.xlu0 %5827  ;;  %v6467_v14 = vsel %vm6466_vm3, %v6464_v22, %v8011_v39  ;;  %5869 = vrot.lane.b32.xlu1 %v2998_v51, %s10559_s16  ;;  %s11016_s16 = smov 30  }
 0x34a   :  { %v6470_v48 = vsel %vm6469_vm4, %v6467_v14, %v8027_v30  ;;  %v8768_v30 = vrot.slane %v3137_v33, %v7347_v56 }
 0x34b   :  { %6059 = vrot.lane.b32.xlu0 %v3679_v42, %s11015_s14  ;;  %v6473_v39 = vsel %vm6472_vm5, %v6470_v48, %v8032_v24  ;;  %v2960_v42 = vrot.slane %v2946_v4, %v7366_v3  ;;  %v3233_v24 = vcombine.low %v8756_v31, %v8742_v8  ;;  %v8776_v35 = vpop.permute.xlu1 %5645 }
 0x34c   :  { %v6476_v62 = vsel %vm6475_vm6, %v6473_v39, %v8043_v20  ;;  %v3201_v4 = vcombine.low %v8768_v30, %v8751_v53  ;;  %v3928_v39 = vrot.slane %v3914_v11, %v7366_v3 }
 0x34d   :  { %v8762_v61 = vpop.permute.xlu0 %5835  ;;  %v6479_v17 = vsel %vm10634_vm7, %v6476_v62, %v8060_v49  ;;  %v2999_v44 = vcombine.low %v2960_v42, %v2992_v18  ;;  %v3000_v14 = vcombine.high %v2960_v42, %v2992_v18  ;;  %v3241_v51 = vrot.slane %v3233_v24, %v7366_v3  ;;  %v11019_v62 = vld [vmem:[#allocation9_spill] sm:$0xff] }
 0x34e   :  { %v6482_v20 = vsel %vm10635_vm8, %v6479_v17, %v8076_v52  ;;  %v3929_v52 = vcombine.low %v8780_v16, %v8765_v57  ;;  %v3209_v18 = vrot.slane %v3201_v4, %v7366_v3  ;;  %v11020_v17 = vld [vmem:[#allocation151_spill] sm:$0xff] }
 0x34f   :  { %6067 = vrot.lane.b32.xlu0 %v3680_v13, %s11016_s16  ;;  %v6485_v49 = vsel %vm10571_vm9, %v6482_v20, %v8081_v50  ;;  %5877 = vrot.lane.b32.xlu1 %v2999_v44, %s10561_s15  ;;  %v8803_v22 = vpop.permute.xlu1 %5653  ;;  %s11017_s15 = smov 32   ;;  %v11022_v20 = vld [vmem:[#allocation121_spill] sm:$0xff]  ;;  %vm10580_vm9 = vcmask 375808  }
 0x350   :  { %v6488_v38 = vsel %vm10565_vm10, %v6485_v49, %v8091_v36  ;;  %v11018_v36 = vcombine.high %v8639_v32, %v8621_v28  ;;  %vm10574_vm10 = vcmask 310272   ;;  %v8825_v28 = vrot.slane %v3929_v52, %v7366_v3 }
 0x351   :  { %v8791_v33 = vpop.permute.xlu0 %5843  ;;  %v6491_v50 = vsel %vm10563_vm11, %v6488_v38, %v8109_v37  ;;  %vm10570_vm11 = vcmask 277504   ;;  %v3234_v32 = vcombine.high %v8756_v31, %v8742_v8 }
 0x352   :  { %v6494_v48 = vsel %vm10564_vm12, %v6491_v50, %v8124_v29  ;;  %v3896_v13 = vrot.slane %v11018_v36, %v7366_v3  ;;  %v3946_v29 = vcombine.high %v8705_v21, %v8712_v58  ;;  %vm10586_vm12 = vcmask 293888   ;;  %v11026_v50 = vld [vmem:[#allocation43_spill] sm:$0xff] }
 0x353   :  { %6075 = vrot.lane.b32.xlu0 %v3945_v12, %s11017_s15  ;;  %v6497_v37 = vsel %vm10569_vm13, %v6494_v48, %v8129_v0  ;;  %5885 = vrot.lane.b32.xlu1 %v3000_v14, %s10566_s18  ;;  %v3186_v0 = vcombine.high %v11003_v26, %v8187_v7  ;;  %v8833_v11 = vpop.permute.xlu1 %5661  ;;  %v3265_v21 = vcombine.low %v3209_v18, %v3241_v51  ;;  %s11021_s18 = smov 34   ;;  %vm10576_vm13 = vcmask 343040  }
 0x354   :  { %v6500_v24 = vsel %vm10568_vm14, %v6497_v37, %v11019_v62  ;;  %v3154_v58 = vcombine.high %v11007_v43, %v11006_v41  ;;  %vm10575_vm14 = vcmask 326656   ;;  %v3947_v49 = vcombine.low %v3896_v13, %v3928_v39  ;;  %v11027_v37 = vld [vmem:[#allocation76_spill] sm:$0xff] }
 0x355   :  { %v8818_v42 = vpop.permute.xlu0 %5851  ;;  %v6503_v44 = vsel %vm6502_vm15, %v6500_v24, %v11020_v17  ;;  %v3202_v7 = vcombine.high %v8768_v30, %v8751_v53  ;;  %v3170_v26 = vcombine.high %v11012_v25, %v11011_v46  ;;  %v3138_v41 = vcombine.high %v11014_v55, %v11013_v34  ;;  %v11023_v25 = vld [vmem:[#allocation106_spill] sm:$0xff]  ;;  %v11025_v55 = vld [vmem:[#allocation89_spill] sm:$0xff] }
 0x356   :  { %v6506_v4 = vsel %vm10570_vm11, %v6503_v44, %v11022_v20  ;;  %vm10577_vm11 = vcmask 359424   ;;  %v8854_v53 = vrot.slane %v3186_v0, %v7347_v56  ;;  %v3266_v30 = vcombine.high %v3209_v18, %v3241_v51  ;;  %v11031_v17 = vld [vmem:[#allocation70_spill] sm:$0xff] }
 0x357   :  { %6083 = vrot.lane.b32.xlu0 %v3946_v29, %s11021_s18  ;;  %v6509_v8 = vsel %vm10586_vm12, %v6506_v4, %v8184_v10  ;;  %5893 = vrot.lane.b32.xlu1 %v3265_v21, %s10572_s22  ;;  %v8858_v10 = vpop.permute.xlu1 %5669  ;;  %s11024_s22 = smov 36   ;;  %v3248_v12 = vrot.slane %v3234_v32, %v7366_v3  ;;  %v8863_v34 = vrot.slane %v3154_v58, %v7347_v56  ;;  %v11028_v29 = vld [vmem:[#allocation54_spill] sm:$0xff]  ;;  %v11030_v32 = vld [vmem:[#allocation95_spill] sm:$0xff]  ;;  %v11032_v58 = vld [vmem:[#allocation8_spill] sm:$0xff]  ;;  %vm10593_vm12 = vcmask 523264  }
 0x358   :  { %v6512_v43 = vsel %vm10574_vm10, %v6509_v8, %v8196_v47  ;;  %vm10581_vm10 = vcmask 392192   ;;  %v3948_v52 = vcombine.high %v3896_v13, %v3928_v39  ;;  %v8868_v38 = vrot.slane %v3170_v26, %v7347_v56  ;;  %v11034_v26 = vld [vmem:[#allocation59_spill] sm:$0xff] }
 0x359   :  { %v8847_v31 = vpop.permute.xlu0 %5859  ;;  %v6515_v46 = vsel %vm10575_vm14, %v6512_v43, %v11023_v25  ;;  %vm10582_vm14 = vcmask 408576   ;;  %v3216_v51 = vrot.slane %v3202_v7, %v7366_v3  ;;  %v8877_v36 = vrot.slane %v3138_v41, %v7347_v56 }
 0x35a   :  { %v6518_v47 = vsel %vm10576_vm13, %v6515_v46, %v11025_v55  ;;  %vm10583_vm13 = vcmask 424960   ;;  %v3905_v13 = vrot.slane %v3897_v9, %v7366_v3  ;;  %v3249_v39 = vcombine.low %v8868_v38, %v8854_v53  ;;  %v11037_v55 = vld [vmem:[#allocation67_spill] sm:$0xff] }
 0x35b   :  { %6091 = vrot.lane.b32.xlu0 %v3947_v49, %s11024_s22  ;;  %v6521_v14 = vsel %vm10577_vm11, %v6518_v47, %v11026_v50  ;;  %5901 = vrot.lane.b32.xlu1 %v3266_v30, %s10578_s19  ;;  %vm10598_vm11 = vcmask 441344   ;;  %v8889_v24 = vpop.permute.xlu1 %5677  ;;  %v3267_v0 = vcombine.low %v3216_v51, %v3248_v12  ;;  %s11029_s19 = smov 38   ;;  %v4137_v44 = vcombine.low %v11031_v17, %v11030_v32 }
 0x35c   :  { %v6524_v18 = vsel %vm10580_vm9, %v6521_v14, %v11027_v37  ;;  %v3930_v21 = vcombine.high %v8780_v16, %v8765_v57  ;;  %vm10587_vm9 = vcmask 457728   ;;  %v3217_v20 = vcombine.low %v8877_v36, %v8863_v34  ;;  %v11033_v16 = vld [vmem:[#allocation81_spill] sm:$0xff]  ;;  %v11038_v14 = vld [vmem:[#allocation22_spill] sm:$0xff] }
 0x35d   :  { %v8874_v48 = vpop.permute.xlu0 %5867  ;;  %v6527_v62 = vsel %vm10581_vm10, %v6524_v18, %v11028_v29  ;;  %vm10588_vm10 = vcmask 474112   ;;  %v3949_v7 = vcombine.low %v3905_v13, %v8825_v28  ;;  %v3898_v57 = vcombine.high %v8679_v23, %v8688_v2  ;;  %v11036_v2 = vld [vmem:[#allocation108_spill] sm:$0xff] }
 0x35e   :  { %v6530_v9 = vsel %vm10582_vm14, %v6527_v62, %v11032_v58  ;;  %v4121_v8 = vcombine.low %v11034_v26, %v11033_v16  ;;  %vm10589_vm14 = vcmask 490496   ;;  %v3268_v25 = vcombine.high %v3216_v51, %v3248_v12 }
 0x35f   :  { %6099 = vrot.lane.b32.xlu0 %v3948_v52, %s11029_s19  ;;  %v6533_v4 = vsel %vm10583_vm13, %v6530_v9, %v8314_v6  ;;  %5909 = vrot.lane.b32.xlu1 %v3267_v0, %s10584_s23  ;;  %vm10592_vm13 = vcmask 506880   ;;  %v8914_v43 = vpop.permute.xlu1 %5685  ;;  %s11035_s23 = smov 40   ;;  %v3257_v46 = vrot.slane %v3249_v39, %v7366_v3  ;;  %v8919_v23 = vrot.slane %v4137_v44, %v7347_v56  ;;  %v11039_v39 = vld [vmem:[#allocation56_spill] sm:$0xff]  ;;  %v11041_v44 = vld [vmem:[#allocation11_spill] sm:$0xff] }
 0x360   :  { %v6536_v41 = vsel %vm10598_vm11, %v6533_v4, %v8326_v1  ;;  %v3944_v1 = vrot.slane %v3930_v21, %v7366_v3  ;;  %v3225_v12 = vrot.slane %v3217_v20, %v7366_v3  ;;  %v3950_v52 = vcombine.high %v3905_v13, %v8825_v28  ;;  %v11043_v4 = vld [vmem:[#allocation137_spill] sm:$0xff] }
 0x361   :  { %v8903_v49 = vpop.permute.xlu0 %5875  ;;  %v6539_v6 = vsel %vm10587_vm9, %v6536_v41, %v8349_v27  ;;  %vm10594_vm9 = vcmask 539648   ;;  %v8932_v50 = vrot.slane %v4121_v8, %v7347_v56  ;;  %v3912_v37 = vrot.slane %v3898_v57, %v7366_v3 }
 0x362   :  { %v6542_v30 = vsel %vm10588_vm10, %v6539_v6, %v11036_v2  ;;  %vm10595_vm10 = vcmask 556032   ;;  %v3250_v18 = vcombine.high %v8868_v38, %v8854_v53  ;;  %v3269_v0 = vcombine.low %v3225_v12, %v3257_v46  ;;  %v11042_v38 = vld [vmem:[#allocation122_spill] sm:$0xff]  ;;  %v11047_v2 = vld [vmem:[#allocation77_spill] sm:$0xff] }
 0x363   :  { %6107 = vrot.lane.b32.xlu0 %v3949_v7, %s11035_s23  ;;  %v6545_v27 = vsel %vm10589_vm14, %v6542_v30, %v11037_v55  ;;  %5917 = vrot.lane.b32.xlu1 %v3268_v25, %s10590_s24  ;;  %vm10613_vm14 = vcmask 572416   ;;  %v8941_v62 = vpop.permute.xlu1 %5693  ;;  %s11040_s24 = smov 42   ;;  %v4138_v28 = vcombine.high %v11031_v17, %v11030_v32  ;;  %v4185_v13 = vcombine.low %v8932_v50, %v8919_v23  ;;  %v11046_v25 = vld [vmem:[#allocation44_spill] sm:$0xff] }
 0x364   :  { %v6548_v51 = vsel %vm10592_vm13, %v6545_v27, %v11038_v14  ;;  %vm10599_vm13 = vcmask 588800   ;;  %v3218_v53 = vcombine.high %v8877_v36, %v8863_v34  ;;  %v3951_v20 = vcombine.low %v3912_v37, %v3944_v1  ;;  %v11044_v34 = vld [vmem:[#allocation90_spill] sm:$0xff] }
 0x365   :  { %v8928_v47 = vpop.permute.xlu0 %5883  ;;  %v6551_v29 = vsel %vm10593_vm12, %v6548_v51, %v11039_v39  ;;  %vm10600_vm12 = vcmask 605184   ;;  %v4154_v32 = vcombine.high %v8666_v19, %v8658_v45  ;;  %v4122_v17 = vcombine.high %v11034_v26, %v11033_v16 }
 0x366   :  { %v6554_v21 = vsel %vm10594_vm9, %v6551_v29, %v11041_v44  ;;  %vm10601_vm9 = vcmask 621568   ;;  %v3270_v8 = vcombine.high %v3225_v12, %v3257_v46  ;;  %v3264_v41 = vrot.slane %v3250_v18, %v7366_v3  ;;  %v11050_v29 = vld [vmem:[#allocation155_spill] sm:$0xff] }
 0x367   :  { %6115 = vrot.lane.b32.xlu0 %v3950_v52, %s11040_s24  ;;  %v6557_v58 = vsel %vm10595_vm10, %v6554_v21, %v11042_v38  ;;  %5925 = vrot.lane.b32.xlu1 %v3269_v0, %s10596_s25  ;;  %vm10604_vm10 = vcmask 637952   ;;  %v8965_v57 = vpop.permute.xlu1 %5701  ;;  %s11045_s25 = smov 44   ;;  %v8970_v6 = vrot.slane %v4138_v28, %v7347_v56  ;;  %vm10605_vm11 = vcmask 654336   ;;  %v11048_v52 = vld [vmem:[#allocation33_spill] sm:$0xff] }
 0x368   :  { %v6560_v7 = vsel %vm10613_vm14, %v6557_v58, %v11043_v4  ;;  %v4193_v26 = vrot.slane %v4185_v13, %v7366_v3  ;;  %v3232_v46 = vrot.slane %v3218_v53, %v7366_v3  ;;  %v3952_v27 = vcombine.high %v3912_v37, %v3944_v1  ;;  %v11053_v13 = vld [vmem:[#allocation140_spill] sm:$0xff]  ;;  %v11055_v53 = vld [vmem:[#allocation183_spill] sm:$0xff] }
 0x369   :  { %v8955_v9 = vpop.permute.xlu0 %5891  ;;  %v6563_v36 = vsel %vm10599_vm13, %v6560_v7, %v11044_v34  ;;  %vm10606_vm13 = vcmask 670720   ;;  %v4186_v12 = vcombine.high %v8932_v50, %v8919_v23  ;;  %v11049_v51 = vcombine.low %v8666_v19, %v8658_v45  ;;  %v11059_v7 = vld [vmem:[#allocation192_spill] sm:$0xff] }
 0x36a   :  { %v6566_v16 = vsel %vm10600_vm12, %v6563_v36, %v11046_v25  ;;  %vm10607_vm12 = vcmask 687104   ;;  %v8990_v39 = vrot.slane %v4122_v17, %v7347_v56  ;;  %v3271_v37 = vcombine.low %v3232_v46, %v3264_v41  ;;  %v11058_v17 = vld [vmem:[#allocation208_spill] sm:$0xff]  ;;  %v11061_v25 = vld [vmem:[#allocation159_spill] sm:$0xff] }
 0x36b   :  { %6123 = vrot.lane.b32.xlu0 %v3951_v20, %s11045_s25  ;;  %v6569_v30 = vsel %vm10601_vm9, %v6566_v16, %v11047_v2  ;;  %5933 = vrot.lane.b32.xlu1 %v3270_v8, %s10602_s26  ;;  %v4161_v18 = vrot.slane %v11049_v51, %v7366_v3  ;;  %vm10610_vm9 = vcmask 703488   ;;  %v8994_v1 = vpop.permute.xlu1 %5709  ;;  %s11051_s26 = smov 46   ;;  %v11052_v23 = vcombine.high %v10992_v63, %v10991_v60  ;;  %v11054_v60 = vld [vmem:[#allocation202_spill] sm:$0xff]  ;;  %v11062_v16 = vld [vmem:[#allocation129_spill] sm:$0xff]  ;;  %v11065_v51 = vld [vmem:[#allocation191_spill] sm:$0xff] }
 0x36c   :  { %v6572_v14 = vsel %vm10604_vm10, %v6569_v30, %v11048_v52  ;;  %vm10611_vm10 = vcmask 719872   ;;  %v9006_v19 = vrot.slane %v4154_v32, %v7366_v3  ;;  %v4201_v28 = vcombine.low %v8990_v39, %v8970_v6  ;;  %v11057_v32 = vld [vmem:[#allocation207_spill] sm:$0xff]  ;;  %v11064_v52 = vld [vmem:[#allocation205_spill] sm:$0xff] }
 0x36d   :  { %v8979_v55 = vpop.permute.xlu0 %5899  ;;  %v6575_v0 = vsel %vm10605_vm11, %v6572_v14, %v11050_v29  ;;  %v9001_v50 = vrot.slane %v11052_v23, %v7347_v56  ;;  %vm10612_vm11 = vcmask 736256   ;;  %v4217_v63 = vcombine.low %v4161_v18, %v4193_v26  ;;  %v11066_v29 = vld [vmem:[#allocation173_spill] sm:$0xff]  ;;  %v11068_v23 = vld [vmem:[#allocation114_spill] sm:$0xff] }
 0x36e   :  { %v6578_v45 = vsel %vm10606_vm13, %v6575_v0, %v8538_v40  ;;  %v3458_v38 = vcombine.high %v11055_v53, %v11054_v60  ;;  %v11056_v40 = vld [vmem:[#allocation154_spill] sm:$0xff]  ;;  %vm6592_vm13 = vcmask 752640   ;;  %v9020_v20 = vrot.slane %v4186_v12, %v7366_v3  ;;  %v11063_v12 = vld [vmem:[#allocation203_spill] sm:$0xff] }
 0x36f   :  { %6131 = vrot.lane.b32.xlu0 %v3952_v27, %s11051_s26  ;;  %v6581_v44 = vsel %vm10607_vm12, %v6578_v45, %v11053_v13  ;;  %5941 = vrot.lane.b32.xlu1 %v3271_v37, %s10608_s27  ;;  %v3506_v4 = vcombine.high %v11058_v17, %v11057_v32  ;;  %vm10616_vm12 = vcmask 769024   ;;  %v9026_v36 = vpop.permute.xlu1 %5717  ;;  %v3272_v8 = vcombine.high %v3232_v46, %v3264_v41  ;;  %s11060_s27 = smov 48   ;;  %v11067_v46 = vld [vmem:[#allocation144_spill] sm:$0xff] }
 0x370   :  { %v6584_v58 = vsel %vm10610_vm9, %v6581_v44, %v11056_v40  ;;  %v3426_v2 = vcombine.high %v11062_v16, %v11061_v25  ;;  %vm10617_vm9 = vcmask 785408   ;;  %v4218_v27 = vcombine.high %v4161_v18, %v4193_v26  ;;  %v11069_v26 = vld [vmem:[#allocation69_spill] sm:$0xff]  ;;  %v11071_v44 = vld [vmem:[#allocation211_spill] sm:$0xff] }
 0x371   :  { %v9013_v21 = vpop.permute.xlu0 %5907  ;;  %v6587_v34 = vsel %vm10611_vm10, %v6584_v58, %v11059_v7  ;;  %v3474_v14 = vcombine.high %v11064_v52, %v11063_v12  ;;  %v3442_v0 = vcombine.high %v11066_v29, %v11065_v51  ;;  %vm10618_vm10 = vcmask 801792   ;;  %v11074_v7 = vld [vmem:[#allocation109_spill] sm:$0xff] }
 0x372   :  { %v6590_v30 = vsel %vm10612_vm11, %v6587_v34, %v8634_v5  ;;  %v3410_v45 = vcombine.high %v11068_v23, %v11067_v46  ;;  %v9045_v5 = vrot.slane %v3458_v38, %v7347_v56  ;;  %vm10619_vm11 = vcmask 818176   ;;  %v11082_v23 = vld [vmem:[#allocation73_spill] sm:$0xff] }
 0x373   :  { %6139 = vrot.lane.b32.xlu0 %v4217_v63, %s11060_s27  ;;  %v6593_v37 = vsel %vm6592_vm13, %v6590_v30, %v8673_v59  ;;  %5949 = vrot.lane.b32.xlu1 %v3272_v8, %s10614_s28  ;;  %vm10620_vm14 = vcmask 834560   ;;  %v9051_v59 = vpop.permute.xlu1 %5725  ;;  %v11072_v63 = vld [vmem:[#allocation210_spill] sm:$0xff]  ;;  %s11073_s28 = smov 50   ;;  %v3520_v53 = vrot.slane %v3506_v4, %v7366_v3  ;;  %v9058_v38 = vrot.slane %v3426_v2, %v7347_v56  ;;  %v11077_v30 = vld [vmem:[#allocation51_spill] sm:$0xff] }
 0x374   :  { %v6596_v18 = vsel %vm10616_vm12, %v6593_v37, %v11069_v26  ;;  %11070 = vst [vmem:[#allocation98_spill] sm:$0xff] %v9051_v59  ;;  %v3538_v60 = vcombine.high %v11072_v63, %v11071_v44  ;;  %vm10621_vm12 = vcmask 850944   ;;  %v9065_v58 = vrot.slane %v3442_v0, %v7347_v56 }
 0x375   :  { %v9040_v41 = vpop.permute.xlu0 %5915  ;;  %v6599_v13 = vsel %vm10617_vm9, %v6596_v18, %v8735_v54  ;;  %v4219_v54 = vcombine.low %v9006_v19, %v9020_v20  ;;  %vm10622_vm9 = vcmask 867328   ;;  %v3488_v17 = vrot.slane %v3474_v14, %v7366_v3 }
 0x376   :  { %v6602_v40 = vsel %vm10618_vm10, %v6599_v13, %v8762_v61  ;;  %v4169_v34 = vcombine.low %v11074_v7, %v9001_v50  ;;  %v9074_v61 = vrot.slane %v3410_v45, %v7347_v56  ;;  %vm10623_vm10 = vcmask 883712  }
 0x377   :  { %6147 = vrot.lane.b32.xlu0 %v4218_v27, %s11073_s28  ;;  %v6605_v32 = vsel %vm10619_vm11, %v6602_v40, %v8791_v33  ;;  %5957 = vrot.lane.b32.xlu1 %v3538_v60, %s6986_s0  ;;  %v3521_v25 = vcombine.low %v9065_v58, %v9045_v5  ;;  %vm10624_vm11 = vcmask 900096   ;;  %v9082_v16 = vpop.permute.xlu1 %5733  ;;  %v3539_v2 = vcombine.low %v3488_v17, %v3520_v53  ;;  %s11076_s0 = smov 52   ;;  %v11078_v27 = vld [vmem:[#allocation28_spill] sm:$0xff]  ;;  %v11086_v40 = vld [vmem:[#allocation182_spill] sm:$0xff] }
 0x378   :  { %v6608_v8 = vsel %vm10620_vm14, %v6605_v32, %v8818_v42  ;;  %11075 = vst [vmem:[#allocation47_spill] sm:$0xff] %v9082_v16  ;;  %v4377_v12 = vcombine.low %v11078_v27, %v11077_v30  ;;  %vm10625_vm14 = vcmask 916480   ;;  %v4209_v42 = vrot.slane %v4201_v28, %v7366_v3  ;;  %v11083_v60 = vld [vmem:[#allocation84_spill] sm:$0xff] }
 0x379   :  { %v5924_v4 = vpop.permute.xlu0 %5923  ;;  %v6611_v33 = vsel %vm10621_vm12, %v6608_v8, %v8847_v31  ;;  %v3489_v14 = vcombine.low %v9074_v61, %v9058_v38  ;;  %vm10626_vm12 = vcmask 932864   ;;  %v4220_v29 = vcombine.high %v9006_v19, %v9020_v20  ;;  %v11081_v20 = vld [vmem:[#allocation101_spill] sm:$0xff] }
 0x37a   :  { %v6614_v52 = vsel %vm10622_vm9, %v6611_v33, %v8874_v48  ;;  %v4170_v0 = vcombine.high %v11074_v7, %v9001_v50  ;;  %vm10627_vm9 = vcmask 949248   ;;  %v4177_v28 = vrot.slane %v4169_v34, %v7366_v3  ;;  %v11089_v33 = vld [vmem:[#allocation158_spill] sm:$0xff] }
 0x37b   :  { %6155 = vrot.lane.b32.xlu0 %v4219_v54, %s11076_s0  ;;  %v6617_v31 = vsel %vm10623_vm10, %v6614_v52, %v8903_v49  ;;  %5965 = vrot.lane.b32.xlu1 %v3539_v2, %s6987_s20  ;;  %vm6631_vm10 = vcmask 965632   ;;  %v9104_v49 = vpop.permute.xlu1 %5741  ;;  %v3540_v46 = vcombine.high %v3488_v17, %v3520_v53  ;;  %s11080_s20 = smov 54   ;;  %v3529_v19 = vrot.slane %v3521_v25, %v7366_v3  ;;  %v11084_v53 = vld [vmem:[#allocation62_spill] sm:$0xff]  ;;  %v11090_v2 = vld [vmem:[#allocation128_spill] sm:$0xff] }
 0x37c   :  { %v6620_v48 = vsel %vm10624_vm11, %v6617_v31, %v8928_v47  ;;  %11079 = vst [vmem:[#allocation24_spill] sm:$0xff] %v9104_v49  ;;  %v4202_v50 = vcombine.high %v8990_v39, %v8970_v6  ;;  %v4409_v47 = vcombine.low %v11082_v23, %v11081_v20  ;;  %vm6634_vm11 = vcmask 982016   ;;  %v11085_v39 = vld [vmem:[#allocation136_spill] sm:$0xff] }
 0x37d   :  { %v5932_v51 = vpop.permute.xlu0 %5931  ;;  %v6623_v37 = vsel %vm10625_vm14, %v6620_v48, %v8955_v9  ;;  %vm6637_vm14 = vcmask 998400   ;;  %v3497_v26 = vrot.slane %v3489_v14, %v7366_v3  ;;  %v4221_v13 = vcombine.low %v4177_v28, %v4209_v42 }
 0x37e   :  { %v6626_v45 = vsel %vm10626_vm12, %v6623_v37, %v8979_v55  ;;  %v4393_v6 = vcombine.low %v11084_v53, %v11083_v60  ;;  %v3729_v54 = vcombine.low %v11086_v40, %v11085_v39  ;;  %vm10633_vm12 = vcmask 1014784   ;;  %v11094_v37 = vld [vmem:[#allocation143_spill] sm:$0xff] }
 0x37f   :  { %6163 = vrot.lane.b32.xlu0 %v4220_v29, %s11080_s20  ;;  %v6629_v9 = vsel %vm10627_vm9, %v6626_v45, %v9013_v21  ;;  %5973 = vrot.lane.b32.xlu1 %v3540_v46, %s6988_s21  ;;  %v3522_v21 = vcombine.high %v9065_v58, %v9045_v5  ;;  %v9127_v17 = vpop.permute.xlu1 %5749  ;;  %v3541_v7 = vcombine.low %v3497_v26, %v3529_v19  ;;  %s11088_s21 = smov 56   ;;  %vm10632_vm9 = vcmask 1031168   ;;  %v11091_v58 = vld [vmem:[#allocation197_spill] sm:$0xff] }
 0x380   :  { %v6632_v55 = vsel %vm6631_vm10, %v6629_v9, %v9040_v41  ;;  %11087 = vst [vmem:[#allocation80_spill] sm:$0xff] %v9127_v17  ;;  %v9131_v34 = vrot.slane %v4409_v47, %v7347_v56  ;;  %v4222_v25 = vcombine.high %v4177_v28, %v4209_v42  ;;  %v4216_v41 = vrot.slane %v4202_v50, %v7366_v3  ;;  %v11095_v46 = vld [vmem:[#allocation113_spill] sm:$0xff]  ;;  %v11099_v9 = vld [vmem:[#allocation40_spill] sm:$0xff] }
 0x381   :  { %v5940_v18 = vpop.permute.xlu0 %5939  ;;  %v6635_v32 = vsel %vm6634_vm11, %v6632_v55, %v5924_v4  ;;  %v3697_v52 = vcombine.low %v11090_v2, %v11089_v33  ;;  %v3490_v5 = vcombine.high %v9074_v61, %v9058_v38  ;;  %v11092_v4 = vld [vmem:[#allocation172_spill] sm:$0xff]  ;;  %v4385_v48 = vrot.slane %v4377_v12, %v7347_v56  ;;  %v11098_v45 = vld [vmem:[#allocation17_spill] sm:$0xff] }
 0x382   :  { %v6638_v8 = vsel %vm6637_vm14, %v6635_v32, %v5932_v51  ;;  %v3713_v14 = vcombine.low %v11092_v4, %v11091_v58  ;;  %v4401_v42 = vrot.slane %v4393_v6, %v7347_v56  ;;  %v4184_v28 = vrot.slane %v4170_v0, %v7366_v3 }
 0x383   :  { %6171 = vrot.lane.b32.xlu0 %v4221_v13, %s11088_s21  ;;  %5981 = vrot.lane.b32.xlu1 %v3541_v7, %s6983_s17  ;;  %v6641_v31 = vsel %vm10633_vm12, %v6638_v8, %v5940_v18  ;;  %v3681_v38 = vcombine.low %v11095_v46, %v11094_v37  ;;  %v3737_v61 = vrot.slane %v3729_v54, %v7347_v56  ;;  %v9152_v50 = vpop.permute.xlu1 %5757  ;;  %s11097_s17 = smov 58   ;;  %vm11156_vm12 = vcmask 179200  }
 0x384   :  { %11096 = vst [vmem:[#allocation94_spill] sm:$0xff] %v9152_v50  ;;  %v3542_v47 = vcombine.high %v3497_v26, %v3529_v19  ;;  %v3536_v12 = vrot.slane %v3522_v21, %v7366_v3  ;;  %v11100_v18 = vcombine.low %v11098_v45, %v11099_v9  ;;  %v4457_v13 = vcombine.low %v4401_v42, %v9131_v34 }
 0x385   :  { %v5948_v29 = vpop.permute.xlu0 %5947  ;;  %v3705_v6 = vrot.slane %v3697_v52, %v7347_v56  ;;  %v3721_v54 = vrot.slane %v3713_v14, %v7347_v56  ;;  %v3504_v19 = vrot.slane %v3490_v5, %v7366_v3  ;;  %v4223_v55 = vcombine.low %v4184_v28, %v4216_v41 }
 0x386   :  { %v9146_v51 = vsel %vm10632_vm9, %v6641_v31, %v5948_v29  ;;  %v4369_v0 = vrot.slane %v11100_v18, %v7347_v56  ;;  %v3689_v21 = vrot.slane %v3681_v38, %v7347_v56  ;;  %v4224_v14 = vcombine.high %v4184_v28, %v4216_v41 }
 0x387   :  { %11093 = vst [vmem:[#allocation58_spill] sm:$0xff] %v9146_v51  ;;  %6772 = vst.msk [vmem:[#allocation5] sm:$0xff] %vm6502_vm15, %v9146_v51  ;;  %6179 = vrot.lane.b32.xlu0 %v4222_v25, %s11097_s17  ;;  %5989 = vrot.lane.b32.xlu1 %v3542_v47, %s10962_s5  ;;  %v3777_v7 = vcombine.low %v3721_v54, %v3737_v61  ;;  %v9170_v8 = vpop.permute.xlu1 %5765  ;;  %v3543_v25 = vcombine.low %v3504_v19, %v3536_v12  ;;  %s11104_s5 = smov 62   ;;  %v11126_v51 = vld [vmem:[#allocation161_spill] sm:$0xff]  ;;  %vm11154_vm9 = vcmask 162816  }
 0x388   :  { %v4425_v32 = vcombine.low %v4369_v0, %v4385_v48  ;;  %11101 = vst [vmem:[#allocation96_spill] sm:$0xff] %v9170_v8  ;;  %v3745_v31 = vcombine.low %v3689_v21, %v3705_v6  ;;  %v4465_v5 = vrot.slane %v4457_v13, %v7366_v3  ;;  %v3544_v47 = vcombine.high %v3504_v19, %v3536_v12 }
 0x389   :  { %v9167_v26 = vpop.permute.xlu0 %5955  ;;  %v3785_v38 = vrot.slane %v3777_v7, %v7366_v3  ;;  %v4458_v44 = vcombine.high %v4401_v42, %v9131_v34  ;;  %v4378_v12 = vcombine.high %v11078_v27, %v11077_v30  ;;  %v4426_v19 = vcombine.high %v4369_v0, %v4385_v48 }
 0x38a   :  { %v4433_v18 = vrot.slane %v4425_v32, %v7366_v3  ;;  %v3753_v41 = vrot.slane %v3745_v31, %v7366_v3  ;;  %v4394_v7 = vcombine.high %v11084_v53, %v11083_v60  ;;  %v3730_v32 = vcombine.high %v11086_v40, %v11085_v39 }
 0x38b   :  { %6187 = vrot.lane.b32.xlu0 %v4223_v55, %s11102_s8  ;;  %5997 = vrot.lane.b32.xlu1 %v3543_v25, %s10971_s4  ;;  %v9177_v29 = vpop.permute.xlu1 %5773  ;;  %v4410_v55 = vcombine.high %v11082_v23, %v11081_v20  ;;  %v3778_v20 = vcombine.high %v3721_v54, %v3737_v61  ;;  %s11106_s4 = smov 64   ;;  %v4362_v42 = vcombine.high %v11098_v45, %v11099_v9 }
 0x38c   :  { %11103 = vst [vmem:[#allocation36_spill] sm:$0xff] %v9177_v29  ;;  %v4489_v13 = vcombine.low %v4433_v18, %v4465_v5  ;;  %v3809_v34 = vcombine.low %v3753_v41, %v3785_v38  ;;  %v4490_v31 = vcombine.high %v4433_v18, %v4465_v5  ;;  %v3698_v30 = vcombine.high %v11090_v2, %v11089_v33 }
 0x38d   :  { %v9174_v52 = vpop.permute.xlu0 %5963  ;;  %v4424_v25 = vrot.slane %v4410_v55, %v7347_v56  ;;  %v3746_v27 = vcombine.high %v3689_v21, %v3705_v6  ;;  %v3714_v60 = vcombine.high %v11092_v4, %v11091_v58  ;;  %v4472_v39 = vrot.slane %v4458_v44, %v7366_v3 }
 0x38e   :  { %v4392_v40 = vrot.slane %v4378_v12, %v7347_v56  ;;  %v4408_v48 = vrot.slane %v4394_v7, %v7347_v56  ;;  %v4440_v61 = vrot.slane %v4426_v19, %v7366_v3  ;;  %v3682_v45 = vcombine.high %v11095_v46, %v11094_v37 }
 0x38f   :  { %6195 = vrot.lane.b32.xlu0 %v4224_v14, %s11104_s5  ;;  %6005 = vrot.lane.b32.xlu1 %v3544_v47, %s10973_s6  ;;  %v9195_v23 = vpop.permute.xlu1 %5781  ;;  %v3744_v33 = vrot.slane %v3730_v32, %v7347_v56  ;;  %v3810_v58 = vcombine.high %v3753_v41, %v3785_v38  ;;  %s11108_s6 = smov 66   ;;  %v3792_v4 = vrot.slane %v3778_v20, %v7366_v3  ;;  %v11113_v20 = vld [vmem:[#allocation100_spill] sm:$0xff] }
 0x390   :  { %11105 = vst [vmem:[#allocation13_spill] sm:$0xff] %v9195_v23  ;;  %v4376_v44 = vrot.slane %v4362_v42, %v7347_v56  ;;  %v4473_v9 = vcombine.low %v4408_v48, %v4424_v25  ;;  %v3712_v0 = vrot.slane %v3698_v30, %v7347_v56  ;;  %v3728_v6 = vrot.slane %v3714_v60, %v7347_v56 }
 0x391   :  { %v9187_v28 = vpop.permute.xlu0 %5971  ;;  %v3760_v37 = vrot.slane %v3746_v27, %v7366_v3  ;;  %v4491_v54 = vcombine.low %v4440_v61, %v4472_v39  ;;  %v3696_v14 = vrot.slane %v3682_v45, %v7347_v56  ;;  %v4492_v41 = vcombine.high %v4440_v61, %v4472_v39  ;;  %v11116_v39 = vld [vmem:[#allocation50_spill] sm:$0xff]  ;;  %v11117_v61 = vld [vmem:[#allocation27_spill] sm:$0xff] }
 0x392   :  { %v4441_v21 = vcombine.low %v4376_v44, %v4392_v40  ;;  %v3793_v5 = vcombine.low %v3728_v6, %v3744_v33  ;;  %v4649_v45 = vcombine.low %v11117_v61, %v11116_v39 }
 0x393   :  { %6203 = vrot.lane.b32.xlu0 %v4489_v13, %s11106_s4  ;;  %6013 = vrot.lane.b32.xlu1 %v3809_v34, %s10976_s7  ;;  %v9215_v2 = vpop.permute.xlu1 %5789  ;;  %v3811_v38 = vcombine.low %v3760_v37, %v3792_v4  ;;  %s11110_s7 = smov 68   ;;  %v3761_v18 = vcombine.low %v3696_v14, %v3712_v0  ;;  %v4481_v13 = vrot.slane %v4473_v9, %v7366_v3  ;;  %v11114_v34 = vld [vmem:[#allocation72_spill] sm:$0xff]  ;;  %v11119_v9 = vld [vmem:[#allocation61_spill] sm:$0xff] }
 0x394   :  { %11107 = vst [vmem:[#allocation92_spill] sm:$0xff] %v9215_v2  ;;  %v3812_v19 = vcombine.high %v3760_v37, %v3792_v4  ;;  %v3801_v7 = vrot.slane %v3793_v5, %v7366_v3  ;;  %v4449_v32 = vrot.slane %v4441_v21, %v7366_v3  ;;  %v4681_v42 = vcombine.low %v11114_v34, %v11113_v20  ;;  %v11118_v4 = vld [vmem:[#allocation83_spill] sm:$0xff]  ;;  %v11120_v21 = vld [vmem:[#allocation206_spill] sm:$0xff]  ;;  %v11121_v5 = vld [vmem:[#allocation184_spill] sm:$0xff] }
 0x395   :  { %v9206_v53 = vpop.permute.xlu0 %5979  ;;  %v3769_v30 = vrot.slane %v3761_v18, %v7366_v3  ;;  %v4665_v37 = vcombine.low %v11119_v9, %v11118_v4  ;;  %v11125_v18 = vld [vmem:[#allocation16_spill] sm:$0xff]  ;;  %v9268_v23 = vrot.slane %v4649_v45, %v7347_v56 }
 0x396   :  { %v4493_v60 = vcombine.low %v4449_v32, %v4481_v13  ;;  %v9257_v63 = vrot.slane %v4681_v42, %v7347_v56 }
 0x397   :  { %6211 = vrot.lane.b32.xlu0 %v4490_v31, %s11108_s6  ;;  %6021 = vrot.lane.b32.xlu1 %v3810_v58, %s10979_s9  ;;  %v9227_v47 = vpop.permute.xlu1 %5797  ;;  %s11112_s9 = smov 70   ;;  %v4474_v31 = vcombine.high %v4408_v48, %v4424_v25  ;;  %v4442_v58 = vcombine.high %v4376_v44, %v4392_v40  ;;  %v3813_v25 = vcombine.low %v3769_v30, %v3801_v7  ;;  %v11124_v48 = vld [vmem:[#allocation39_spill] sm:$0xff] }
 0x398   :  { %11109 = vst [vmem:[#allocation68_spill] sm:$0xff] %v9227_v47  ;;  %v3762_v44 = vcombine.high %v3696_v14, %v3712_v0  ;;  %v11129_v47 = vld [vmem:[#allocation175_spill] sm:$0xff]  ;;  %v9271_v42 = vrot.slane %v4665_v37, %v7347_v56  ;;  %v11131_v0 = vld [vmem:[#allocation146_spill] sm:$0xff]  ;;  %v11132_v14 = vld [vmem:[#allocation116_spill] sm:$0xff] }
 0x399   :  { %v9224_v46 = vpop.permute.xlu0 %5987  ;;  %v4488_v40 = vrot.slane %v4474_v31, %v7366_v3  ;;  %v4456_v31 = vrot.slane %v4442_v58, %v7366_v3  ;;  %v3953_v29 = vcombine.low %v11132_v14, %v11131_v0 }
 0x39a   :  { %v4729_v45 = vcombine.low %v9271_v42, %v9257_v63 }
 0x39b   :  { %6219 = vrot.lane.b32.xlu0 %v4491_v54, %s11110_s7  ;;  %6029 = vrot.lane.b32.xlu1 %v3811_v38, %s10990_s10  ;;  %v9234_v12 = vpop.permute.xlu1 %5805  ;;  %v3794_v54 = vcombine.high %v3728_v6, %v3744_v33  ;;  %v4001_v38 = vcombine.low %v11121_v5, %v11120_v21  ;;  %s11123_s10 = smov 72   ;;  %v11128_v6 = vld [vmem:[#allocation193_spill] sm:$0xff]  ;;  %v9308_v49 = vrot.slane %v3953_v29, %v7347_v56 }
 0x39c   :  { %11111 = vst [vmem:[#allocation46_spill] sm:$0xff] %v9234_v12  ;;  %v11127_v12 = vld [vmem:[#allocation131_spill] sm:$0xff]  ;;  %v3985_v2 = vcombine.low %v11129_v47, %v11128_v6 }
 0x39d   :  { %v9231_v55 = vpop.permute.xlu0 %5995  ;;  %v3969_v33 = vcombine.low %v11127_v12, %v11126_v51  ;;  %v9277_v8 = vrot.slane %v4001_v38, %v7347_v56  ;;  %v4495_v38 = vcombine.low %v4456_v31, %v4488_v40 }
 0x39e   :  { %v9292_v37 = vrot.slane %v3985_v2, %v7347_v56 }
 0x39f   :  { %6227 = vrot.lane.b32.xlu0 %v4492_v41, %s11112_s9  ;;  %6037 = vrot.lane.b32.xlu1 %v3812_v19, %s10996_s11  ;;  %v9251_v41 = vpop.permute.xlu1 %5813  ;;  %v4633_v19 = vcombine.low %v11125_v18, %v11124_v48  ;;  %s11134_s11 = smov 74   ;;  %v9289_v58 = vrot.slane %v3969_v33, %v7347_v56  ;;  %v11138_v33 = vld [vmem:[#allocation200_spill] sm:$0xff] }
 0x3a0   :  { %11122 = vst [vmem:[#allocation79_spill] sm:$0xff] %v9251_v41 }
 0x3a1   :  { %v9243_v27 = vpop.permute.xlu0 %6003  ;;  %v4017_v29 = vcombine.low %v9308_v49, %v9289_v58 }
 0x3a2   :  { %11115 = vst [vmem:[#allocation23_spill] sm:$0xff] %v9243_v27  ;;  %v11147_v27 = vld [vmem:[#allocation45_spill] sm:$0xff] }
 0x3a3   :  { %6235 = vrot.lane.b32.xlu0 %v4493_v60, %s11123_s10  ;;  %6045 = vrot.lane.b32.xlu1 %v3813_v25, %s11001_s12  ;;  %v4494_v60 = vcombine.high %v4449_v32, %v4481_v13  ;;  %v9279_v50 = vpop.permute.xlu1 %5821  ;;  %v3814_v25 = vcombine.high %v3769_v30, %v3801_v7  ;;  %v3808_v13 = vrot.slane %v3794_v54, %v7366_v3  ;;  %s11172_s12 = smov 84  }
 0x3a4   :  { %11133 = vst [vmem:[#allocation35_spill] sm:$0xff] %v9279_v50  ;;  %v9284_v32 = vrot.slane %v4633_v19, %v7347_v56  ;;  %v3776_v7 = vrot.slane %v3762_v44, %v7366_v3  ;;  %v4634_v54 = vcombine.high %v11125_v18, %v11124_v48  ;;  %v11137_v50 = vld [vmem:[#allocation199_spill] sm:$0xff]  ;;  %v4049_v44 = vcombine.low %v9292_v37, %v9277_v8 }
 0x3a5   :  { %v9265_v41 = vpop.permute.xlu0 %6011  ;;  %v11139_v17 = vcombine.low %v11137_v50, %v11138_v33  ;;  %v4650_v18 = vcombine.high %v11117_v61, %v11116_v39  ;;  %v11142_v50 = vld [vmem:[#allocation167_spill] sm:$0xff]  ;;  %v11144_v39 = vld [vmem:[#allocation42_spill] sm:$0xff] }
 0x3a6   :  { %11130 = vst [vmem:[#allocation57_spill] sm:$0xff] %v9265_v41  ;;  %v4697_v19 = vcombine.low %v9284_v32, %v9268_v23  ;;  %v3815_v48 = vcombine.low %v3776_v7, %v3808_v13  ;;  %v11145_v61 = vld [vmem:[#allocation19_spill] sm:$0xff] }
 0x3a7   :  { %6243 = vrot.lane.b32.xlu0 %v4494_v60, %s11134_s11  ;;  %6053 = vrot.lane.b32.xlu1 %v3814_v25, %s11005_s13  ;;  %v11136_v60 = vld [vmem:[#allocation153_spill] sm:$0xff]  ;;  %v11140_v25 = vld [vmem:[#allocation123_spill] sm:$0xff]  ;;  %v9314_v41 = vpop.permute.xlu1 %5829  ;;  %v4905_v16 = vcombine.low %v11145_v61, %v11144_v39  ;;  %s11195_s13 = smov 88  }
 0x3a8   :  { %v6459_v2 = vsel %vm6457_vm0, %v11139_v17, %v11136_v60  ;;  %11141 = vst [vmem:[#allocation181_spill] sm:$0xff] %v9314_v41  ;;  %v11143_v60 = vld [vmem:[#allocation138_spill] sm:$0xff]  ;;  %v4737_v41 = vrot.slane %v4729_v45, %v7366_v3  ;;  %v4906_v45 = vcombine.high %v11145_v61, %v11144_v39 }
 0x3a9   :  { %v9296_v30 = vpop.permute.xlu0 %6019 }
 0x3aa   :  { %11135 = vst [vmem:[#allocation12_spill] sm:$0xff] %v9296_v30  ;;  %v6462_v30 = vsel %vm6460_vm1, %v6459_v2, %v11140_v25  ;;  %v4496_v25 = vcombine.high %v4456_v31, %v4488_v40  ;;  %v4057_v40 = vrot.slane %v4049_v44, %v7366_v3  ;;  %v4705_v31 = vrot.slane %v4697_v19, %v7366_v3 }
 0x3ab   :  { %6251 = vrot.lane.b32.xlu0 %v4495_v38, %s7022_s29  ;;  %v6465_v17 = vsel %vm6463_vm2, %v6462_v30, %v11142_v50  ;;  %6061 = vrot.lane.b32.xlu1 %v3815_v48, %s11015_s14  ;;  %v9330_v38 = vrot.slane %v4634_v54, %v7347_v56  ;;  %v11146_v30 = vld [vmem:[#allocation91_spill] sm:$0xff]  ;;  %v3816_v48 = vcombine.high %v3776_v7, %v3808_v13  ;;  %v11149_v7 = vld [vmem:[#allocation34_spill] sm:$0xff]  ;;  %s11274_s14 = smov 102  }
 0x3ac   :  { %v6468_v33 = vsel %vm6466_vm3, %v6465_v17, %v11143_v60  ;;  %v9338_v17 = vpop.permute.xlu1 %5837  ;;  %v4682_v54 = vcombine.high %v11114_v34, %v11113_v20  ;;  %v4730_v60 = vcombine.high %v9271_v42, %v9257_v63  ;;  %v9352_v13 = vrot.slane %v4650_v18, %v7347_v56  ;;  %v11150_v63 = vld [vmem:[#allocation53_spill] sm:$0xff]  ;;  %v11151_v34 = vld [vmem:[#allocation30_spill] sm:$0xff]  ;;  %v11152_v18 = vld [vmem:[#allocation152_spill] sm:$0xff] }
 0x3ad   :  { %v9326_v2 = vpop.permute.xlu0 %6027  ;;  %v6471_v50 = vsel %vm6469_vm4, %v6468_v33, %v11146_v30  ;;  %v11148_v33 = vld [vmem:[#allocation78_spill] sm:$0xff]  ;;  %v4025_v19 = vrot.slane %v4017_v29, %v7366_v3  ;;  %v4761_v39 = vcombine.low %v4705_v31, %v4737_v41  ;;  %v4698_v20 = vcombine.high %v9284_v32, %v9268_v23 }
 0x3ae   :  { %v6474_v59 = vsel %vm6472_vm5, %v6471_v50, %v11147_v27  ;;  %v4921_v42 = vcombine.low %v11151_v34, %v11150_v63  ;;  %v4002_v30 = vcombine.high %v11121_v5, %v11120_v21  ;;  %v4050_v29 = vcombine.high %v9292_v37, %v9277_v8  ;;  %v11153_v50 = vld [vmem:[#allocation166_spill] sm:$0xff] }
 0x3af   :  { %6259 = vrot.lane.b32.xlu0 %v4496_v25, %s7023_s30  ;;  %v6477_v27 = vsel %vm6475_vm6, %v6474_v59, %v11148_v33  ;;  %6069 = vrot.lane.b32.xlu1 %v3816_v48, %s11016_s16  ;;  %v4666_v59 = vcombine.high %v11119_v9, %v11118_v4  ;;  %v4081_v23 = vcombine.low %v4025_v19, %v4057_v40  ;;  %v11155_v4 = vld [vmem:[#allocation107_spill] sm:$0xff]  ;;  %s11288_s16 = smov 104  }
 0x3b0   :  { %v6480_v44 = vsel %vm10634_vm7, %v6477_v27, %v11149_v7  ;;  %v9374_v33 = vpop.permute.xlu1 %5845  ;;  %v9378_v32 = vrot.slane %v4682_v54, %v7347_v56  ;;  %v4762_v27 = vcombine.high %v4705_v31, %v4737_v41  ;;  %v4744_v21 = vrot.slane %v4730_v60, %v7366_v3  ;;  %v11157_v7 = vld [vmem:[#allocation66_spill] sm:$0xff] }
 0x3b1   :  { %v9358_v25 = vpop.permute.xlu0 %6035  ;;  %v6483_v61 = vsel %vm10635_vm8, %v6480_v44, %v11152_v18  ;;  %v3970_v8 = vcombine.high %v11127_v12, %v11126_v51  ;;  %v4018_v5 = vcombine.high %v9308_v49, %v9289_v58  ;;  %v3986_v37 = vcombine.high %v11129_v47, %v11128_v6  ;;  %v11159_v51 = vld [vmem:[#allocation21_spill] sm:$0xff]  ;;  %v11161_v6 = vld [vmem:[#allocation55_spill] sm:$0xff] }
 0x3b2   :  { %v6486_v48 = vsel %vm11154_vm9, %v6483_v61, %v11153_v50  ;;  %vm11158_vm9 = vcmask 195584   ;;  %v9395_v41 = vrot.slane %v4666_v59, %v7347_v56  ;;  %v3954_v31 = vcombine.high %v11132_v14, %v11131_v0 }
 0x3b3   :  { %6267 = vrot.lane.b32.xlu0 %v4761_v39, %s7024_s2  ;;  %v6489_v9 = vsel %vm11156_vm12, %v6486_v48, %v11155_v4  ;;  %6077 = vrot.lane.b32.xlu1 %v4081_v23, %s11017_s15  ;;  %vm11160_vm12 = vcmask 211968   ;;  %v4712_v49 = vrot.slane %v4698_v20, %v7366_v3  ;;  %v9403_v47 = vrot.slane %v4002_v30, %v7347_v56  ;;  %v11164_v20 = vld [vmem:[#allocation10_spill] sm:$0xff] }
 0x3b4   :  { %v6492_v44 = vsel %vm11158_vm9, %v6489_v9, %v11157_v7  ;;  %vm11162_vm9 = vcmask 228352   ;;  %v9407_v60 = vpop.permute.xlu1 %5853  ;;  %v4082_v39 = vcombine.high %v4025_v19, %v4057_v40  ;;  %v4064_v59 = vrot.slane %v4050_v29, %v7366_v3  ;;  %v11166_v40 = vld [vmem:[#allocation125_spill] sm:$0xff] }
 0x3b5   :  { %v9392_v54 = vpop.permute.xlu0 %6043  ;;  %v6495_v12 = vsel %vm11160_vm12, %v6492_v44, %v11159_v51  ;;  %11163 = vst [vmem:[#allocation157_spill] sm:$0xff] %v9407_v60  ;;  %v9412_v0 = vrot.slane %v4905_v16, %v7347_v56  ;;  %v4745_v14 = vcombine.low %v9395_v41, %v9378_v32  ;;  %vm11165_vm12 = vcmask 244736   ;;  %v11167_v9 = vld [vmem:[#allocation169_spill] sm:$0xff] }
 0x3b6   :  { %v6498_v58 = vsel %vm11162_vm9, %v6495_v12, %v11161_v6  ;;  %v4763_v61 = vcombine.low %v4712_v49, %v4744_v21  ;;  %v9419_v30 = vrot.slane %v3970_v8, %v7347_v56  ;;  %v9422_v50 = vrot.slane %v3986_v37, %v7347_v56  ;;  %v11169_v37 = vld [vmem:[#allocation110_spill] sm:$0xff]  ;;  %v11175_v6 = vld [vmem:[#allocation124_spill] sm:$0xff] }
 0x3b7   :  { %6275 = vrot.lane.b32.xlu0 %v4762_v27, %s7025_s3  ;;  %v6501_v18 = vsel %vm11165_vm12, %v6498_v58, %v11164_v20  ;;  %6085 = vrot.lane.b32.xlu1 %v4082_v39, %s11021_s18  ;;  %v4032_v16 = vrot.slane %v4018_v5, %v7366_v3  ;;  %v4713_v48 = vcombine.low %v9330_v38, %v9352_v13  ;;  %vm11168_vm9 = vcmask 277504   ;;  %v11177_v20 = vld [vmem:[#allocation168_spill] sm:$0xff]  ;;  %s11297_s18 = smov 106  }
 0x3b8   :  { %v6504_v19 = vsel %vm6502_vm15, %v6501_v18, %v11166_v40  ;;  %v4922_v23 = vcombine.high %v11151_v34, %v11150_v63  ;;  %v9435_v4 = vrot.slane %v4921_v42, %v7347_v56  ;;  %v9440_v8 = vrot.slane %v3954_v31, %v7347_v56  ;;  %v9446_v44 = vpop.permute.xlu1 %5861  ;;  %v11173_v42 = vld [vmem:[#allocation105_spill] sm:$0xff]  ;;  %v11174_v31 = vld [vmem:[#allocation75_spill] sm:$0xff] }
 0x3b9   :  { %v9428_v29 = vpop.permute.xlu0 %6051  ;;  %v6507_v27 = vsel %vm11168_vm9, %v6504_v19, %v11167_v9  ;;  %v4065_v5 = vcombine.low %v9422_v50, %v9403_v47  ;;  %vm11170_vm12 = vcmask 293888   ;;  %11171 = vst [vmem:[#allocation127_spill] sm:$0xff] %v9446_v44  ;;  %v4083_v51 = vcombine.low %v4032_v16, %v4064_v59  ;;  %v11179_v19 = vld [vmem:[#allocation86_spill] sm:$0xff]  ;;  %v11180_v9 = vld [vmem:[#allocation64_spill] sm:$0xff]  ;;  %v11203_v44 = vld [vmem:[#allocation115_spill] sm:$0xff] }
 0x3ba   :  { %v6510_v7 = vsel %vm11170_vm12, %v6507_v27, %v11169_v37  ;;  %v9450_v63 = vrot.slane %v4906_v45, %v7347_v56  ;;  %v4714_v34 = vcombine.high %v9330_v38, %v9352_v13  ;;  %v4953_v12 = vcombine.low %v11174_v31, %v11173_v42  ;;  %v11181_v37 = vld [vmem:[#allocation139_spill] sm:$0xff] }
 0x3bb   :  { %6283 = vrot.lane.b32.xlu0 %v4763_v61, %s11172_s12  ;;  %vm11176_vm9 = vcmask 310272   ;;  %v4033_v39 = vcombine.low %v9440_v8, %v9419_v30  ;;  %vm11178_vm12 = vcmask 326656   ;;  %6093 = vrot.lane.b32.xlu1 %v4083_v51, %s11024_s22  ;;  %v4764_v45 = vcombine.high %v4712_v49, %v4744_v21  ;;  %s11186_s22 = smov 86  }
 0x3bc   :  { %v6513_v58 = vsel %vm11176_vm9, %v6510_v7, %v11175_v6  ;;  %v4753_v40 = vrot.slane %v4745_v14, %v7366_v3  ;;  %v9467_v38 = vrot.slane %v4922_v23, %v7347_v56  ;;  %v4969_v13 = vcombine.low %v9412_v0, %v9435_v4  ;;  %v11183_v6 = vld [vmem:[#allocation93_spill] sm:$0xff] }
 0x3bd   :  { %v6516_v18 = vsel %vm11178_vm12, %v6513_v58, %v11177_v20  ;;  %v9463_v61 = vpop.permute.xlu0 %6059  ;;  %v4937_v27 = vcombine.low %v11180_v9, %v11179_v19  ;;  %vm11182_vm9 = vcmask 343040   ;;  %vm11184_vm12 = vcmask 359424   ;;  %v9477_v58 = vpop.permute.xlu1 %5869 }
 0x3be   :  { %v6519_v7 = vsel %vm11182_vm9, %v6516_v18, %v11181_v37  ;;  %11185 = vst [vmem:[#allocation190_spill] sm:$0xff] %v9477_v58  ;;  %v4084_v21 = vcombine.high %v4032_v16, %v4064_v59  ;;  %v4073_v49 = vrot.slane %v4065_v5, %v7366_v3  ;;  %v4721_v14 = vrot.slane %v4713_v48, %v7366_v3  ;;  %v11187_v37 = vld [vmem:[#allocation99_spill] sm:$0xff]  ;;  %v11202_v58 = vld [vmem:[#allocation145_spill] sm:$0xff] }
 0x3bf   :  { %v6522_v51 = vsel %vm11184_vm12, %v6519_v7, %v11183_v6  ;;  %6291 = vrot.lane.b32.xlu0 %v4764_v45, %s11186_s22  ;;  %v4746_v20 = vcombine.high %v9395_v41, %v9378_v32  ;;  %v9487_v18 = vrot.slane %v4953_v12, %v7347_v56  ;;  %vm11188_vm9 = vcmask 375808   ;;  %v11190_v41 = vld [vmem:[#allocation65_spill] sm:$0xff] }
 0x3c0   :  { %v6525_v7 = vsel %vm11188_vm9, %v6522_v51, %v11187_v37  ;;  %vm11189_vm12 = vcmask 392192   ;;  %6101 = vrot.lane.b32.xlu1 %v4084_v21, %s11029_s19  ;;  %v4041_v16 = vrot.slane %v4033_v39, %v7366_v3  ;;  %v4765_v5 = vcombine.low %v4721_v14, %v4753_v40  ;;  %v11191_v12 = vld [vmem:[#allocation185_spill] sm:$0xff]  ;;  %s11300_s19 = smov 108  }
 0x3c1   :  { %v6528_v59 = vsel %vm11189_vm12, %v6525_v7, %v8746_v15  ;;  %v9495_v48 = vpop.permute.xlu0 %6067  ;;  %v9498_v45 = vrot.slane %v4714_v34, %v7366_v3  ;;  %v9501_v32 = vrot.slane %v4937_v27, %v7347_v56  ;;  %v4273_v6 = vcombine.low %v11191_v12, %v11190_v41  ;;  %v9516_v27 = vpop.permute.xlu1 %5877  ;;  %v11196_v7 = vld [vmem:[#allocation160_spill] sm:$0xff] }
 0x3c2   :  { %vm11192_vm9 = vcmask 408576   ;;  %v9508_v15 = vrot.slane %v4969_v13, %v7366_v3  ;;  %v4954_v39 = vcombine.high %v11174_v31, %v11173_v42  ;;  %v4066_v21 = vcombine.high %v9422_v50, %v9403_v47  ;;  %11194 = vst [vmem:[#allocation171_spill] sm:$0xff] %v9516_v27  ;;  %v11197_v13 = vld [vmem:[#allocation130_spill] sm:$0xff] }
 0x3c3   :  { %v6531_v51 = vsel %vm11192_vm9, %v6528_v59, %v8776_v35  ;;  %vm11193_vm12 = vcmask 424960   ;;  %v4085_v37 = vcombine.low %v4041_v16, %v4073_v49  ;;  %6299 = vrot.lane.b32.xlu0 %v4765_v5, %s11195_s13  ;;  %v5001_v35 = vcombine.low %v9501_v32, %v9487_v18  ;;  %v11200_v50 = vld [vmem:[#allocation174_spill] sm:$0xff] }
 0x3c4   :  { %v6534_v34 = vsel %vm11193_vm12, %v6531_v51, %v8803_v22  ;;  %v4241_v59 = vcombine.low %v11197_v13, %v11196_v7  ;;  %vm11198_vm9 = vcmask 441344   ;;  %v4760_v31 = vrot.slane %v4746_v20, %v7366_v3  ;;  %v11199_v22 = vld [vmem:[#allocation198_spill] sm:$0xff]  ;;  %v11206_v20 = vld [vmem:[#allocation103_spill] sm:$0xff] }
 0x3c5   :  { %v6537_v42 = vsel %vm11198_vm9, %v6534_v34, %v8833_v11  ;;  %v4034_v47 = vcombine.high %v9440_v8, %v9419_v30  ;;  %v4257_v51 = vcombine.low %v11200_v50, %v11199_v22  ;;  %vm11201_vm12 = vcmask 457728   ;;  %6109 = vrot.lane.b32.xlu1 %v4085_v37, %s11035_s23  ;;  %v9533_v23 = vpop.permute.xlu0 %6075  ;;  %v11205_v8 = vld [vmem:[#allocation102_spill] sm:$0xff]  ;;  %s11209_s23 = smov 90  }
 0x3c6   :  { %v6540_v5 = vsel %vm11201_vm12, %v6537_v42, %v8858_v10  ;;  %v4766_v27 = vcombine.high %v4721_v14, %v4753_v40  ;;  %v4225_v60 = vcombine.low %v11203_v44, %v11202_v58  ;;  %v9538_v11 = vrot.slane %v4273_v6, %v7347_v56  ;;  %v9551_v14 = vpop.permute.xlu1 %5885 }
 0x3c7   :  { %vm11204_vm9 = vcmask 474112   ;;  %v11207_v34 = vcombine.low %v11205_v8, %v11206_v20  ;;  %vm11208_vm12 = vcmask 490496   ;;  %v4086_v42 = vcombine.high %v4041_v16, %v4073_v49 }
 0x3c8   :  { %v6543_v30 = vsel %vm11204_vm9, %v6540_v5, %v8889_v24  ;;  %6307 = vrot.lane.b32.xlu0 %v4766_v27, %s11209_s23  ;;  %v4080_v6 = vrot.slane %v4066_v21, %v7366_v3  ;;  %v9556_v24 = vrot.slane %v4241_v59, %v7347_v56  ;;  %vm11210_vm9 = vcmask 506880  }
 0x3c9   :  { %v6646_v10 = vsel %vm6457_vm0, %v11207_v34, %v9167_v26  ;;  %v6546_v37 = vsel %vm11208_vm12, %v6543_v30, %v8914_v43  ;;  %v4767_v43 = vcombine.low %v9498_v45, %v4760_v31  ;;  %vm11211_vm12 = vcmask 523264   ;;  %6117 = vrot.lane.b32.xlu1 %v4086_v42, %s11040_s24  ;;  %v9572_v27 = vpop.permute.xlu0 %6083  ;;  %s11214_s24 = smov 92  }
 0x3ca   :  { %v6648_v40 = vsel %vm6460_vm1, %v6646_v10, %v9174_v52  ;;  %v6549_v5 = vsel %vm11210_vm9, %v6546_v37, %v8941_v62  ;;  %v9564_v52 = vrot.slane %v4257_v51, %v7347_v56  ;;  %v4048_v21 = vrot.slane %v4034_v47, %v7366_v3  ;;  %v9589_v30 = vpop.permute.xlu1 %5893  ;;  %v11220_v10 = vld [vmem:[#allocation57_spill] sm:$0xff] }
 0x3cb   :  { %v6650_v26 = vsel %vm6463_vm2, %v6648_v40, %v9187_v28  ;;  %v6552_v49 = vsel %vm11211_vm12, %v6549_v5, %v8965_v57  ;;  %v4938_v62 = vcombine.high %v11180_v9, %v11179_v19  ;;  %v9577_v28 = vrot.slane %v4225_v60, %v7347_v56  ;;  %v11217_v9 = vld [vmem:[#allocation23_spill] sm:$0xff]  ;;  %v11221_v5 = vld [vmem:[#allocation24_spill] sm:$0xff] }
 0x3cc   :  { %v6652_v16 = vsel %vm6466_vm3, %v6650_v26, %v9206_v53  ;;  %vm11212_vm9 = vcmask 539648   ;;  %v4321_v53 = vcombine.low %v9564_v52, %v9538_v11  ;;  %vm11213_vm12 = vcmask 556032   ;;  %6315 = vrot.lane.b32.xlu0 %v4767_v43, %s11214_s24  ;;  %v11223_v26 = vld [vmem:[#allocation12_spill] sm:$0xff] }
 0x3cd   :  { %v6555_v59 = vsel %vm11212_vm9, %v6552_v49, %v8994_v1  ;;  %v6654_v57 = vsel %vm6469_vm4, %v6652_v16, %v9224_v46  ;;  %v4087_v19 = vcombine.low %v4048_v21, %v4080_v6  ;;  %v9593_v60 = vrot.slane %v4954_v39, %v7347_v56  ;;  %v11215_v1 = vld [vmem:[#allocation98_spill] sm:$0xff]  ;;  %v6092_v39 = vpop.permute.xlu0 %6091 }
 0x3ce   :  { %v6558_v47 = vsel %vm11213_vm12, %v6555_v59, %v9026_v36  ;;  %v6656_v51 = vsel %vm6472_vm5, %v6654_v57, %v9231_v55  ;;  %vm11216_vm9 = vcmask 572416   ;;  %v5009_v20 = vrot.slane %v5001_v35, %v7366_v3  ;;  %v11218_v55 = vld [vmem:[#allocation47_spill] sm:$0xff]  ;;  %v11225_v59 = vld [vmem:[#allocation80_spill] sm:$0xff] }
 0x3cf   :  { %v6561_v46 = vsel %vm11216_vm9, %v6558_v47, %v11215_v1  ;;  %v6658_v8 = vsel %vm6475_vm6, %v6656_v51, %v11217_v9  ;;  %v4289_v36 = vcombine.low %v9577_v28, %v9556_v24  ;;  %vm11219_vm12 = vcmask 588800   ;;  %6125 = vrot.lane.b32.xlu1 %v4087_v19, %s11045_s25  ;;  %s11228_s25 = smov 94   ;;  %v11235_v9 = vld [vmem:[#allocation36_spill] sm:$0xff] }
 0x3d0   :  { %v6564_v34 = vsel %vm11219_vm12, %v6561_v46, %v11218_v55  ;;  %v6660_v37 = vsel %vm10634_vm7, %v6658_v8, %v11220_v10  ;;  %v4768_v40 = vcombine.high %v9498_v45, %v4760_v31  ;;  %v9609_v42 = vrot.slane %v4938_v62, %v7347_v56  ;;  %v9625_v31 = vpop.permute.xlu1 %5901 }
 0x3d1   :  { %vm11222_vm9 = vcmask 605184   ;;  %v6662_v43 = vsel %vm10635_vm8, %v6660_v37, %v11223_v26  ;;  %v11224_v49 = vcombine.high %v9412_v0, %v9435_v4  ;;  %vm11226_vm12 = vcmask 621568   ;;  %v11229_v4 = vld [vmem:[#allocation94_spill] sm:$0xff] }
 0x3d2   :  { %v6567_v35 = vsel %vm11222_vm9, %v6564_v34, %v11221_v5  ;;  %vm11227_vm7 = vcmask 162816   ;;  %v4088_v62 = vcombine.high %v4048_v21, %v4080_v6  ;;  %6323 = vrot.lane.b32.xlu0 %v4768_v40, %s11228_s25  ;;  %v4329_v47 = vrot.slane %v4321_v53, %v7366_v3  ;;  %v11238_v34 = vld [vmem:[#allocation13_spill] sm:$0xff]  ;;  %v11245_v40 = vld [vmem:[#allocation68_spill] sm:$0xff]  ;;  %v11247_v26 = vld [vmem:[#allocation46_spill] sm:$0xff] }
 0x3d3   :  { %v9619_v16 = vrot.slane %v11224_v49, %v7366_v3  ;;  %v6570_v57 = vsel %vm11226_vm12, %v6567_v35, %v11225_v59  ;;  %v6664_v45 = vsel %vm11227_vm7, %v6662_v43, %v9326_v2  ;;  %v5002_v51 = vcombine.high %v9501_v32, %v9487_v18  ;;  %v11232_v2 = vld [vmem:[#allocation96_spill] sm:$0xff]  ;;  %v6100_v18 = vpop.permute.xlu0 %6099  ;;  %v11253_v59 = vld [vmem:[#allocation35_spill] sm:$0xff] }
 0x3d4   :  { %v5017_v0 = vcombine.low %v9609_v42, %v9593_v60  ;;  %vm11230_vm9 = vcmask 637952   ;;  %vm11231_vm12 = vcmask 179200   ;;  %vm11233_vm7 = vcmask 654336   ;;  %6133 = vrot.lane.b32.xlu1 %v4088_v62, %s11051_s26  ;;  %v9657_v37 = vpop.permute.xlu1 %5909  ;;  %s11241_s26 = smov 96  }
 0x3d5   :  { %v6573_v19 = vsel %vm11230_vm9, %v6570_v57, %v11229_v4  ;;  %v6666_v1 = vsel %vm11231_vm12, %v6664_v45, %v9358_v25  ;;  %vm11234_vm8 = vcmask 195584   ;;  %v4297_v21 = vrot.slane %v4289_v36, %v7366_v3 }
 0x3d6   :  { %v6576_v46 = vsel %vm11233_vm7, %v6573_v19, %v11232_v2  ;;  %v6668_v6 = vsel %vm11234_vm8, %v6666_v1, %v9392_v54  ;;  %v5033_v32 = vcombine.low %v9508_v15, %v5009_v20  ;;  %v4274_v53 = vcombine.high %v11191_v12, %v11190_v41 }
 0x3d7   :  { %vm11236_vm9 = vcmask 670720   ;;  %vm11237_vm12 = vcmask 211968   ;;  %v5034_v55 = vcombine.high %v9508_v15, %v5009_v20  ;;  %v4322_v54 = vcombine.high %v9564_v52, %v9538_v11 }
 0x3d8   :  { %v6579_v8 = vsel %vm11236_vm9, %v6576_v46, %v11235_v9  ;;  %v6670_v25 = vsel %vm11237_vm12, %v6668_v6, %v9428_v29  ;;  %vm11239_vm8 = vcmask 687104   ;;  %vm11240_vm7 = vcmask 228352   ;;  %6331 = vrot.lane.b32.xlu0 %v5033_v32, %s11241_s26  ;;  %v11242_v29 = vld [vmem:[#allocation92_spill] sm:$0xff]  ;;  %v5918_v43 = vpop.permute.xlu1 %5917 }
 0x3d9   :  { %v6582_v36 = vsel %vm11239_vm8, %v6579_v8, %v11238_v34  ;;  %v6672_v10 = vsel %vm11240_vm7, %v6670_v25, %v9463_v61  ;;  %v4353_v41 = vcombine.low %v4297_v21, %v4329_v47  ;;  %v4242_v12 = vcombine.high %v11197_v13, %v11196_v7  ;;  %v6108_v13 = vpop.permute.xlu0 %6107  ;;  %v11263_v9 = vld [vmem:[#allocation52_spill] sm:$0xff]  ;;  %v11264_v8 = vld [vmem:[#allocation29_spill] sm:$0xff]  ;;  %v11267_v34 = vld [vmem:[#allocation127_spill] sm:$0xff] }
 0x3da   :  { %vm11243_vm9 = vcmask 703488   ;;  %vm11244_vm12 = vcmask 244736   ;;  %v5016_v52 = vrot.slane %v5002_v51, %v7366_v3  ;;  %v4290_v20 = vcombine.high %v9577_v28, %v9556_v24 }
 0x3db   :  { %v6585_v15 = vsel %vm11243_vm9, %v6582_v36, %v11242_v29  ;;  %v6674_v11 = vsel %vm11244_vm12, %v6672_v10, %v9495_v48  ;;  %v4258_v61 = vcombine.high %v11200_v50, %v11199_v22  ;;  %vm11246_vm8 = vcmask 719872   ;;  %6141 = vrot.lane.b32.xlu1 %v4353_v41, %s11060_s27  ;;  %v11250_v50 = vld [vmem:[#allocation79_spill] sm:$0xff]  ;;  %s11252_s27 = smov 98   ;;  %v11269_v29 = vld [vmem:[#allocation190_spill] sm:$0xff] }
 0x3dc   :  { %v6588_v5 = vsel %vm11246_vm8, %v6585_v15, %v11245_v40  ;;  %v6676_v7 = vsel %vm6502_vm15, %v6674_v11, %v9533_v23  ;;  %v4226_v48 = vcombine.high %v11203_v44, %v11202_v58  ;;  %v9679_v35 = vrot.slane %v4274_v53, %v7347_v56  ;;  %6339 = vrot.lane.b32.xlu0 %v5034_v55, %s11252_s27  ;;  %v5926_v32 = vpop.permute.xlu1 %5925  ;;  %v11265_v55 = vld [vmem:[#allocation157_spill] sm:$0xff] }
 0x3dd   :  { %vm11248_vm7 = vcmask 736256   ;;  %vm11249_vm9 = vcmask 277504   ;;  %vm11251_vm12 = vcmask 293888   ;;  %v4354_v49 = vcombine.high %v4297_v21, %v4329_v47  ;;  %v6116_v19 = vpop.permute.xlu0 %6115 }
 0x3de   :  { %v6591_v24 = vsel %vm11248_vm7, %v6588_v5, %v11247_v26  ;;  %v6678_v22 = vsel %vm11249_vm9, %v6676_v7, %v9572_v27  ;;  %v4336_v44 = vrot.slane %v4322_v54, %v7366_v3  ;;  %v9691_v58 = vrot.slane %v4242_v12, %v7347_v56  ;;  %v11276_v7 = vld [vmem:[#allocation18_spill] sm:$0xff] }
 0x3df   :  { %v6594_v28 = vsel %vm6592_vm13, %v6591_v24, %v11250_v50  ;;  %v6680_v23 = vsel %vm11251_vm12, %v6678_v22, %v6092_v39  ;;  %vm11254_vm8 = vcmask 769024   ;;  %vm11255_vm7 = vcmask 310272   ;;  %v11256_v39 = vld [vmem:[#allocation181_spill] sm:$0xff]  ;;  %6149 = vrot.lane.b32.xlu1 %v4354_v49, %s11073_s28  ;;  %s11262_s28 = smov 100  }
 0x3e0   :  { %v6597_v57 = vsel %vm11254_vm8, %v6594_v28, %v11253_v59  ;;  %v6682_v45 = vsel %vm11255_vm7, %v6680_v23, %v6100_v18  ;;  %v5035_v27 = vcombine.low %v9619_v16, %v5016_v52  ;;  %v9698_v62 = vrot.slane %v4258_v61, %v7347_v56  ;;  %v5934_v40 = vpop.permute.xlu1 %5933  ;;  %v11282_v59 = vld [vmem:[#allocation63_spill] sm:$0xff] }
 0x3e1   :  { %vm11257_vm9 = vcmask 785408   ;;  %vm11258_vm12 = vcmask 326656   ;;  %v4304_v4 = vrot.slane %v4290_v20, %v7366_v3  ;;  %v4985_v1 = vcombine.low %v9450_v63, %v9467_v38  ;;  %v6124_v10 = vpop.permute.xlu0 %6123  ;;  %v11272_v20 = vld [vmem:[#allocation171_spill] sm:$0xff] }
 0x3e2   :  { %v6600_v47 = vsel %vm11257_vm9, %v6597_v57, %v11256_v39  ;;  %v6684_v51 = vsel %vm11258_vm12, %v6682_v45, %v6108_v13  ;;  %vm11259_vm8 = vcmask 801792   ;;  %vm11260_vm7 = vcmask 343040   ;;  %6347 = vrot.lane.b32.xlu0 %v5035_v27, %s11262_s28  ;;  %v11286_v27 = vld [vmem:[#allocation186_spill] sm:$0xff] }
 0x3e3   :  { %v6603_v2 = vsel %vm11259_vm8, %v6600_v47, %v9338_v17  ;;  %v6686_v46 = vsel %vm11260_vm7, %v6684_v51, %v6116_v19  ;;  %v9711_v6 = vrot.slane %v4226_v48, %v7347_v56  ;;  %v4337_v21 = vcombine.low %v9698_v62, %v9679_v35 }
 0x3e4   :  { %vm11261_vm9 = vcmask 818176   ;;  %v4355_v53 = vcombine.low %v4304_v4, %v4336_v44  ;;  %v5193_v25 = vcombine.low %v11264_v8, %v11263_v9  ;;  %vm11266_vm12 = vcmask 834560   ;;  %v5942_v51 = vpop.permute.xlu1 %5941 }
 0x3e5   :  { %v6606_v18 = vsel %vm11261_vm9, %v6603_v2, %v9374_v33  ;;  %v4305_v54 = vcombine.low %v9711_v6, %v9691_v58  ;;  %vm11268_vm8 = vcmask 850944   ;;  %v5036_v33 = vcombine.high %v9619_v16, %v5016_v52  ;;  %v6132_v23 = vpop.permute.xlu0 %6131 }
 0x3e6   :  { %v6609_v17 = vsel %vm11266_vm12, %v6606_v18, %v11265_v55  ;;  %6157 = vrot.lane.b32.xlu1 %v4355_v53, %s11076_s0  ;;  %v5025_v41 = vrot.slane %v5017_v0, %v7366_v3  ;;  %v4986_v12 = vcombine.high %v9450_v63, %v9467_v38  ;;  %vm11270_vm7 = vcmask 867328   ;;  %v11275_v0 = vld [vmem:[#allocation41_spill] sm:$0xff]  ;;  %v11277_v63 = vld [vmem:[#allocation104_spill] sm:$0xff]  ;;  %v11278_v38 = vld [vmem:[#allocation74_spill] sm:$0xff]  ;;  %s11302_s0 = smov 110  }
 0x3e7   :  { %v6612_v36 = vsel %vm11268_vm8, %v6609_v17, %v11267_v34  ;;  %vm11271_vm9 = vcmask 359424   ;;  %vm11273_vm12 = vcmask 883712   ;;  %v4356_v5 = vcombine.high %v4304_v4, %v4336_v44  ;;  %6355 = vrot.lane.b32.xlu0 %v5036_v33, %s11274_s14  ;;  %v11281_v44 = vld [vmem:[#allocation85_spill] sm:$0xff]  ;;  %v11291_v18 = vld [vmem:[#allocation194_spill] sm:$0xff] }
 0x3e8   :  { %v6615_v15 = vsel %vm11270_vm7, %v6612_v36, %v11269_v29  ;;  %v6688_v11 = vsel %vm11271_vm9, %v6686_v46, %v6124_v10  ;;  %v4345_v16 = vrot.slane %v4337_v21, %v7366_v3  ;;  %v4993_v52 = vrot.slane %v4985_v1, %v7366_v3  ;;  %v11290_v46 = vld [vmem:[#allocation133_spill] sm:$0xff]  ;;  %v5950_v33 = vpop.permute.xlu1 %5949 }
 0x3e9   :  { %v6618_v61 = vsel %vm11273_vm12, %v6615_v15, %v11272_v20  ;;  %v5177_v13 = vcombine.low %v11276_v7, %v11275_v0  ;;  %v5225_v48 = vcombine.low %v11278_v38, %v11277_v63  ;;  %v5018_v26 = vcombine.high %v9609_v42, %v9593_v60  ;;  %v6140_v55 = vpop.permute.xlu0 %6139 }
 0x3ea   :  { %vm11279_vm8 = vcmask 900096   ;;  %v9751_v22 = vrot.slane %v5193_v25, %v7347_v56  ;;  %vm11280_vm7 = vcmask 916480   ;;  %6165 = vrot.lane.b32.xlu1 %v4356_v5, %s11080_s20  ;;  %v4313_v28 = vrot.slane %v4305_v54, %v7366_v3  ;;  %v11294_v54 = vld [vmem:[#allocation118_spill] sm:$0xff]  ;;  %s11306_s20 = smov 114  }
 0x3eb   :  { %v6621_v24 = vsel %vm11279_vm8, %v6618_v61, %v9551_v14  ;;  %v5037_v49 = vcombine.low %v4993_v52, %v5025_v41  ;;  %v5209_v57 = vcombine.low %v11282_v59, %v11281_v44  ;;  %vm11283_vm9 = vcmask 932864  }
 0x3ec   :  { %v6624_v50 = vsel %vm11280_vm7, %v6621_v24, %v9589_v30  ;;  %vm11284_vm12 = vcmask 375808   ;;  %v5000_v42 = vrot.slane %v4986_v12, %v7366_v3  ;;  %v4338_v45 = vcombine.high %v9698_v62, %v9679_v35  ;;  %v11285_v30 = vld [vmem:[#allocation209_spill] sm:$0xff]  ;;  %v11289_v62 = vld [vmem:[#allocation163_spill] sm:$0xff] }
 0x3ed   :  { %v6627_v60 = vsel %vm11283_vm9, %v6624_v50, %v9625_v31  ;;  %v6690_v14 = vsel %vm11284_vm12, %v6688_v11, %v6132_v23  ;;  %v4545_v39 = vcombine.low %v11286_v27, %v11285_v30  ;;  %vm11287_vm8 = vcmask 949248   ;;  %6363 = vrot.lane.b32.xlu0 %v5037_v49, %s11288_s16 }
 0x3ee   :  { %v6630_v47 = vsel %vm11287_vm8, %v6627_v60, %v9657_v37  ;;  %v4357_v4 = vcombine.low %v4313_v28, %v4345_v16  ;;  %v9771_v19 = vrot.slane %v5225_v48, %v7347_v56  ;;  %v5038_v1 = vcombine.high %v4993_v52, %v5025_v41  ;;  %v11292_v37 = vld [vmem:[#allocation177_spill] sm:$0xff] }
 0x3ef   :  { %v6633_v31 = vsel %vm6631_vm10, %v6630_v47, %v5918_v43  ;;  %v5032_v2 = vrot.slane %v5018_v26, %v7366_v3  ;;  %v4306_v35 = vcombine.high %v9711_v6, %v9691_v58  ;;  %v4513_v21 = vcombine.low %v11290_v46, %v11289_v62  ;;  %v11293_v43 = vld [vmem:[#allocation148_spill] sm:$0xff]  ;;  %v9811_v26 = vpop.permute.xlu1 %5957 }
 0x3f0   :  { %v4529_v53 = vcombine.low %v11292_v37, %v11291_v18  ;;  %v6636_v25 = vsel %vm6634_vm11, %v6633_v31, %v5926_v32  ;;  %6173 = vrot.lane.b32.xlu1 %v4357_v4, %s11088_s21  ;;  %v5217_v17 = vrot.slane %v5209_v57, %v7347_v56  ;;  %v4497_v34 = vcombine.low %v11294_v54, %v11293_v43  ;;  %s11308_s21 = smov 116  }
 0x3f1   :  { %v6639_v36 = vsel %vm6637_vm14, %v6636_v25, %v5934_v40  ;;  %vm11295_vm7 = vcmask 392192   ;;  %v9789_v6 = vrot.slane %v4545_v39, %v7347_v56  ;;  %vm11296_vm9 = vcmask 1014784   ;;  %6371 = vrot.lane.b32.xlu0 %v5038_v1, %s11297_s18  ;;  %v6148_v40 = vpop.permute.xlu0 %6147 }
 0x3f2   :  { %v6692_v58 = vsel %vm11295_vm7, %v6690_v14, %v6140_v55  ;;  %v6642_v10 = vsel %vm11296_vm9, %v6639_v36, %v5942_v51  ;;  %v4358_v41 = vcombine.high %v4313_v28, %v4345_v16  ;;  %v4352_v32 = vrot.slane %v4338_v45, %v7366_v3 }
 0x3f3   :  { %v5185_v12 = vrot.slane %v5177_v13, %v7347_v56  ;;  %v5273_v29 = vcombine.low %v5217_v17, %v9771_v19  ;;  %vm11298_vm12 = vcmask 1031168   ;;  %v9800_v11 = vrot.slane %v4513_v21, %v7347_v56  ;;  %v9818_v60 = vpop.permute.xlu1 %5965 }
 0x3f4   :  { %v9797_v15 = vsel %vm11298_vm12, %v6642_v10, %v5950_v33  ;;  %v4537_v20 = vrot.slane %v4529_v53, %v7347_v56  ;;  %6181 = vrot.lane.b32.xlu1 %v4358_v41, %s11097_s17  ;;  %v4320_v61 = vrot.slane %v4306_v35, %v7366_v3  ;;  %v5039_v5 = vcombine.low %v5000_v42, %v5032_v2  ;;  %s11310_s17 = smov 118  }
 0x3f5   :  { %6773 = vst.msk [vmem:[#allocation5 + $0x20] sm:$0xff] %vm6502_vm15, %v9797_v15  ;;  %vm11299_vm8 = vcmask 408576   ;;  %v5241_v52 = vcombine.low %v5185_v12, %v9751_v22  ;;  %v4505_v13 = vrot.slane %v4497_v34, %v7347_v56  ;;  %v6156_v28 = vpop.permute.xlu0 %6155  ;;  %v5040_v23 = vcombine.high %v5000_v42, %v5032_v2 }
 0x3f6   :  { %v6694_v16 = vsel %vm11299_vm8, %v6692_v58, %v6148_v40  ;;  %v4593_v48 = vcombine.low %v4537_v20, %v9789_v6  ;;  %v4359_v24 = vcombine.low %v4320_v61, %v4352_v32  ;;  %6379 = vrot.lane.b32.xlu0 %v5039_v5, %s11300_s19  ;;  %v5281_v49 = vrot.slane %v5273_v29, %v7366_v3 }
 0x3f7   :  { %v4561_v50 = vcombine.low %v4505_v13, %v9800_v11  ;;  %vm11301_vm7 = vcmask 424960   ;;  %v4360_v14 = vcombine.high %v4320_v61, %v4352_v32  ;;  %v5249_v39 = vrot.slane %v5241_v52, %v7366_v3 }
 0x3f8   :  { %6189 = vrot.lane.b32.xlu1 %v4359_v24, %s11102_s8  ;;  %v6696_v57 = vsel %vm11301_vm7, %v6694_v16, %v6156_v28  ;;  %v4601_v45 = vrot.slane %v4593_v48, %v7366_v3  ;;  %v5226_v47 = vcombine.high %v11278_v38, %v11277_v63  ;;  %v5274_v51 = vcombine.high %v5217_v17, %v9771_v19  ;;  %v9837_v19 = vpop.permute.xlu1 %5973  ;;  %s11304_s8 = smov 112  }
 0x3f9   :  { %v4569_v42 = vrot.slane %v4561_v50, %v7366_v3  ;;  %v6164_v4 = vpop.permute.xlu0 %6163  ;;  %v5305_v31 = vcombine.low %v5249_v39, %v5281_v49  ;;  %v5194_v1 = vcombine.high %v11264_v8, %v11263_v9  ;;  %v5242_v2 = vcombine.high %v5185_v12, %v9751_v22 }
 0x3fa   :  { %6387 = vrot.lane.b32.xlu0 %v5040_v23, %s11302_s0  ;;  %v5210_v35 = vcombine.high %v11282_v59, %v11281_v44  ;;  %vm11303_vm9 = vcmask 441344   ;;  %v4546_v63 = vcombine.high %v11286_v27, %v11285_v30  ;;  %v4594_v38 = vcombine.high %v4537_v20, %v9789_v6 }
 0x3fb   :  { %v6698_v21 = vsel %vm11303_vm9, %v6696_v57, %v6164_v4  ;;  %v4625_v53 = vcombine.low %v4569_v42, %v4601_v45  ;;  %v5178_v9 = vcombine.high %v11276_v7, %v11275_v0  ;;  %v5240_v8 = vrot.slane %v5226_v47, %v7347_v56  ;;  %v11313_v47 = vld [vmem:[#allocation187_spill] sm:$0xff] }
 0x3fc   :  { %6197 = vrot.lane.b32.xlu1 %v4360_v14, %s11104_s5  ;;  %v5288_v22 = vrot.slane %v5274_v51, %v7366_v3  ;;  %v4514_v44 = vcombine.high %v11290_v46, %v11289_v62  ;;  %v4562_v59 = vcombine.high %v4505_v13, %v9800_v11  ;;  %v4530_v30 = vcombine.high %v11292_v37, %v11291_v18  ;;  %v9857_v34 = vpop.permute.xlu1 %5981  ;;  %s11314_s5 = smov 120  }
 0x3fd   :  { %v6172_v27 = vpop.permute.xlu0 %6171  ;;  %v5306_v25 = vcombine.high %v5249_v39, %v5281_v49  ;;  %v5208_v55 = vrot.slane %v5194_v1, %v7347_v56  ;;  %v5224_v0 = vrot.slane %v5210_v35, %v7347_v56  ;;  %vm11305_vm12 = vcmask 457728   ;;  %v11312_v39 = vld [vmem:[#allocation20_spill] sm:$0xff] }
 0x3fe   :  { %6395 = vrot.lane.b32.xlu0 %v5305_v31, %s11304_s8  ;;  %v6700_v7 = vsel %vm11305_vm12, %v6698_v21, %v6172_v27  ;;  %v5256_v17 = vrot.slane %v5242_v2, %v7366_v3  ;;  %v4498_v62 = vcombine.high %v11294_v54, %v11293_v43  ;;  %v4560_v46 = vrot.slane %v4546_v63, %v7347_v56  ;;  %v11315_v2 = vld [vmem:[#allocation162_spill] sm:$0xff]  ;;  %v11316_v35 = vld [vmem:[#allocation132_spill] sm:$0xff]  ;;  %v11321_v27 = vld [vmem:[#allocation117_spill] sm:$0xff] }
 0x3ff   :  { %v4626_v18 = vcombine.high %v4569_v42, %v4601_v45  ;;  %v4608_v37 = vrot.slane %v4594_v38, %v7366_v3  ;;  %v5192_v36 = vrot.slane %v5178_v9, %v7347_v56  ;;  %v5289_v58 = vcombine.low %v5224_v0, %v5240_v8  ;;  %v11317_v38 = vld [vmem:[#allocation201_spill] sm:$0xff] }
 0x400   :  { %6205 = vrot.lane.b32.xlu1 %v4625_v53, %s11106_s4  ;;  %v4528_v6 = vrot.slane %v4514_v44, %v7347_v56  ;;  %v4544_v10 = vrot.slane %v4530_v30, %v7347_v56  ;;  %v4576_v43 = vrot.slane %v4562_v59, %v7366_v3  ;;  %v5307_v33 = vcombine.low %v5256_v17, %v5288_v22  ;;  %v9868_v11 = vpop.permute.xlu1 %5989  ;;  %v11318_v53 = vld [vmem:[#allocation176_spill] sm:$0xff]  ;;  %v11320_v30 = vld [vmem:[#allocation147_spill] sm:$0xff] }
 0x401   :  { %v6180_v54 = vpop.permute.xlu0 %6179  ;;  %vm11307_vm8 = vcmask 474112   ;;  %v5257_v32 = vcombine.low %v5192_v36, %v5208_v55  ;;  %v4512_v12 = vrot.slane %v4498_v62, %v7347_v56  ;;  %v5308_v5 = vcombine.high %v5256_v17, %v5288_v22 }
 0x402   :  { %6403 = vrot.lane.b32.xlu0 %v5306_v25, %s11306_s20  ;;  %v6702_v41 = vsel %vm11307_vm8, %v6700_v7, %v6180_v54  ;;  %v4609_v29 = vcombine.low %v4544_v10, %v4560_v46  ;;  %v4627_v20 = vcombine.low %v4576_v43, %v4608_v37  ;;  %v5297_v16 = vrot.slane %v5289_v58, %v7366_v3 }
 0x403   :  { %v4577_v61 = vcombine.low %v4512_v12, %v4528_v6  ;;  %vm11309_vm7 = vcmask 490496   ;;  %v4628_v48 = vcombine.high %v4576_v43, %v4608_v37  ;;  %v5265_v50 = vrot.slane %v5257_v32, %v7366_v3 }
 0x404   :  { %6213 = vrot.lane.b32.xlu1 %v4626_v18, %s11108_s6  ;;  %v9874_v13 = vpop.permute.xlu1 %5997  ;;  %v4617_v24 = vrot.slane %v4609_v29, %v7366_v3  ;;  %v5290_v28 = vcombine.high %v5224_v0, %v5240_v8  ;;  %v5258_v14 = vcombine.high %v5192_v36, %v5208_v55  ;;  %vm11311_vm9 = vcmask 506880   ;;  %s11322_s6 = smov 122  }
 0x405   :  { %v6188_v40 = vpop.permute.xlu0 %6187  ;;  %v4585_v23 = vrot.slane %v4577_v61, %v7366_v3  ;;  %v5309_v57 = vcombine.low %v5265_v50, %v5297_v16  ;;  %v4817_v51 = vcombine.low %v11313_v47, %v11312_v39  ;;  %v4610_v42 = vcombine.high %v4544_v10, %v4560_v46 }
 0x406   :  { %6411 = vrot.lane.b32.xlu0 %v5307_v33, %s11308_s21  ;;  %v6704_v52 = vsel %vm11309_vm7, %v6702_v41, %v6188_v40  ;;  %v5304_v1 = vrot.slane %v5290_v28, %v7366_v3  ;;  %v4785_v21 = vcombine.low %v11316_v35, %v11315_v2  ;;  %v4578_v63 = vcombine.high %v4512_v12, %v4528_v6  ;;  %v11328_v28 = vld [vmem:[#allocation58_spill] sm:$0xff] }
 0x407   :  { %v4629_v31 = vcombine.low %v4585_v23, %v4617_v24  ;;  %v4801_v9 = vcombine.low %v11318_v53, %v11317_v38  ;;  %v5310_v22 = vcombine.high %v5265_v50, %v5297_v16  ;;  %vm11319_vm12 = vcmask 523264  }
 0x408   :  { %6221 = vrot.lane.b32.xlu1 %v4627_v20, %s11110_s7  ;;  %v9884_v4 = vpop.permute.xlu1 %6005  ;;  %v5272_v59 = vrot.slane %v5258_v14, %v7366_v3  ;;  %v4769_v25 = vcombine.low %v11321_v27, %v11320_v30  ;;  %v4825_v55 = vrot.slane %v4817_v51, %v7347_v56  ;;  %v4630_v7 = vcombine.high %v4585_v23, %v4617_v24  ;;  %s11324_s7 = smov 124  }
 0x409   :  { %v6196_v49 = vpop.permute.xlu0 %6195  ;;  %v4624_v17 = vrot.slane %v4610_v42, %v7366_v3  ;;  %v4793_v62 = vrot.slane %v4785_v21, %v7347_v56  ;;  %v4809_v46 = vrot.slane %v4801_v9, %v7347_v56  ;;  %v4592_v18 = vrot.slane %v4578_v63, %v7366_v3 }
 0x40a   :  { %6419 = vrot.lane.b32.xlu0 %v5308_v5, %s11310_s17  ;;  %v6706_v45 = vsel %vm11311_vm9, %v6704_v52, %v6196_v49  ;;  %v5311_v36 = vcombine.low %v5272_v59, %v5304_v1  ;;  %vm11323_vm8 = vcmask 539648   ;;  %v4777_v6 = vrot.slane %v4769_v25, %v7347_v56 }
 0x40b   :  { %v4865_v10 = vcombine.low %v4809_v46, %v4825_v55  ;;  %v4631_v54 = vcombine.low %v4592_v18, %v4624_v17  ;;  %v5312_v32 = vcombine.high %v5272_v59, %v5304_v1  ;;  %vm11325_vm7 = vcmask 556032  }
 0x40c   :  { %6229 = vrot.lane.b32.xlu1 %v4628_v48, %s11112_s9  ;;  %v9898_v0 = vpop.permute.xlu1 %6013  ;;  %v4833_v33 = vcombine.low %v4777_v6, %v4793_v62  ;;  %v4632_v20 = vcombine.high %v4592_v18, %v4624_v17  ;;  %s11326_s9 = smov 126   ;;  %vm11327_vm9 = vcmask 572416   ;;  %v4818_v52 = vcombine.high %v11313_v47, %v11312_v39  ;;  %v11334_v18 = vld [vmem:[#allocation188_spill] sm:$0xff] }
 0x40d   :  { %v6204_v8 = vpop.permute.xlu0 %6203  ;;  %v4873_v61 = vrot.slane %v4865_v10, %v7366_v3  ;;  %v4866_v48 = vcombine.high %v4809_v46, %v4825_v55  ;;  %v4786_v23 = vcombine.high %v11316_v35, %v11315_v2  ;;  %v4834_v49 = vcombine.high %v4777_v6, %v4793_v62  ;;  %v11333_v46 = vld [vmem:[#allocation32_spill] sm:$0xff]  ;;  %v11335_v10 = vld [vmem:[#allocation165_spill] sm:$0xff] }
 0x40e   :  { %6427 = vrot.lane.b32.xlu0 %v5309_v57, %s11314_s5  ;;  %v6708_v44 = vsel %vm11319_vm12, %v6706_v45, %v6204_v8  ;;  %v4841_v40 = vrot.slane %v4833_v33, %v7366_v3  ;;  %v4802_v57 = vcombine.high %v11318_v53, %v11317_v38  ;;  %vm11329_vm12 = vcmask 588800  }
 0x40f   :  { %v4770_v39 = vcombine.high %v11321_v27, %v11320_v30  ;;  %v4832_v47 = vrot.slane %v4818_v52, %v7347_v56  ;;  %v4800_v1 = vrot.slane %v4786_v23, %v7347_v56  ;;  %v4848_v35 = vrot.slane %v4834_v49, %v7366_v3  ;;  %v11342_v49 = vld [vmem:[#allocation210_spill] sm:$0xff] }
 0x410   :  { %6237 = vrot.lane.b32.xlu1 %v4629_v31, %s11123_s10  ;;  %v9908_v43 = vpop.permute.xlu1 %6021  ;;  %v4897_v50 = vcombine.low %v4841_v40, %v4873_v61  ;;  %v4898_v42 = vcombine.high %v4841_v40, %v4873_v61  ;;  %v4880_v31 = vrot.slane %v4866_v48, %v7366_v3  ;;  %v4816_v2 = vrot.slane %v4802_v57, %v7347_v56  ;;  %v11340_v40 = vld [vmem:[#allocation150_spill] sm:$0xff]  ;;  %v11343_v57 = vld [vmem:[#allocation211_spill] sm:$0xff] }
 0x411   :  { %v6212_v37 = vpop.permute.xlu0 %6211  ;;  %v4784_v38 = vrot.slane %v4770_v39, %v7347_v56 }
 0x412   :  { %6435 = vrot.lane.b32.xlu0 %v5310_v22, %s11322_s6  ;;  %v6710_v58 = vsel %vm11323_vm8, %v6708_v44, %v6212_v37  ;;  %vm11330_vm8 = vcmask 605184   ;;  %v4881_v53 = vcombine.low %v4816_v2, %v4832_v47  ;;  %v4899_v8 = vcombine.low %v4848_v35, %v4880_v31 }
 0x413   :  { %v4849_v22 = vcombine.low %v4784_v38, %v4800_v1  ;;  %v4900_v27 = vcombine.high %v4848_v35, %v4880_v31  ;;  %v4882_v62 = vcombine.high %v4816_v2, %v4832_v47  ;;  %v5089_v37 = vcombine.low %v11334_v18, %v11333_v46 }
 0x414   :  { %6245 = vrot.lane.b32.xlu1 %v4630_v7, %s11134_s11  ;;  %v9913_v29 = vpop.permute.xlu1 %6029  ;;  %v4889_v25 = vrot.slane %v4881_v53, %v7366_v3  ;;  %v4850_v6 = vcombine.high %v4784_v38, %v4800_v1 }
 0x415   :  { %v6220_v41 = vpop.permute.xlu0 %6219  ;;  %v4857_v55 = vrot.slane %v4849_v22, %v7366_v3  ;;  %v5097_v52 = vrot.slane %v5089_v37, %v7347_v56  ;;  %v4896_v23 = vrot.slane %v4882_v62, %v7366_v3 }
 0x416   :  { %6443 = vrot.lane.b32.xlu0 %v5311_v36, %s11324_s7  ;;  %v6712_v12 = vsel %vm11325_vm7, %v6710_v58, %v6220_v41  ;;  %vm11331_vm7 = vcmask 621568   ;;  %v11337_v41 = vld [vmem:[#allocation196_spill] sm:$0xff]  ;;  %v4864_v31 = vrot.slane %v4850_v6, %v7366_v3 }
 0x417   :  { %v4901_v58 = vcombine.low %v4857_v55, %v4889_v25 }
 0x418   :  { %6253 = vrot.lane.b32.xlu1 %v4631_v54, %s7022_s29  ;;  %v9922_v24 = vpop.permute.xlu1 %6037  ;;  %v11336_v54 = vld [vmem:[#allocation135_spill] sm:$0xff]  ;;  %v4903_v53 = vcombine.low %v4864_v31, %v4896_v23  ;;  %s7048_s29 = smov [#allocation5]  }
 0x419   :  { %v6228_v5 = vpop.permute.xlu0 %6227  ;;  %v5057_v33 = vcombine.low %v11336_v54, %v11335_v10 }
 0x41a   :  { %6451 = vrot.lane.b32.xlu0 %v5312_v32, %s11326_s9  ;;  %v6714_v16 = vsel %vm11327_vm9, %v6712_v12, %v6228_v5  ;;  %vm11332_vm9 = vcmask 637952   ;;  %v11338_v32 = vld [vmem:[#allocation179_spill] sm:$0xff]  ;;  %v11341_v5 = vld [vmem:[#allocation120_spill] sm:$0xff] }
 0x41b   :  { %v5073_v12 = vcombine.low %v11338_v32, %v11337_v41  ;;  %v5065_v39 = vrot.slane %v5057_v33, %v7347_v56  ;;  %v5074_v33 = vcombine.high %v11338_v32, %v11337_v41 }
 0x41c   :  { %6261 = vrot.lane.b32.xlu1 %v4632_v20, %s7023_s30  ;;  %v9935_v51 = vpop.permute.xlu1 %6045  ;;  %s6852_s30 = sshll.u32 %s7048_s29, 4  ;;  %s6853_s30 = int_to_ptr.vmem [resolvable:$true] %s6852_s30 }
 0x41d   :  { %v6236_v14 = vpop.permute.xlu0 %6235  ;;  %v5081_v47 = vrot.slane %v5073_v12, %v7347_v56  ;;  %v5088_v32 = vrot.slane %v5074_v33, %v7347_v56  ;;  %p6960_p9 = scmp.lt.s32.totalorder %s6853_s30, %s6853_s30 }
 0x41e   :  { %6788 = vrot.lane.b32.xlu0 %v11328_v28, %s11106_s4  ;;  %v6716_v45 = vsel %vm11329_vm12, %v6714_v16, %v6236_v14  ;;  %vm11339_vm12 = vcmask 654336   ;;  %v5041_v16 = vcombine.low %v11341_v5, %v11340_v40  ;;  %v11344_v14 = vcombine.low %v11342_v49, %v11343_v57 }
 0x420   :  { %6269 = vrot.lane.b32.xlu1 %v4897_v50, %s7024_s2  ;;  %v9944_v9 = vpop.permute.xlu1 %6053  ;;  %v4902_v50 = vcombine.high %v4857_v55, %v4889_v25  ;;  %s6955_s2 = scalar_lea.vmem %s6853_s30, 1024 }
 0x421   :  { %v6244_v21 = vpop.permute.xlu0 %6243  ;;  %p6956_p8 = scmp.ne.s32.totalorder %s6853_s30, %s6955_s2  ;;  %p6961_p10 = scmp.lt.s32.totalorder %s6955_s2, %s6955_s2 }
 0x422   :  { %v6718_v63 = vsel %vm11330_vm8, %v6716_v45, %v6244_v21  ;;  %v6647_v45 = vsel %vm6457_vm0, %v11344_v14, %v9811_v26  ;;  %vm11345_vm8 = vcmask 670720   ;;  %v5049_v26 = vrot.slane %v5041_v16, %v7347_v56 }
 0x423   :  { %v5137_v21 = vcombine.low %v5081_v47, %v5097_v52  ;;  %vm11346_vm0 = vcmask 130048   ;;  %p6962_p11 = por %p6961_p10, %p6960_p9 }
 0x424   :  { %6277 = vrot.lane.b32.xlu1 %v4898_v42, %s7025_s3  ;;  %v6062_v30 = vpop.permute.xlu1 %6061  ;;  %v6649_v42 = vsel %vm6460_vm1, %v6647_v45, %v9818_v60  ;;  %vm11347_vm1 = vcmask 146432   ;;  %v5106_v6 = vcombine.high %v5049_v26, %v5065_v39 }
 0x425   :  { %v6252_v44 = vpop.permute.xlu0 %6251  ;;  %v6651_v2 = vsel %vm6463_vm2, %v6649_v42, %v9837_v19  ;;  %v5145_v25 = vrot.slane %v5137_v21, %v7366_v3  ;;  %vm11348_vm2 = vcmask 162816   ;;  %p6963_p12 = pnand %p6962_p11, %p6956_p8 }
 0x426   :  { %v6720_v59 = vsel %vm11331_vm7, %v6718_v63, %v6252_v44  ;;  %v6653_v63 = vsel %vm6466_vm3, %v6651_v2, %v9857_v34  ;;  %vm11349_vm3 = vcmask 179200   ;;  %vm11353_vm7 = vcmask 244736   ;;  %v11360_v2 = vld [vmem:[#allocation31_spill] sm:$0xff] }
 0x427   :  { %v6655_v60 = vsel %vm6469_vm4, %v6653_v63, %v9868_v11  ;;  %vm11350_vm4 = vcmask 195584  }
 0x428   :  { %6285 = vrot.lane.b32.xlu1 %v4899_v8, %s11172_s12  ;;  %v6070_v36 = vpop.permute.xlu1 %6069  ;;  %v5105_v8 = vcombine.low %v5049_v26, %v5065_v39  ;;  %v6657_v22 = vsel %vm6472_vm5, %v6655_v60, %v9874_v13  ;;  %vm11351_vm5 = vcmask 211968   ;;  %v11361_v26 = vld [vmem:[#allocation189_spill] sm:$0xff] }
 0x429   :  { %v6260_v7 = vpop.permute.xlu0 %6259  ;;  %v6659_v44 = vsel %vm6475_vm6, %v6657_v22, %v9884_v4  ;;  %vm11352_vm6 = vcmask 228352   ;;  %v5361_v21 = vcombine.low %v11361_v26, %v11360_v2  ;;  %v11364_v22 = vld [vmem:[#allocation134_spill] sm:$0xff] }
 0x42a   :  { %v6722_v17 = vsel %vm11332_vm9, %v6720_v59, %v6260_v7  ;;  %v6661_v59 = vsel %vm11346_vm0, %v6659_v44, %v9898_v0  ;;  %v5113_v55 = vrot.slane %v5105_v8, %v7366_v3  ;;  %v5090_v0 = vcombine.high %v11334_v18, %v11333_v46  ;;  %v11363_v8 = vld [vmem:[#allocation164_spill] sm:$0xff] }
 0x42b   :  { %v6663_v11 = vsel %vm11347_vm1, %v6661_v59, %v9908_v43  ;;  %vm11354_vm9 = vcmask 277504   ;;  %vm11357_vm0 = vcmask 326656   ;;  %vm11358_vm1 = vcmask 343040  }
 0x42c   :  { %6293 = vrot.lane.b32.xlu1 %v4900_v27, %s11186_s22  ;;  %v6078_v48 = vpop.permute.xlu1 %6077  ;;  %v4904_v27 = vcombine.high %v4864_v31, %v4896_v23  ;;  %v6665_v13 = vsel %vm11348_vm2, %v6663_v11, %v9913_v29  ;;  %v5169_v37 = vcombine.low %v5113_v55, %v5145_v25  ;;  %vm11359_vm2 = vcmask 359424  }
 0x42d   :  { %v6268_v20 = vpop.permute.xlu0 %6267  ;;  %v6667_v4 = vsel %vm11349_vm3, %v6665_v13, %v9922_v24  ;;  %vm11362_vm3 = vcmask 375808   ;;  %v5329_v44 = vcombine.low %v11364_v22, %v11363_v8  ;;  %v11367_v13 = vld [vmem:[#allocation149_spill] sm:$0xff] }
 0x42e   :  { %v6724_v61 = vsel %vm11339_vm12, %v6722_v17, %v6268_v20  ;;  %v5138_v17 = vcombine.high %v5081_v47, %v5097_v52  ;;  %v6669_v62 = vsel %vm11350_vm4, %v6667_v4, %v9935_v51  ;;  %v5042_v51 = vcombine.high %v11341_v5, %v11340_v40 }
 0x42f   :  { %v6671_v29 = vsel %vm11351_vm5, %v6669_v62, %v9944_v9  ;;  %v5104_v9 = vrot.slane %v5090_v0, %v7347_v56  ;;  %vm11355_vm12 = vcmask 293888   ;;  %v5369_v0 = vrot.slane %v5361_v21, %v7347_v56 }
 0x430   :  { %6301 = vrot.lane.b32.xlu1 %v4901_v58, %s11195_s13  ;;  %v6086_v38 = vpop.permute.xlu1 %6085  ;;  %v5058_v58 = vcombine.high %v11336_v54, %v11335_v10  ;;  %v6673_v24 = vsel %vm11352_vm6, %v6671_v29, %v6062_v30  ;;  %v5170_v54 = vcombine.high %v5113_v55, %v5145_v25  ;;  %v5152_v20 = vrot.slane %v5138_v17, %v7366_v3  ;;  %v11368_v55 = vld [vmem:[#allocation119_spill] sm:$0xff] }
 0x431   :  { %v6276_v1 = vpop.permute.xlu0 %6275  ;;  %v6675_v18 = vsel %vm11353_vm7, %v6673_v24, %v6070_v36  ;;  %v5120_v36 = vrot.slane %v5106_v6, %v7366_v3  ;;  %v5056_v16 = vrot.slane %v5042_v51, %v7347_v56  ;;  %v5153_v52 = vcombine.low %v5088_v32, %v5104_v9 }
 0x432   :  { %v9978_v35 = vsel %vm11345_vm8, %v6724_v61, %v6276_v1  ;;  %v6677_v12 = vsel %vm6502_vm15, %v6675_v18, %v6078_v48  ;;  %v5072_v30 = vrot.slane %v5058_v58, %v7347_v56  ;;  %vm11356_vm8 = vcmask 310272  }
 0x433   :  { %v6679_v41 = vsel %vm11354_vm9, %v6677_v12, %v6086_v38  ;;  %v5171_v23 = vcombine.low %v5120_v36, %v5152_v20  ;;  %v5172_v39 = vcombine.high %v5120_v36, %v5152_v20  ;;  %v5161_v47 = vrot.slane %v5153_v52, %v7366_v3 }
 0x434   :  { %6309 = vrot.lane.b32.xlu1 %v4902_v50, %s11209_s23  ;;  %v6094_v34 = vpop.permute.xlu1 %6093  ;;  %v5121_v57 = vcombine.low %v5056_v16, %v5072_v30  ;;  %v5154_v63 = vcombine.high %v5088_v32, %v5104_v9  ;;  %v5122_v59 = vcombine.high %v5056_v16, %v5072_v30  ;;  %v5313_v4 = vcombine.low %v11368_v55, %v11367_v13 }
 0x435   :  { %v9988_v19 = vpop.permute.xlu0 %6283  ;;  %v6681_v61 = vsel %vm11355_vm12, %v6679_v41, %v6094_v34  ;;  %v11365_v34 = vld [vmem:[#allocation204_spill] sm:$0xff]  ;;  %vm11369_vm4 = vcmask 392192   ;;  %v5337_v29 = vrot.slane %v5329_v44, %v7347_v56  ;;  %vm11370_vm5 = vcmask 408576  }
 0x436   :  { %v5129_v31 = vrot.slane %v5121_v57, %v7366_v3  ;;  %v5136_v6 = vrot.slane %v5122_v59, %v7366_v3  ;;  %v5321_v24 = vrot.slane %v5313_v4, %v7347_v56  ;;  %vm11371_vm6 = vcmask 424960  }
 0x437   :  { %vm11372_vm7 = vcmask 441344   ;;  %vm11373_vm9 = vcmask 457728   ;;  %vm11374_vm12 = vcmask 474112  }
 0x438   :  { %6317 = vrot.lane.b32.xlu1 %v4903_v53, %s11214_s24  ;;  %v6102_v43 = vpop.permute.xlu1 %6101  ;;  %v5173_v53 = vcombine.low %v5129_v31, %v5161_v47  ;;  %v5174_v62 = vcombine.high %v5129_v31, %v5161_v47 }
 0x439   :  { %v10001_v7 = vpop.permute.xlu0 %6291  ;;  %v6683_v5 = vsel %vm11356_vm8, %v6681_v61, %v6102_v43  ;;  %v5168_v43 = vrot.slane %v5154_v63, %v7366_v3  ;;  %vm11375_vm8 = vcmask 490496  }
 0x43b   :  { %v5175_v9 = vcombine.low %v5136_v6, %v5168_v43  ;;  %v5176_v41 = vcombine.high %v5136_v6, %v5168_v43 }
 0x43c   :  { %6325 = vrot.lane.b32.xlu1 %v4904_v27, %s11228_s25  ;;  %v6110_v10 = vpop.permute.xlu1 %6109  ;;  %v11366_v27 = vld [vmem:[#allocation178_spill] sm:$0xff] }
 0x43d   :  { %v10017_v46 = vpop.permute.xlu0 %6299  ;;  %v6685_v48 = vsel %vm11357_vm0, %v6683_v5, %v6110_v10  ;;  %v5345_v25 = vcombine.low %v11366_v27, %v11365_v34  ;;  %v5377_v10 = vcombine.low %v5321_v24, %v5337_v29  ;;  %v5362_v5 = vcombine.high %v11361_v26, %v11360_v2 }
 0x43e   :  { %v5346_v57 = vcombine.high %v11366_v27, %v11365_v34  ;;  %vm11376_vm0 = vcmask 506880  }
 0x43f   :  { %v5353_v58 = vrot.slane %v5345_v25, %v7347_v56  ;;  %v5385_v61 = vrot.slane %v5377_v10, %v7366_v3  ;;  %v5376_v47 = vrot.slane %v5362_v5, %v7347_v56 }
 0x440   :  { %6333 = vrot.lane.b32.xlu1 %v5169_v37, %s11241_s26  ;;  %v6118_v50 = vpop.permute.xlu1 %6117  ;;  %v5360_v63 = vrot.slane %v5346_v57, %v7347_v56 }
 0x441   :  { %v10031_v40 = vpop.permute.xlu0 %6307  ;;  %v6687_v49 = vsel %vm11358_vm1, %v6685_v48, %v6118_v50  ;;  %v5409_v51 = vcombine.low %v5353_v58, %v5369_v0  ;;  %v5410_v16 = vcombine.high %v5353_v58, %v5369_v0  ;;  %vm11377_vm1 = vcmask 523264  }
 0x443   :  { %v5417_v30 = vrot.slane %v5409_v51, %v7366_v3  ;;  %v5424_v2 = vrot.slane %v5410_v16, %v7366_v3 }
 0x444   :  { %6341 = vrot.lane.b32.xlu1 %v5170_v54, %s11252_s27  ;;  %v6126_v45 = vpop.permute.xlu1 %6125 }
 0x445   :  { %v10038_v14 = vpop.permute.xlu0 %6315  ;;  %v6689_v42 = vsel %vm11359_vm2, %v6687_v49, %v6126_v45  ;;  %v5441_v48 = vcombine.low %v5385_v61, %v5417_v30  ;;  %v5378_v49 = vcombine.high %v5321_v24, %v5337_v29  ;;  %v5442_v31 = vcombine.high %v5385_v61, %v5417_v30 }
 0x446   :  { %vm11378_vm2 = vcmask 539648  }
 0x448   :  { %6349 = vrot.lane.b32.xlu1 %v5171_v23, %s11262_s28  ;;  %v6134_v38 = vpop.permute.xlu1 %6133  ;;  %v5330_v23 = vcombine.high %v11364_v22, %v11363_v8  ;;  %v5425_v8 = vcombine.low %v5360_v63, %v5376_v47 }
 0x449   :  { %v10044_v1 = vpop.permute.xlu0 %6323  ;;  %v6691_v60 = vsel %vm11362_vm3, %v6689_v42, %v6134_v38  ;;  %v5392_v38 = vrot.slane %v5378_v49, %v7366_v3  ;;  %vm11379_vm3 = vcmask 687104  }
 0x44a   :  { %v5344_v21 = vrot.slane %v5330_v23, %v7347_v56  ;;  %v6728_v30 = vsel %vm11379_vm3, %v9978_v35, %v9988_v19  ;;  %vm11390_vm3 = vcmask 850944  }
 0x44b   :  { %v5443_v44 = vcombine.low %v5392_v38, %v5424_v2 }
 0x44c   :  { %6357 = vrot.lane.b32.xlu1 %v5172_v39, %s11274_s14  ;;  %v5314_v39 = vcombine.high %v11368_v55, %v11367_v13  ;;  %v5444_v13 = vcombine.high %v5392_v38, %v5424_v2  ;;  %v5433_v55 = vrot.slane %v5425_v8, %v7366_v3 }
 0x44d   :  { %v10054_v11 = vpop.permute.xlu0 %6331  ;;  %v6142_v17 = vpop.permute.xlu1 %6141 }
 0x44e   :  { %v6693_v37 = vsel %vm11369_vm4, %v6691_v60, %v6142_v17  ;;  %v5328_v60 = vrot.slane %v5314_v39, %v7347_v56  ;;  %v5426_v17 = vcombine.high %v5360_v63, %v5376_v47  ;;  %vm11380_vm4 = vcmask 703488  }
 0x44f   :  { %v6730_v61 = vsel %vm11380_vm4, %v6728_v30, %v10001_v7  ;;  %vm11391_vm4 = vcmask 867328  }
 0x450   :  { %6365 = vrot.lane.b32.xlu1 %v5173_v53, %s11288_s16  ;;  %v5393_v34 = vcombine.low %v5328_v60, %v5344_v21  ;;  %v5394_v29 = vcombine.high %v5328_v60, %v5344_v21  ;;  %v5440_v51 = vrot.slane %v5426_v17, %v7366_v3 }
 0x451   :  { %v10065_v33 = vpop.permute.xlu0 %6339  ;;  %v6150_v18 = vpop.permute.xlu1 %6149 }
 0x452   :  { %v6695_v12 = vsel %vm11370_vm5, %v6693_v37, %v6150_v18  ;;  %v5401_v0 = vrot.slane %v5393_v34, %v7366_v3  ;;  %vm11381_vm5 = vcmask 719872  }
 0x453   :  { %v6732_v5 = vsel %vm11381_vm5, %v6730_v61, %v10017_v46  ;;  %vm11392_vm5 = vcmask 588800  }
 0x454   :  { %6373 = vrot.lane.b32.xlu1 %v5174_v62, %s11297_s18  ;;  %v5445_v43 = vcombine.low %v5401_v0, %v5433_v55  ;;  %v5446_v24 = vcombine.high %v5401_v0, %v5433_v55 }
 0x455   :  { %v10070_v54 = vpop.permute.xlu0 %6347 }
 0x458   :  { %6381 = vrot.lane.b32.xlu1 %v5175_v9, %s11300_s19  ;;  %v6158_v20 = vpop.permute.xlu1 %6157  ;;  %v5408_v9 = vrot.slane %v5394_v29, %v7366_v3 }
 0x459   :  { %v6697_v32 = vsel %vm11371_vm6, %v6695_v12, %v6158_v20  ;;  %v10076_v36 = vpop.permute.xlu0 %6355  ;;  %vm11382_vm6 = vcmask 736256  }
 0x45a   :  { %v5447_v20 = vcombine.low %v5408_v9, %v5440_v51  ;;  %v5448_v3 = vcombine.high %v5408_v9, %v5440_v51 }
 0x45c   :  { %6389 = vrot.lane.b32.xlu1 %v5176_v41, %s11302_s0  ;;  %v6166_v52 = vpop.permute.xlu1 %6165 }
 0x45d   :  { %v6699_v50 = vsel %vm11372_vm7, %v6697_v32, %v6166_v52  ;;  %v6734_v52 = vsel %vm11382_vm6, %v6732_v5, %v10031_v40  ;;  %vm11383_vm7 = vcmask 556032   ;;  %vm11393_vm6 = vcmask 883712  }
 0x45f   :  { %v10086_v45 = vpop.permute.xlu0 %6363 }
 0x460   :  { %6397 = vrot.lane.b32.xlu1 %v5441_v48, %s11304_s8 }
 0x462   :  { %v6174_v42 = vpop.permute.xlu1 %6173 }
 0x463   :  { %v6701_v26 = vsel %vm11373_vm9, %v6699_v50, %v6174_v42  ;;  %v6372_v53 = vpop.permute.xlu0 %6371  ;;  %v6736_v50 = vsel %vm6592_vm13, %v6734_v52, %v10038_v14  ;;  %vm11384_vm9 = vcmask 769024  }
 0x464   :  { %6405 = vrot.lane.b32.xlu1 %v5442_v31, %s11306_s20  ;;  %v6738_v19 = vsel %vm11384_vm9, %v6736_v50, %v10044_v1  ;;  %vm11395_vm9 = vcmask 916480  }
 0x466   :  { %v6182_v22 = vpop.permute.xlu1 %6181 }
 0x467   :  { %v6703_v59 = vsel %vm11374_vm12, %v6701_v26, %v6182_v22  ;;  %vm11385_vm12 = vcmask 785408  }
 0x468   :  { %6413 = vrot.lane.b32.xlu1 %v5443_v44, %s11308_s21  ;;  %v6380_v27 = vpop.permute.xlu0 %6379  ;;  %v6740_v7 = vsel %vm11385_vm12, %v6738_v19, %v10054_v11  ;;  %vm11396_vm12 = vcmask 932864  }
 0x46a   :  { %v6190_v25 = vpop.permute.xlu1 %6189 }
 0x46b   :  { %v6705_v4 = vsel %vm11375_vm8, %v6703_v59, %v6190_v25  ;;  %vm11386_vm8 = vcmask 801792  }
 0x46c   :  { %6421 = vrot.lane.b32.xlu1 %v5444_v13, %s11310_s17  ;;  %v6388_v56 = vpop.permute.xlu0 %6387  ;;  %v6742_v23 = vsel %vm11386_vm8, %v6740_v7, %v10065_v33  ;;  %vm11397_vm8 = vcmask 605184  }
 0x46e   :  { %v6198_v62 = vpop.permute.xlu1 %6197 }
 0x46f   :  { %v6707_v37 = vsel %vm11376_vm0, %v6705_v4, %v6198_v62  ;;  %vm11387_vm0 = vcmask 572416  }
 0x470   :  { %6429 = vrot.lane.b32.xlu1 %v5445_v43, %s11314_s5  ;;  %v6396_v58 = vpop.permute.xlu0 %6395 }
 0x472   :  { %v6206_v6 = vpop.permute.xlu1 %6205 }
 0x473   :  { %v6709_v18 = vsel %vm11377_vm1, %v6707_v37, %v6206_v6  ;;  %vm11388_vm1 = vcmask 818176  }
 0x474   :  { %6437 = vrot.lane.b32.xlu1 %v5446_v24, %s11322_s6  ;;  %v6404_v12 = vpop.permute.xlu0 %6403  ;;  %v6744_v49 = vsel %vm11388_vm1, %v6742_v23, %v10070_v54  ;;  %vm11399_vm1 = vcmask 621568  }
 0x476   :  { %v6214_v10 = vpop.permute.xlu1 %6213 }
 0x477   :  { %v6711_v41 = vsel %vm11378_vm2, %v6709_v18, %v6214_v10  ;;  %vm11389_vm2 = vcmask 834560  }
 0x478   :  { %6445 = vrot.lane.b32.xlu1 %v5447_v20, %s11324_s7  ;;  %v6412_v32 = vpop.permute.xlu0 %6411  ;;  %v6746_v57 = vsel %vm11389_vm2, %v6744_v49, %v10076_v36  ;;  %vm11400_vm2 = vcmask 1014784  }
 0x479   :  { %v6748_v1 = vsel %vm11390_vm3, %v6746_v57, %v10086_v45  ;;  %vm11401_vm3 = vcmask 1031168  }
 0x47a   :  { %v6222_v16 = vpop.permute.xlu1 %6221  ;;  %v6750_v39 = vsel %vm11391_vm4, %v6748_v1, %v6372_v53  ;;  %vm11402_vm4 = vcmask 637952  }
 0x47b   :  { %v6713_v48 = vsel %vm11383_vm7, %v6711_v41, %v6222_v16  ;;  %v6752_v47 = vsel %vm11393_vm6, %v6750_v39, %v6380_v27  ;;  %vm11394_vm7 = vcmask 900096   ;;  %vm11404_vm6 = vcmask 670720  }
 0x47c   :  { %6453 = vrot.lane.b32.xlu1 %v5448_v3, %s11326_s9  ;;  %v6420_v35 = vpop.permute.xlu0 %6419  ;;  %v6754_v54 = vsel %vm11394_vm7, %v6752_v47, %v6388_v56  ;;  %vm11405_vm7 = vcmask 687104  }
 0x47d   :  { %v6756_v31 = vsel %vm11395_vm9, %v6754_v54, %v6396_v58  ;;  %vm11406_vm9 = vcmask 703488  }
 0x47e   :  { %v6230_v46 = vpop.permute.xlu1 %6229  ;;  %v6758_v26 = vsel %vm11396_vm12, %v6756_v31, %v6404_v12  ;;  %vm11407_vm12 = vcmask 719872  }
 0x47f   :  { %v6715_v40 = vsel %vm11387_vm0, %v6713_v48, %v6230_v46  ;;  %vm11398_vm0 = vcmask 949248  }
 0x480   :  { %6790 = vrot.lane.b32.xlu1 %v9797_v15, %s11106_s4  ;;  %v6428_v14 = vpop.permute.xlu0 %6427  ;;  %v6760_v21 = vsel %vm11398_vm0, %v6758_v26, %v6412_v32  ;;  %vm11409_vm0 = vcmask 769024  }
 0x481   :  { %v6762_v63 = vsel %vm6631_vm10, %v6760_v21, %v6420_v35 }
 0x482   :  { %v6238_v11 = vpop.permute.xlu1 %6237  ;;  %v6764_v38 = vsel %vm6634_vm11, %v6762_v63, %v6428_v14 }
 0x483   :  { %v6717_v33 = vsel %vm11392_vm5, %v6715_v40, %v6238_v11  ;;  %vm11403_vm5 = vcmask 654336  }
 0x484   :  { %v6436_v42 = vpop.permute.xlu0 %6435 }
 0x485   :  { %v6766_v60 = vsel %vm6637_vm14, %v6764_v38, %v6436_v42 }
 0x486   :  { %v6246_v2 = vpop.permute.xlu1 %6245 }
 0x487   :  { %v6719_v36 = vsel %vm11397_vm8, %v6717_v33, %v6246_v2  ;;  %vm11408_vm8 = vcmask 736256  }
 0x488   :  { %v6444_v45 = vpop.permute.xlu0 %6443 }
 0x489   :  { %v6768_v22 = vsel %vm11400_vm2, %v6766_v60, %v6444_v45  ;;  %vm11411_vm2 = vcmask 801792  }
 0x48a   :  { %v6254_v53 = vpop.permute.xlu1 %6253 }
 0x48b   :  { %v6721_v8 = vsel %vm11399_vm1, %v6719_v36, %v6254_v53  ;;  %vm11410_vm1 = vcmask 785408  }
 0x48c   :  { %v6452_v44 = vpop.permute.xlu0 %6451 }
 0x48d   :  { %v10154_v59 = vsel %vm11401_vm3, %v6768_v22, %v6452_v44  ;;  %vm11412_vm3 = vcmask 818176  }
 0x48e   :  { %v6262_v34 = vpop.permute.xlu1 %6261  ;;  %6811 = vst.msk [vmem:[#allocation5 + $0x10] sm:$0xff] %vm6502_vm15, %v10154_v59  ;;  %6825 = vrot.lane.b32.xlu0 %v10154_v59, %s11106_s4 }
 0x48f   :  { %v6723_v27 = vsel %vm11402_vm4, %v6721_v8, %v6262_v34  ;;  %vm11413_vm4 = vcmask 834560  }
 0x490   :  { %v10161_v25 = vpop.permute.xlu0 %6788 }
 0x491   :  { %6797 = vst.msk [vmem:[#allocation5 + $0x8] sm:$0xff] %vm6502_vm15, %v10161_v25 }
 0x492   :  { %v6270_v13 = vpop.permute.xlu1 %6269  ;;  %6776 = vrot.lane.b32.xlu0 %v11328_v28, %s11017_s15 }
 0x493   :  { %v6725_v55 = vsel %vm11403_vm5, %v6723_v27, %v6270_v13  ;;  %vm11414_vm5 = vcmask 850944  }
 0x496   :  { %v6278_v4 = vpop.permute.xlu1 %6277  ;;  %6799 = vrot.lane.b32.xlu0 %v11328_v28, %s11241_s26 }
 0x497   :  { %v6727_v0 = vsel %vm11404_vm6, %v6725_v55, %v6278_v4  ;;  %vm11415_vm6 = vcmask 867328  }
 0x49a   :  { %v6286_v56 = vpop.permute.xlu1 %6285  ;;  %6815 = vrot.lane.b32.xlu0 %v10154_v59, %s11017_s15 }
 0x49b   :  { %v6729_v30 = vsel %vm11405_vm7, %v6727_v0, %v6286_v56  ;;  %vm11416_vm7 = vcmask 883712  }
 0x49e   :  { %v6294_v17 = vpop.permute.xlu1 %6293  ;;  %6835 = vrot.lane.b32.xlu0 %v10154_v59, %s11241_s26 }
 0x49f   :  { %v6731_v61 = vsel %vm11406_vm9, %v6729_v30, %v6294_v17  ;;  %vm11418_vm9 = vcmask 916480  }
 0x4a2   :  { %v6302_v62 = vpop.permute.xlu1 %6301 }
 0x4a3   :  { %v6733_v5 = vsel %vm11407_vm12, %v6731_v61, %v6302_v62  ;;  %vm11419_vm12 = vcmask 932864  }
 0x4a6   :  { %v6310_v43 = vpop.permute.xlu1 %6309 }
 0x4a7   :  { %v6735_v16 = vsel %vm11408_vm8, %v6733_v5, %v6310_v43  ;;  %vm11420_vm8 = vcmask 949248  }
 0x4aa   :  { %v6318_v37 = vpop.permute.xlu1 %6317 }
 0x4ab   :  { %v6737_v3 = vsel %vm6592_vm13, %v6735_v16, %v6318_v37  ;;  %vm11417_vm13 = vcmask 900096  }
 0x4ae   :  { %v6326_v29 = vpop.permute.xlu1 %6325 }
 0x4af   :  { %v6739_v48 = vsel %vm11409_vm0, %v6737_v3, %v6326_v29  ;;  %vm11421_vm0 = vcmask 1014784  }
 0x4b2   :  { %v6334_v58 = vpop.permute.xlu1 %6333 }
 0x4b3   :  { %v6741_v50 = vsel %vm11410_vm1, %v6739_v48, %v6334_v58  ;;  %vm11422_vm1 = vcmask 1031168  }
 0x4b6   :  { %v6342_v6 = vpop.permute.xlu1 %6341 }
 0x4b7   :  { %v6743_v35 = vsel %vm11411_vm2, %v6741_v50, %v6342_v6 }
 0x4ba   :  { %v6350_v24 = vpop.permute.xlu1 %6349 }
 0x4bb   :  { %v6745_v19 = vsel %vm11412_vm3, %v6743_v35, %v6350_v24 }
 0x4be   :  { %v6358_v51 = vpop.permute.xlu1 %6357 }
 0x4bf   :  { %v6747_v46 = vsel %vm11413_vm4, %v6745_v19, %v6358_v51 }
 0x4c2   :  { %v6366_v18 = vpop.permute.xlu1 %6365 }
 0x4c3   :  { %v6749_v23 = vsel %vm11414_vm5, %v6747_v46, %v6366_v18 }
 0x4c6   :  { %v6374_v9 = vpop.permute.xlu1 %6373 }
 0x4c7   :  { %v6751_v40 = vsel %vm11415_vm6, %v6749_v23, %v6374_v9 }
 0x4ca   :  { %v6382_v12 = vpop.permute.xlu1 %6381 }
 0x4cb   :  { %v6753_v49 = vsel %vm11416_vm7, %v6751_v40, %v6382_v12 }
 0x4ce   :  { %v6390_v10 = vpop.permute.xlu1 %6389 }
 0x4cf   :  { %v6755_v57 = vsel %vm11417_vm13, %v6753_v49, %v6390_v10 }
 0x4d2   :  { %v6398_v20 = vpop.permute.xlu1 %6397 }
 0x4d3   :  { %v6757_v1 = vsel %vm11418_vm9, %v6755_v57, %v6398_v20 }
 0x4d6   :  { %v6406_v41 = vpop.permute.xlu1 %6405 }
 0x4d7   :  { %v6759_v11 = vsel %vm11419_vm12, %v6757_v1, %v6406_v41 }
 0x4da   :  { %v6414_v32 = vpop.permute.xlu1 %6413 }
 0x4db   :  { %v6761_v39 = vsel %vm11420_vm8, %v6759_v11, %v6414_v32 }
 0x4de   :  { %v6422_v52 = vpop.permute.xlu1 %6421 }
 0x4df   :  { %v6763_v47 = vsel %vm6631_vm10, %v6761_v39, %v6422_v52  ;;  %vm6782_vm10 = vcmask 523520  }
 0x4e2   :  { %v6430_v7 = vpop.permute.xlu1 %6429 }
 0x4e3   :  { %v6765_v42 = vsel %vm6634_vm11, %v6763_v47, %v6430_v7  ;;  %vm6785_vm11 = vcmask 785920  }
 0x4e6   :  { %v6438_v14 = vpop.permute.xlu1 %6437 }
 0x4e7   :  { %v6767_v54 = vsel %vm6637_vm14, %v6765_v42, %v6438_v14  ;;  %vm6794_vm14 = vcmask 1048320  }
 0x4ea   :  { %v6446_v33 = vpop.permute.xlu1 %6445 }
 0x4eb   :  { %v6769_v31 = vsel %vm11421_vm0, %v6767_v54, %v6446_v33 }
 0x4ee   :  { %v6454_v2 = vpop.permute.xlu1 %6453 }
 0x4ef   :  { %v6771_v26 = vsel %vm11422_vm1, %v6769_v31, %v6454_v2 }
 0x4f0   :  { %6812 = vst.msk [vmem:[#allocation5 + $0x30] sm:$0xff] %vm6502_vm15, %v6771_v26  ;;  %6827 = vrot.lane.b32.xlu1 %v6771_v26, %s11106_s4 }
 0x4f2   :  { %v6791_v36 = vpop.permute.xlu1 %6790 }
 0x4f3   :  { %6798 = vst.msk [vmem:[#allocation5 + $0x28] sm:$0xff] %vm6502_vm15, %v6791_v36 }
 0x4f4   :  { %6778 = vrot.lane.b32.xlu1 %v9797_v15, %s11017_s15 }
 0x4f8   :  { %6801 = vrot.lane.b32.xlu1 %v9797_v15, %s11241_s26 }
 0x4fc   :  { %6817 = vrot.lane.b32.xlu1 %v6771_v26, %s11017_s15 }
 0x500   :  { %6837 = vrot.lane.b32.xlu1 %v6771_v26, %s11241_s26  ;;  %v6826_v21 = vpop.permute.xlu0 %6825 }
 0x501   :  { %6833 = vst.msk [vmem:[#allocation5 + $0x18] sm:$0xff] %vm6502_vm15, %v6826_v21 }
 0x504   :  { %v6777_v45 = vpop.permute.xlu0 %6776 }
 0x505   :  { %6783 = vst.msk [vmem:[#allocation5] sm:$0xff] %vm6782_vm10, %v6777_v45 }
 0x506   :  { %6786 = vst.msk [vmem:[#allocation5] sm:$0xff] %vm6785_vm11, %v6777_v45 }
 0x507   :  { %6795 = vst.msk [vmem:[#allocation5] sm:$0xff] %vm6794_vm14, %v10161_v25 }
 0x508   :  { %v6800_v63 = vpop.permute.xlu0 %6799 }
 0x509   :  { %6805 = vst.msk [vmem:[#allocation5 + $0x8] sm:$0xff] %vm6782_vm10, %v6800_v63 }
 0x50a   :  { %6807 = vst.msk [vmem:[#allocation5 + $0x8] sm:$0xff] %vm6785_vm11, %v6800_v63 }
 0x50b   :  { %6809 = vst.msk [vmem:[#allocation5 + $0x8] sm:$0xff] %vm6794_vm14, %v11328_v28 }
 0x50c   :  { %v6816_v38 = vpop.permute.xlu0 %6815 }
 0x50d   :  { %6821 = vst.msk [vmem:[#allocation5 + $0x10] sm:$0xff] %vm6782_vm10, %v6816_v38 }
 0x50e   :  { %6823 = vst.msk [vmem:[#allocation5 + $0x10] sm:$0xff] %vm6785_vm11, %v6816_v38 }
 0x50f   :  { %6831 = vst.msk [vmem:[#allocation5 + $0x10] sm:$0xff] %vm6794_vm14, %v6826_v21 }
 0x510   :  { %v6836_v53 = vpop.permute.xlu0 %6835 }
 0x511   :  { %6841 = vst.msk [vmem:[#allocation5 + $0x18] sm:$0xff] %vm6782_vm10, %v6836_v53 }
 0x512   :  { %6843 = vst.msk [vmem:[#allocation5 + $0x18] sm:$0xff] %vm6785_vm11, %v6836_v53 }
 0x513   :  { %6845 = vst.msk [vmem:[#allocation5 + $0x18] sm:$0xff] %vm6794_vm14, %v10154_v59 }
 0x562   :  { %v6828_v60 = vpop.permute.xlu1 %6827 }
 0x563   :  { %6834 = vst.msk [vmem:[#allocation5 + $0x38] sm:$0xff] %vm6502_vm15, %v6828_v60 }
 0x566   :  { %v6779_v8 = vpop.permute.xlu1 %6778 }
 0x567   :  { %6784 = vst.msk [vmem:[#allocation5 + $0x20] sm:$0xff] %vm6782_vm10, %v6779_v8 }
 0x568   :  { %6787 = vst.msk [vmem:[#allocation5 + $0x20] sm:$0xff] %vm6785_vm11, %v6779_v8 }
 0x569   :  { %6796 = vst.msk [vmem:[#allocation5 + $0x20] sm:$0xff] %vm6794_vm14, %v6791_v36 }
 0x56a   :  { %v6802_v28 = vpop.permute.xlu1 %6801 }
 0x56b   :  { %6806 = vst.msk [vmem:[#allocation5 + $0x28] sm:$0xff] %vm6782_vm10, %v6802_v28 }
 0x56c   :  { %6808 = vst.msk [vmem:[#allocation5 + $0x28] sm:$0xff] %vm6785_vm11, %v6802_v28 }
 0x56d   :  { %6810 = vst.msk [vmem:[#allocation5 + $0x28] sm:$0xff] %vm6794_vm14, %v9797_v15 }
 0x56e   :  { %v6818_v22 = vpop.permute.xlu1 %6817 }
 0x56f   :  { %6822 = vst.msk [vmem:[#allocation5 + $0x30] sm:$0xff] %vm6782_vm10, %v6818_v22 }
 0x570   :  { %6824 = vst.msk [vmem:[#allocation5 + $0x30] sm:$0xff] %vm6785_vm11, %v6818_v22 }
 0x571   :  { %6832 = vst.msk [vmem:[#allocation5 + $0x30] sm:$0xff] %vm6794_vm14, %v6828_v60 }
 0x572   :  { %v6838_v44 = vpop.permute.xlu1 %6837 }
 0x573   :  { %6842 = vst.msk [vmem:[#allocation5 + $0x38] sm:$0xff] %vm6782_vm10, %v6838_v44 }
 0x574   :  { %6844 = vst.msk [vmem:[#allocation5 + $0x38] sm:$0xff] %vm6785_vm11, %v6838_v44 }
 0x575   :  { %6846 = vst.msk [vmem:[#allocation5 + $0x38] sm:$0xff] %vm6794_vm14, %v6771_v26 }
 0x576   :  { %6966 = shalt.err (!%p6963_p12)
}
 0x577   :  { %s6967_s10 = scalar_lea.hbm %s10250_s1, 1024 }
 0x578   :  { %p6968_p13 = scmp.ne.s32.totalorder %s10250_s1, %s6967_s10  ;;  %p6971_p0 = scmp.lt.u32.totalorder %s6967_s10, %s10250_s1 }
 0x57a   :  { %p6973_p1 = pnand %p6971_p0, %p6968_p13 }
 0x57c   :  { %6976 = shalt.err (!%p6973_p1)
}
 0x57d   :  { %s7049_s23 = smov 512  }
 0x57e   :  { %6858 = dma.vmem_to_hbm [thread:$0]  %s6853_s30, 1024, %s10250_s1, [#allocation4], %s7049_s23, %s7049_s23, %s11017_s15  }
 0x57f   :  { %6979 = dma.done.wait [#allocation4], 1024  }
 0x580   :  { %6980 = vsyncadd [#allocation4], 4294966272 }
 0x581   :  { %6862 = vsyncpa [#allocation3], 1 }
 0x582   :  { %6863 = vsyncpa [#allocation4], 1 }

</bundles_post_ra>
